<compile_context>
chip_gen: v7x
topology: tpu7x:2x2x1
jax: 0.10.0
libtpu: 0.0.40
codegen_flags: <defaults>
</compile_context>

<pallas_src>
import jax
import jax.numpy as jnp
from jax import lax
from jax.experimental import pallas as pl
from jax.experimental.pallas import tpu as pltpu

K1, P1 = 3, 1       # first conv: kernel 3, padding 1
K2, P2 = 5, 2       # second conv: kernel 5, padding 2
BN_EPS = 1e-5


# ------------------------------------------------------------------ kernel --

def _make_fused_kernel(*, N, H, W, Cin, Cout, Cin_p, Cout_p, LP):
    """Fully-fused conv_block forward.

    refs: x, w1, w2, m1, m2, gb1, gb2 | out | xf1, xf2, im1, im2

    x   : (N, Cin, HW)            input, spatial flattened on lanes
    w1  : (Cout, K1*K1*Cin_p)     matmul-layout weights (zero-padded channels)
    w2  : (Cout, K2*K2*Cout_p)
    m1  : (K1*K1, N*HW)           per-tap validity masks (1.0 / 0.0)
    m2  : (K2*K2, N*HW)
    gb* : (Cout, 2)               [gamma, beta]
    out : (N, Cout, HW)
    xf* : (C_p, LP + N*HW + LP)   zero-halo-padded flattened batch slab
    im* : (C_p*K*K, N*HW)         implicit im2col matrix
    """
    HW = H * W
    NHW = N * HW

    def im2col(xf_ref, m_ref, im_ref, C, ksize, pad):
        # Each tap: one static lane-shifted slice of the padded slab, one
        # per-tap mask multiply, one full-tile store. No reshapes/relayouts.
        for kh in range(ksize):
            for kw in range(ksize):
                t = kh * ksize + kw
                s = LP + (kh - pad) * W + (kw - pad)
                im_ref[t * C:(t + 1) * C, :] = (
                    xf_ref[:, s:s + NHW] * m_ref[t:t + 1, :])

    def bn_relu(y, gb_ref):
        # Training-mode BatchNorm (biased variance) + ReLU, two-pass stats,
        # entirely in registers (y never goes back to HBM).
        inv_cnt = 1.0 / float(NHW)
        mean = jnp.sum(y, axis=1, keepdims=True) * inv_cnt
        d = y - mean
        var = jnp.sum(d * d, axis=1, keepdims=True) * inv_cnt
        scale = gb_ref[:, 0:1] * lax.rsqrt(var + BN_EPS)
        return jnp.maximum(d * scale + gb_ref[:, 1:2], 0.0)

    def kernel(x_ref, w1_ref, w2_ref, m1_ref, m2_ref, gb1_ref, gb2_ref,
               out_ref, xf1_ref, xf2_ref, im1_ref, im2_ref):
        # ---------------- layer 1: conv3x3 -> BN -> ReLU ----------------
        xf1_ref[...] = jnp.zeros_like(xf1_ref)        # single step: zeroed once
        for n in range(N):
            xf1_ref[0:Cin, LP + n * HW:LP + (n + 1) * HW] = x_ref[n]
        im2col(xf1_ref, m1_ref, im1_ref, Cin_p, K1, P1)
        # One fat MXU matmul over the whole batch. No conv bias: it is
        # cancelled exactly by the training-mode BatchNorm that follows.
        y1 = jnp.dot(w1_ref[...], im1_ref[...],
                     preferred_element_type=jnp.float32)      # (Cout, N*HW)
        y1 = bn_relu(y1, gb1_ref)

        # ---------------- layer 2: conv5x5 -> BN -> ReLU ----------------
        xf2_ref[...] = jnp.zeros_like(xf2_ref)
        xf2_ref[0:Cout, LP:LP + NHW] = y1             # stays in VMEM, no HBM
        im2col(xf2_ref, m2_ref, im2_ref, Cout_p, K2, P2)
        y2 = jnp.dot(w2_ref[...], im2_ref[...],
                     preferred_element_type=jnp.float32)      # (Cout, N*HW)
        y2 = bn_relu(y2, gb2_ref)

        for n in range(N):
            out_ref[n] = y2[:, n * HW:(n + 1) * HW]   # lane-dense full stores

    return kernel


# ---------------------------------------------------------------- wrappers --

def _tap_masks(ksize, pad, H, W, N):
    """(K*K, N*HW) mask: 1.0 where tap (kh,kw) reads inside the image."""
    idx = jnp.arange(H * W, dtype=jnp.int32)
    r = idx // W
    c = idx % W
    rows = []
    for kh in range(ksize):
        for kw in range(ksize):
            rr = r + (kh - pad)
            cc = c + (kw - pad)
            ok = (rr >= 0) & (rr < H) & (cc >= 0) & (cc < W)
            rows.append(ok.astype(jnp.float32))
    m = jnp.stack(rows, axis=0)            # (K*K, HW)
    return jnp.tile(m, (1, N))             # same mask for every sample


def _prep_weight(w_oihw, cin_p):
    """(Cout,Cin,K,K) -> (Cout, K*K*Cin_p); zero-pad channels, (kh,kw,ci) order."""
    cout, cin, k, _ = w_oihw.shape
    if cin_p != cin:
        w_oihw = jnp.pad(w_oihw, ((0, 0), (0, cin_p - cin), (0, 0), (0, 0)))
    return jnp.transpose(w_oihw, (0, 2, 3, 1)).reshape(cout, k * k * cin_p)


@jax.jit
def conv_block_forward(x_nchw, params):
    """Full conv_block forward. Input / output NCHW (PyTorch convention)."""
    N, Cin, H, W = x_nchw.shape
    HW = H * W
    NHW = N * HW
    Cout = params["w1"].shape[0]
    Cin_p = ((Cin + 7) // 8) * 8
    Cout_p = ((Cout + 7) // 8) * 8

    # lane-aligned halo pad (covers the largest vertical+horizontal tap shift)
    halo = max(P1 * (W + 1), P2 * (W + 1))
    LP = ((halo + 127) // 128) * 128
    LBUF = LP + NHW + LP

    x = x_nchw.reshape(N, Cin, HW)                       # free trailing reshape
    w1 = _prep_weight(params["w1"], Cin_p)               # (Cout, K1*K1*Cin_p)
    w2 = _prep_weight(params["w2"], Cout_p)              # (Cout, K2*K2*Cout_p)
    m1 = _tap_masks(K1, P1, H, W, N)
    m2 = _tap_masks(K2, P2, H, W, N)
    gb1 = jnp.stack([params["gamma1"], params["beta1"]], axis=1)   # (Cout, 2)
    gb2 = jnp.stack([params["gamma2"], params["beta2"]], axis=1)

    kernel = _make_fused_kernel(N=N, H=H, W=W, Cin=Cin, Cout=Cout,
                                Cin_p=Cin_p, Cout_p=Cout_p, LP=LP)

    out = pl.pallas_call(
        kernel,
        out_shape=jax.ShapeDtypeStruct((N, Cout, HW), jnp.float32),
        grid_spec=pltpu.PrefetchScalarGridSpec(
            num_scalar_prefetch=0,
            grid=(1,),                                    # single fused step
            in_specs=[
                pl.BlockSpec((N, Cin, HW), lambda i: (0, 0, 0)),
                pl.BlockSpec(w1.shape, lambda i: (0, 0)),
                pl.BlockSpec(w2.shape, lambda i: (0, 0)),
                pl.BlockSpec(m1.shape, lambda i: (0, 0)),
                pl.BlockSpec(m2.shape, lambda i: (0, 0)),
                pl.BlockSpec(gb1.shape, lambda i: (0, 0)),
                pl.BlockSpec(gb2.shape, lambda i: (0, 0)),
            ],
            out_specs=pl.BlockSpec((N, Cout, HW), lambda i: (0, 0, 0)),
            scratch_shapes=[
                pltpu.VMEM((Cin_p, LBUF), jnp.float32),
                pltpu.VMEM((Cout_p, LBUF), jnp.float32),
                pltpu.VMEM((K1 * K1 * Cin_p, NHW), jnp.float32),
                pltpu.VMEM((K2 * K2 * Cout_p, NHW), jnp.float32),
            ]),
        compiler_params=pltpu.CompilerParams(
            dimension_semantics=("arbitrary",)),
    )(x, w1, w2, m1, m2, gb1, gb2)

    return out.reshape(N, Cout, H, W)


# ----------------------------------------------------------------- reference -

def _ref_forward(x_nchw, params):
    """Pure-JAX reference (lax conv + bias + training-mode BN + ReLU)."""
    def conv(x, w, b, pad):
        y = lax.conv_general_dilated(
            x, w, window_strides=(1, 1), padding=((pad, pad), (pad, pad)),
            dimension_numbers=("NCHW", "OIHW", "NCHW"))
        return y + b.reshape(1, -1, 1, 1)

    def bn_relu(x, g, bta):
        m = jnp.mean(x, axis=(0, 2, 3), keepdims=True)
        v = jnp.mean(jnp.square(x - m), axis=(0, 2, 3), keepdims=True)  # biased
        y = (x - m) / jnp.sqrt(v + BN_EPS)
        return jnp.maximum(y * g.reshape(1, -1, 1, 1) + bta.reshape(1, -1, 1, 1), 0.0)

    x = bn_relu(conv(x_nchw, params["w1"], params["b1"], P1),
                params["gamma1"], params["beta1"])
    x = bn_relu(conv(x, params["w2"], params["b2"], P2),
                params["gamma2"], params["beta2"])
    return x


# ---------------------------------------------------------------------- main -

if __name__ == "__main__":
    in_ch, out_ch = 4, 8
    N, H, W = 2, 16, 16

    key = jax.random.PRNGKey(0)
    kx, k1, kb1, k2, kb2 = jax.random.split(key, 5)

    x = jax.random.normal(kx, (N, in_ch, H, W), dtype=jnp.float32)   # NCHW

    fan1 = in_ch * K1 * K1
    fan2 = out_ch * K2 * K2
    params = {
        "w1": jax.random.uniform(k1, (out_ch, in_ch, K1, K1), jnp.float32,
                                 -1.0, 1.0) / jnp.sqrt(fan1),
        "b1": jax.random.uniform(kb1, (out_ch,), jnp.float32,
                                 -1.0, 1.0) / jnp.sqrt(fan1),
        "gamma1": jnp.ones((out_ch,), jnp.float32),
        "beta1": jnp.zeros((out_ch,), jnp.float32),
        "w2": jax.random.uniform(k2, (out_ch, out_ch, K2, K2), jnp.float32,
                                 -1.0, 1.0) / jnp.sqrt(fan2),
        "b2": jax.random.uniform(kb2, (out_ch,), jnp.float32,
                                 -1.0, 1.0) / jnp.sqrt(fan2),
        "gamma2": jnp.ones((out_ch,), jnp.float32),
        "beta2": jnp.zeros((out_ch,), jnp.float32),
    }

    out = jax.block_until_ready(conv_block_forward(x, params))
    ref = jax.block_until_ready(_ref_forward(x, params))

    assert out.shape == (N, out_ch, H, W)
    err = float(jnp.max(jnp.abs(out - ref)))
    assert err < 5e-4, f"mismatch vs JAX reference: {err}"

    print("KERNEL_OK")
</pallas_src>

<mosaic_0001>
module attributes {stable_mosaic.version = 11 : i64} {
  func.func @kernel(%arg0: i32, %arg1: memref<2x4x256xf32, #tpu.memory_space<vmem>>, %arg2: memref<8x72xf32, #tpu.memory_space<vmem>>, %arg3: memref<8x200xf32, #tpu.memory_space<vmem>>, %arg4: memref<9x512xf32, #tpu.memory_space<vmem>>, %arg5: memref<25x512xf32, #tpu.memory_space<vmem>>, %arg6: memref<8x2xf32, #tpu.memory_space<vmem>>, %arg7: memref<8x2xf32, #tpu.memory_space<vmem>>, %arg8: memref<2x8x256xf32, #tpu.memory_space<vmem>>, %arg9: memref<8x768xf32, #tpu.memory_space<vmem>>, %arg10: memref<8x768xf32, #tpu.memory_space<vmem>>, %arg11: memref<72x512xf32, #tpu.memory_space<vmem>>, %arg12: memref<200x512xf32, #tpu.memory_space<vmem>>) attributes {dimension_semantics = [#tpu.dimension_semantics<arbitrary>], iteration_bounds = array<i64: 1>, scalar_prefetch = 0 : i64, scratch_operands = 4 : i64, tpu.core_type = #tpu.core_type<tc>, window_params = [{pipeline_mode = #tpu.pipeline_mode<synchronous>, transform_indices = @transform_0, window_bounds = array<i64: 2, 4, 256>}, {pipeline_mode = #tpu.pipeline_mode<synchronous>, transform_indices = @transform_1, window_bounds = array<i64: 8, 72>}, {pipeline_mode = #tpu.pipeline_mode<synchronous>, transform_indices = @transform_2, window_bounds = array<i64: 8, 200>}, {pipeline_mode = #tpu.pipeline_mode<synchronous>, transform_indices = @transform_3, window_bounds = array<i64: 9, 512>}, {pipeline_mode = #tpu.pipeline_mode<synchronous>, transform_indices = @transform_4, window_bounds = array<i64: 25, 512>}, {pipeline_mode = #tpu.pipeline_mode<synchronous>, transform_indices = @transform_5, window_bounds = array<i64: 8, 2>}, {pipeline_mode = #tpu.pipeline_mode<synchronous>, transform_indices = @transform_6, window_bounds = array<i64: 8, 2>}, {pipeline_mode = #tpu.pipeline_mode<synchronous>, transform_indices = @transform_7, window_bounds = array<i64: 2, 8, 256>}]} {
    %cst = arith.constant 0.000000e+00 : f32
    %0 = vector.broadcast %cst : f32 to vector<8x768xf32>
    %c0 = arith.constant 0 : index
    %c0_0 = arith.constant 0 : index
    %1 = vector.load %arg9[%c0, %c0_0] : memref<8x768xf32, #tpu.memory_space<vmem>>, vector<8x768xf32>
    tpu.vector_store %arg9[%c0, %c0_0], %0 {strides = array<i32>} : memref<8x768xf32, #tpu.memory_space<vmem>>, vector<8x768xf32>,
    %c0_1 = arith.constant 0 : index
    %c0_2 = arith.constant 0 : index
    %c0_3 = arith.constant 0 : index
    %2 = vector.load %arg1[%c0_1, %c0_2, %c0_3] : memref<2x4x256xf32, #tpu.memory_space<vmem>>, vector<1x4x256xf32>
    %3 = vector.shape_cast %2 : vector<1x4x256xf32> to vector<4x256xf32>
    %c0_4 = arith.constant 0 : index
    %c128 = arith.constant 128 : index
    %4 = vector.load %arg9[%c0_4, %c128] : memref<8x768xf32, #tpu.memory_space<vmem>>, vector<4x256xf32>
    tpu.vector_store %arg9[%c0_4, %c128], %3 {strides = array<i32>} : memref<8x768xf32, #tpu.memory_space<vmem>>, vector<4x256xf32>,
    %c1 = arith.constant 1 : index
    %c0_5 = arith.constant 0 : index
    %c0_6 = arith.constant 0 : index
    %5 = vector.load %arg1[%c1, %c0_5, %c0_6] : memref<2x4x256xf32, #tpu.memory_space<vmem>>, vector<1x4x256xf32>
    %6 = vector.shape_cast %5 : vector<1x4x256xf32> to vector<4x256xf32>
    %c0_7 = arith.constant 0 : index
    %c384 = arith.constant 384 : index
    %7 = vector.load %arg9[%c0_7, %c384] : memref<8x768xf32, #tpu.memory_space<vmem>>, vector<4x256xf32>
    tpu.vector_store %arg9[%c0_7, %c384], %6 {strides = array<i32>} : memref<8x768xf32, #tpu.memory_space<vmem>>, vector<4x256xf32>,
    %c0_8 = arith.constant 0 : index
    %c111 = arith.constant 111 : index
    %8 = vector.load %arg9[%c0_8, %c111] : memref<8x768xf32, #tpu.memory_space<vmem>>, vector<8x512xf32>
    %c0_9 = arith.constant 0 : index
    %c0_10 = arith.constant 0 : index
    %9 = vector.load %arg4[%c0_9, %c0_10] : memref<9x512xf32, #tpu.memory_space<vmem>>, vector<1x512xf32>
    %10 = vector.broadcast %9 : vector<1x512xf32> to vector<8x512xf32>
    %11 = arith.mulf %8, %10 : vector<8x512xf32>
    %c0_11 = arith.constant 0 : index
    %c0_12 = arith.constant 0 : index
    %12 = vector.load %arg11[%c0_11, %c0_12] : memref<72x512xf32, #tpu.memory_space<vmem>>, vector<8x512xf32>
    tpu.vector_store %arg11[%c0_11, %c0_12], %11 {strides = array<i32>} : memref<72x512xf32, #tpu.memory_space<vmem>>, vector<8x512xf32>,
    %c0_13 = arith.constant 0 : index
    %c112 = arith.constant 112 : index
    %13 = vector.load %arg9[%c0_13, %c112] : memref<8x768xf32, #tpu.memory_space<vmem>>, vector<8x512xf32>
    %c1_14 = arith.constant 1 : index
    %c0_15 = arith.constant 0 : index
    %14 = vector.load %arg4[%c1_14, %c0_15] : memref<9x512xf32, #tpu.memory_space<vmem>>, vector<1x512xf32>
    %15 = vector.broadcast %14 : vector<1x512xf32> to vector<8x512xf32>
    %16 = arith.mulf %13, %15 : vector<8x512xf32>
    %c8 = arith.constant 8 : index
    %c0_16 = arith.constant 0 : index
    %17 = vector.load %arg11[%c8, %c0_16] : memref<72x512xf32, #tpu.memory_space<vmem>>, vector<8x512xf32>
    tpu.vector_store %arg11[%c8, %c0_16], %16 {strides = array<i32>} : memref<72x512xf32, #tpu.memory_space<vmem>>, vector<8x512xf32>,
    %c0_17 = arith.constant 0 : index
    %c113 = arith.constant 113 : index
    %18 = vector.load %arg9[%c0_17, %c113] : memref<8x768xf32, #tpu.memory_space<vmem>>, vector<8x512xf32>
    %c2 = arith.constant 2 : index
    %c0_18 = arith.constant 0 : index
    %19 = vector.load %arg4[%c2, %c0_18] : memref<9x512xf32, #tpu.memory_space<vmem>>, vector<1x512xf32>
    %20 = vector.broadcast %19 : vector<1x512xf32> to vector<8x512xf32>
    %21 = arith.mulf %18, %20 : vector<8x512xf32>
    %c16 = arith.constant 16 : index
    %c0_19 = arith.constant 0 : index
    %22 = vector.load %arg11[%c16, %c0_19] : memref<72x512xf32, #tpu.memory_space<vmem>>, vector<8x512xf32>
    tpu.vector_store %arg11[%c16, %c0_19], %21 {strides = array<i32>} : memref<72x512xf32, #tpu.memory_space<vmem>>, vector<8x512xf32>,
    %c0_20 = arith.constant 0 : index
    %c127 = arith.constant 127 : index
    %23 = vector.load %arg9[%c0_20, %c127] : memref<8x768xf32, #tpu.memory_space<vmem>>, vector<8x512xf32>
    %c3 = arith.constant 3 : index
    %c0_21 = arith.constant 0 : index
    %24 = vector.load %arg4[%c3, %c0_21] : memref<9x512xf32, #tpu.memory_space<vmem>>, vector<1x512xf32>
    %25 = vector.broadcast %24 : vector<1x512xf32> to vector<8x512xf32>
    %26 = arith.mulf %23, %25 : vector<8x512xf32>
    %c24 = arith.constant 24 : index
    %c0_22 = arith.constant 0 : index
    %27 = vector.load %arg11[%c24, %c0_22] : memref<72x512xf32, #tpu.memory_space<vmem>>, vector<8x512xf32>
    tpu.vector_store %arg11[%c24, %c0_22], %26 {strides = array<i32>} : memref<72x512xf32, #tpu.memory_space<vmem>>, vector<8x512xf32>,
    %c0_23 = arith.constant 0 : index
    %c128_24 = arith.constant 128 : index
    %28 = vector.load %arg9[%c0_23, %c128_24] : memref<8x768xf32, #tpu.memory_space<vmem>>, vector<8x512xf32>
    %c4 = arith.constant 4 : index
    %c0_25 = arith.constant 0 : index
    %29 = vector.load %arg4[%c4, %c0_25] : memref<9x512xf32, #tpu.memory_space<vmem>>, vector<1x512xf32>
    %30 = vector.broadcast %29 : vector<1x512xf32> to vector<8x512xf32>
    %31 = arith.mulf %28, %30 : vector<8x512xf32>
    %c32 = arith.constant 32 : index
    %c0_26 = arith.constant 0 : index
    %32 = vector.load %arg11[%c32, %c0_26] : memref<72x512xf32, #tpu.memory_space<vmem>>, vector<8x512xf32>
    tpu.vector_store %arg11[%c32, %c0_26], %31 {strides = array<i32>} : memref<72x512xf32, #tpu.memory_space<vmem>>, vector<8x512xf32>,
    %c0_27 = arith.constant 0 : index
    %c129 = arith.constant 129 : index
    %33 = vector.load %arg9[%c0_27, %c129] : memref<8x768xf32, #tpu.memory_space<vmem>>, vector<8x512xf32>
    %c5 = arith.constant 5 : index
    %c0_28 = arith.constant 0 : index
    %34 = vector.load %arg4[%c5, %c0_28] : memref<9x512xf32, #tpu.memory_space<vmem>>, vector<1x512xf32>
    %35 = vector.broadcast %34 : vector<1x512xf32> to vector<8x512xf32>
    %36 = arith.mulf %33, %35 : vector<8x512xf32>
    %c40 = arith.constant 40 : index
    %c0_29 = arith.constant 0 : index
    %37 = vector.load %arg11[%c40, %c0_29] : memref<72x512xf32, #tpu.memory_space<vmem>>, vector<8x512xf32>
    tpu.vector_store %arg11[%c40, %c0_29], %36 {strides = array<i32>} : memref<72x512xf32, #tpu.memory_space<vmem>>, vector<8x512xf32>,
    %c0_30 = arith.constant 0 : index
    %c143 = arith.constant 143 : index
    %38 = vector.load %arg9[%c0_30, %c143] : memref<8x768xf32, #tpu.memory_space<vmem>>, vector<8x512xf32>
    %c6 = arith.constant 6 : index
    %c0_31 = arith.constant 0 : index
    %39 = vector.load %arg4[%c6, %c0_31] : memref<9x512xf32, #tpu.memory_space<vmem>>, vector<1x512xf32>
    %40 = vector.broadcast %39 : vector<1x512xf32> to vector<8x512xf32>
    %41 = arith.mulf %38, %40 : vector<8x512xf32>
    %c48 = arith.constant 48 : index
    %c0_32 = arith.constant 0 : index
    %42 = vector.load %arg11[%c48, %c0_32] : memref<72x512xf32, #tpu.memory_space<vmem>>, vector<8x512xf32>
    tpu.vector_store %arg11[%c48, %c0_32], %41 {strides = array<i32>} : memref<72x512xf32, #tpu.memory_space<vmem>>, vector<8x512xf32>,
    %c0_33 = arith.constant 0 : index
    %c144 = arith.constant 144 : index
    %43 = vector.load %arg9[%c0_33, %c144] : memref<8x768xf32, #tpu.memory_space<vmem>>, vector<8x512xf32>
    %c7 = arith.constant 7 : index
    %c0_34 = arith.constant 0 : index
    %44 = vector.load %arg4[%c7, %c0_34] : memref<9x512xf32, #tpu.memory_space<vmem>>, vector<1x512xf32>
    %45 = vector.broadcast %44 : vector<1x512xf32> to vector<8x512xf32>
    %46 = arith.mulf %43, %45 : vector<8x512xf32>
    %c56 = arith.constant 56 : index
    %c0_35 = arith.constant 0 : index
    %47 = vector.load %arg11[%c56, %c0_35] : memref<72x512xf32, #tpu.memory_space<vmem>>, vector<8x512xf32>
    tpu.vector_store %arg11[%c56, %c0_35], %46 {strides = array<i32>} : memref<72x512xf32, #tpu.memory_space<vmem>>, vector<8x512xf32>,
    %c0_36 = arith.constant 0 : index
    %c145 = arith.constant 145 : index
    %48 = vector.load %arg9[%c0_36, %c145] : memref<8x768xf32, #tpu.memory_space<vmem>>, vector<8x512xf32>
    %c8_37 = arith.constant 8 : index
    %c0_38 = arith.constant 0 : index
    %49 = vector.load %arg4[%c8_37, %c0_38] : memref<9x512xf32, #tpu.memory_space<vmem>>, vector<1x512xf32>
    %50 = vector.broadcast %49 : vector<1x512xf32> to vector<8x512xf32>
    %51 = arith.mulf %48, %50 : vector<8x512xf32>
    %c64 = arith.constant 64 : index
    %c0_39 = arith.constant 0 : index
    %52 = vector.load %arg11[%c64, %c0_39] : memref<72x512xf32, #tpu.memory_space<vmem>>, vector<8x512xf32>
    tpu.vector_store %arg11[%c64, %c0_39], %51 {strides = array<i32>} : memref<72x512xf32, #tpu.memory_space<vmem>>, vector<8x512xf32>,
    %c0_40 = arith.constant 0 : index
    %c0_41 = arith.constant 0 : index
    %53 = vector.load %arg2[%c0_40, %c0_41] : memref<8x72xf32, #tpu.memory_space<vmem>>, vector<8x72xf32>
    %c0_42 = arith.constant 0 : index
    %c0_43 = arith.constant 0 : index
    %54 = vector.load %arg11[%c0_42, %c0_43] : memref<72x512xf32, #tpu.memory_space<vmem>>, vector<72x512xf32>
    %cst_44 = arith.constant dense<0.000000e+00> : vector<8x512xf32>
    %55 = tpu.matmul %53, %54, %cst_44 {dimension_numbers = #tpu.dot_dimension_numbers<[1], [0], [0], [1], [0, 0, 1, 1], [], []>} : vector<8x72xf32>, vector<72x512xf32>, vector<8x512xf32> -> vector<8x512xf32>
    %cst_45 = arith.constant dense<0.000000e+00> : vector<8xf32>
    %56 = vector.multi_reduction <add>, %55, %cst_45 [1] : vector<8x512xf32> to vector<8xf32>
    %57 = vector.shape_cast %56 : vector<8xf32> to vector<8x1xf32>
    %cst_46 = arith.constant 0.001953125 : f32
    %58 = vector.broadcast %cst_46 : f32 to vector<8x1xf32>
    %59 = arith.mulf %57, %58 : vector<8x1xf32>
    %60 = vector.broadcast %59 : vector<8x1xf32> to vector<8x512xf32>
    %61 = arith.subf %55, %60 : vector<8x512xf32>
    %62 = arith.mulf %61, %61 : vector<8x512xf32>
    %cst_47 = arith.constant dense<0.000000e+00> : vector<8xf32>
    %63 = vector.multi_reduction <add>, %62, %cst_47 [1] : vector<8x512xf32> to vector<8xf32>
    %64 = vector.shape_cast %63 : vector<8xf32> to vector<8x1xf32>
    %cst_48 = arith.constant 0.001953125 : f32
    %65 = vector.broadcast %cst_48 : f32 to vector<8x1xf32>
    %66 = arith.mulf %64, %65 : vector<8x1xf32>
    %c0_49 = arith.constant 0 : index
    %c0_50 = arith.constant 0 : index
    %67 = vector.load %arg6[%c0_49, %c0_50] : memref<8x2xf32, #tpu.memory_space<vmem>>, vector<8x1xf32>
    %cst_51 = arith.constant 9.99999974E-6 : f32
    %68 = vector.broadcast %cst_51 : f32 to vector<8x1xf32>
    %69 = arith.addf %66, %68 : vector<8x1xf32>
    %70 = math.rsqrt %69 : vector<8x1xf32>
    %71 = arith.mulf %67, %70 : vector<8x1xf32>
    %72 = vector.broadcast %71 : vector<8x1xf32> to vector<8x512xf32>
    %73 = arith.mulf %61, %72 : vector<8x512xf32>
    %c0_52 = arith.constant 0 : index
    %c1_53 = arith.constant 1 : index
    %74 = vector.load %arg6[%c0_52, %c1_53] : memref<8x2xf32, #tpu.memory_space<vmem>>, vector<8x1xf32>
    %75 = vector.broadcast %74 : vector<8x1xf32> to vector<8x512xf32>
    %76 = arith.addf %73, %75 : vector<8x512xf32>
    %cst_54 = arith.constant 0.000000e+00 : f32
    %77 = vector.broadcast %cst_54 : f32 to vector<8x512xf32>
    %78 = arith.maximumf %76, %77 : vector<8x512xf32>
    %cst_55 = arith.constant 0.000000e+00 : f32
    %79 = vector.broadcast %cst_55 : f32 to vector<8x768xf32>
    %c0_56 = arith.constant 0 : index
    %c0_57 = arith.constant 0 : index
    %80 = vector.load %arg10[%c0_56, %c0_57] : memref<8x768xf32, #tpu.memory_space<vmem>>, vector<8x768xf32>
    tpu.vector_store %arg10[%c0_56, %c0_57], %79 {strides = array<i32>} : memref<8x768xf32, #tpu.memory_space<vmem>>, vector<8x768xf32>,
    %c0_58 = arith.constant 0 : index
    %c128_59 = arith.constant 128 : index
    %81 = vector.load %arg10[%c0_58, %c128_59] : memref<8x768xf32, #tpu.memory_space<vmem>>, vector<8x512xf32>
    tpu.vector_store %arg10[%c0_58, %c128_59], %78 {strides = array<i32>} : memref<8x768xf32, #tpu.memory_space<vmem>>, vector<8x512xf32>,
    %c0_60 = arith.constant 0 : index
    %c94 = arith.constant 94 : index
    %82 = vector.load %arg10[%c0_60, %c94] : memref<8x768xf32, #tpu.memory_space<vmem>>, vector<8x512xf32>
    %c0_61 = arith.constant 0 : index
    %c0_62 = arith.constant 0 : index
    %83 = vector.load %arg5[%c0_61, %c0_62] : memref<25x512xf32, #tpu.memory_space<vmem>>, vector<1x512xf32>
    %84 = vector.broadcast %83 : vector<1x512xf32> to vector<8x512xf32>
    %85 = arith.mulf %82, %84 : vector<8x512xf32>
    %c0_63 = arith.constant 0 : index
    %c0_64 = arith.constant 0 : index
    %86 = vector.load %arg12[%c0_63, %c0_64] : memref<200x512xf32, #tpu.memory_space<vmem>>, vector<8x512xf32>
    tpu.vector_store %arg12[%c0_63, %c0_64], %85 {strides = array<i32>} : memref<200x512xf32, #tpu.memory_space<vmem>>, vector<8x512xf32>,
    %c0_65 = arith.constant 0 : index
    %c95 = arith.constant 95 : index
    %87 = vector.load %arg10[%c0_65, %c95] : memref<8x768xf32, #tpu.memory_space<vmem>>, vector<8x512xf32>
    %c1_66 = arith.constant 1 : index
    %c0_67 = arith.constant 0 : index
    %88 = vector.load %arg5[%c1_66, %c0_67] : memref<25x512xf32, #tpu.memory_space<vmem>>, vector<1x512xf32>
    %89 = vector.broadcast %88 : vector<1x512xf32> to vector<8x512xf32>
    %90 = arith.mulf %87, %89 : vector<8x512xf32>
    %c8_68 = arith.constant 8 : index
    %c0_69 = arith.constant 0 : index
    %91 = vector.load %arg12[%c8_68, %c0_69] : memref<200x512xf32, #tpu.memory_space<vmem>>, vector<8x512xf32>
    tpu.vector_store %arg12[%c8_68, %c0_69], %90 {strides = array<i32>} : memref<200x512xf32, #tpu.memory_space<vmem>>, vector<8x512xf32>,
    %c0_70 = arith.constant 0 : index
    %c96 = arith.constant 96 : index
    %92 = vector.load %arg10[%c0_70, %c96] : memref<8x768xf32, #tpu.memory_space<vmem>>, vector<8x512xf32>
    %c2_71 = arith.constant 2 : index
    %c0_72 = arith.constant 0 : index
    %93 = vector.load %arg5[%c2_71, %c0_72] : memref<25x512xf32, #tpu.memory_space<vmem>>, vector<1x512xf32>
    %94 = vector.broadcast %93 : vector<1x512xf32> to vector<8x512xf32>
    %95 = arith.mulf %92, %94 : vector<8x512xf32>
    %c16_73 = arith.constant 16 : index
    %c0_74 = arith.constant 0 : index
    %96 = vector.load %arg12[%c16_73, %c0_74] : memref<200x512xf32, #tpu.memory_space<vmem>>, vector<8x512xf32>
    tpu.vector_store %arg12[%c16_73, %c0_74], %95 {strides = array<i32>} : memref<200x512xf32, #tpu.memory_space<vmem>>, vector<8x512xf32>,
    %c0_75 = arith.constant 0 : index
    %c97 = arith.constant 97 : index
    %97 = vector.load %arg10[%c0_75, %c97] : memref<8x768xf32, #tpu.memory_space<vmem>>, vector<8x512xf32>
    %c3_76 = arith.constant 3 : index
    %c0_77 = arith.constant 0 : index
    %98 = vector.load %arg5[%c3_76, %c0_77] : memref<25x512xf32, #tpu.memory_space<vmem>>, vector<1x512xf32>
    %99 = vector.broadcast %98 : vector<1x512xf32> to vector<8x512xf32>
    %100 = arith.mulf %97, %99 : vector<8x512xf32>
    %c24_78 = arith.constant 24 : index
    %c0_79 = arith.constant 0 : index
    %101 = vector.load %arg12[%c24_78, %c0_79] : memref<200x512xf32, #tpu.memory_space<vmem>>, vector<8x512xf32>
    tpu.vector_store %arg12[%c24_78, %c0_79], %100 {strides = array<i32>} : memref<200x512xf32, #tpu.memory_space<vmem>>, vector<8x512xf32>,
    %c0_80 = arith.constant 0 : index
    %c98 = arith.constant 98 : index
    %102 = vector.load %arg10[%c0_80, %c98] : memref<8x768xf32, #tpu.memory_space<vmem>>, vector<8x512xf32>
    %c4_81 = arith.constant 4 : index
    %c0_82 = arith.constant 0 : index
    %103 = vector.load %arg5[%c4_81, %c0_82] : memref<25x512xf32, #tpu.memory_space<vmem>>, vector<1x512xf32>
    %104 = vector.broadcast %103 : vector<1x512xf32> to vector<8x512xf32>
    %105 = arith.mulf %102, %104 : vector<8x512xf32>
    %c32_83 = arith.constant 32 : index
    %c0_84 = arith.constant 0 : index
    %106 = vector.load %arg12[%c32_83, %c0_84] : memref<200x512xf32, #tpu.memory_space<vmem>>, vector<8x512xf32>
    tpu.vector_store %arg12[%c32_83, %c0_84], %105 {strides = array<i32>} : memref<200x512xf32, #tpu.memory_space<vmem>>, vector<8x512xf32>,
    %c0_85 = arith.constant 0 : index
    %c110 = arith.constant 110 : index
    %107 = vector.load %arg10[%c0_85, %c110] : memref<8x768xf32, #tpu.memory_space<vmem>>, vector<8x512xf32>
    %c5_86 = arith.constant 5 : index
    %c0_87 = arith.constant 0 : index
    %108 = vector.load %arg5[%c5_86, %c0_87] : memref<25x512xf32, #tpu.memory_space<vmem>>, vector<1x512xf32>
    %109 = vector.broadcast %108 : vector<1x512xf32> to vector<8x512xf32>
    %110 = arith.mulf %107, %109 : vector<8x512xf32>
    %c40_88 = arith.constant 40 : index
    %c0_89 = arith.constant 0 : index
    %111 = vector.load %arg12[%c40_88, %c0_89] : memref<200x512xf32, #tpu.memory_space<vmem>>, vector<8x512xf32>
    tpu.vector_store %arg12[%c40_88, %c0_89], %110 {strides = array<i32>} : memref<200x512xf32, #tpu.memory_space<vmem>>, vector<8x512xf32>,
    %c0_90 = arith.constant 0 : index
    %c111_91 = arith.constant 111 : index
    %112 = vector.load %arg10[%c0_90, %c111_91] : memref<8x768xf32, #tpu.memory_space<vmem>>, vector<8x512xf32>
    %c6_92 = arith.constant 6 : index
    %c0_93 = arith.constant 0 : index
    %113 = vector.load %arg5[%c6_92, %c0_93] : memref<25x512xf32, #tpu.memory_space<vmem>>, vector<1x512xf32>
    %114 = vector.broadcast %113 : vector<1x512xf32> to vector<8x512xf32>
    %115 = arith.mulf %112, %114 : vector<8x512xf32>
    %c48_94 = arith.constant 48 : index
    %c0_95 = arith.constant 0 : index
    %116 = vector.load %arg12[%c48_94, %c0_95] : memref<200x512xf32, #tpu.memory_space<vmem>>, vector<8x512xf32>
    tpu.vector_store %arg12[%c48_94, %c0_95], %115 {strides = array<i32>} : memref<200x512xf32, #tpu.memory_space<vmem>>, vector<8x512xf32>,
    %c0_96 = arith.constant 0 : index
    %c112_97 = arith.constant 112 : index
    %117 = vector.load %arg10[%c0_96, %c112_97] : memref<8x768xf32, #tpu.memory_space<vmem>>, vector<8x512xf32>
    %c7_98 = arith.constant 7 : index
    %c0_99 = arith.constant 0 : index
    %118 = vector.load %arg5[%c7_98, %c0_99] : memref<25x512xf32, #tpu.memory_space<vmem>>, vector<1x512xf32>
    %119 = vector.broadcast %118 : vector<1x512xf32> to vector<8x512xf32>
    %120 = arith.mulf %117, %119 : vector<8x512xf32>
    %c56_100 = arith.constant 56 : index
    %c0_101 = arith.constant 0 : index
    %121 = vector.load %arg12[%c56_100, %c0_101] : memref<200x512xf32, #tpu.memory_space<vmem>>, vector<8x512xf32>
    tpu.vector_store %arg12[%c56_100, %c0_101], %120 {strides = array<i32>} : memref<200x512xf32, #tpu.memory_space<vmem>>, vector<8x512xf32>,
    %c0_102 = arith.constant 0 : index
    %c113_103 = arith.constant 113 : index
    %122 = vector.load %arg10[%c0_102, %c113_103] : memref<8x768xf32, #tpu.memory_space<vmem>>, vector<8x512xf32>
    %c8_104 = arith.constant 8 : index
    %c0_105 = arith.constant 0 : index
    %123 = vector.load %arg5[%c8_104, %c0_105] : memref<25x512xf32, #tpu.memory_space<vmem>>, vector<1x512xf32>
    %124 = vector.broadcast %123 : vector<1x512xf32> to vector<8x512xf32>
    %125 = arith.mulf %122, %124 : vector<8x512xf32>
    %c64_106 = arith.constant 64 : index
    %c0_107 = arith.constant 0 : index
    %126 = vector.load %arg12[%c64_106, %c0_107] : memref<200x512xf32, #tpu.memory_space<vmem>>, vector<8x512xf32>
    tpu.vector_store %arg12[%c64_106, %c0_107], %125 {strides = array<i32>} : memref<200x512xf32, #tpu.memory_space<vmem>>, vector<8x512xf32>,
    %c0_108 = arith.constant 0 : index
    %c114 = arith.constant 114 : index
    %127 = vector.load %arg10[%c0_108, %c114] : memref<8x768xf32, #tpu.memory_space<vmem>>, vector<8x512xf32>
    %c9 = arith.constant 9 : index
    %c0_109 = arith.constant 0 : index
    %128 = vector.load %arg5[%c9, %c0_109] : memref<25x512xf32, #tpu.memory_space<vmem>>, vector<1x512xf32>
    %129 = vector.broadcast %128 : vector<1x512xf32> to vector<8x512xf32>
    %130 = arith.mulf %127, %129 : vector<8x512xf32>
    %c72 = arith.constant 72 : index
    %c0_110 = arith.constant 0 : index
    %131 = vector.load %arg12[%c72, %c0_110] : memref<200x512xf32, #tpu.memory_space<vmem>>, vector<8x512xf32>
    tpu.vector_store %arg12[%c72, %c0_110], %130 {strides = array<i32>} : memref<200x512xf32, #tpu.memory_space<vmem>>, vector<8x512xf32>,
    %c0_111 = arith.constant 0 : index
    %c126 = arith.constant 126 : index
    %132 = vector.load %arg10[%c0_111, %c126] : memref<8x768xf32, #tpu.memory_space<vmem>>, vector<8x512xf32>
    %c10 = arith.constant 10 : index
    %c0_112 = arith.constant 0 : index
    %133 = vector.load %arg5[%c10, %c0_112] : memref<25x512xf32, #tpu.memory_space<vmem>>, vector<1x512xf32>
    %134 = vector.broadcast %133 : vector<1x512xf32> to vector<8x512xf32>
    %135 = arith.mulf %132, %134 : vector<8x512xf32>
    %c80 = arith.constant 80 : index
    %c0_113 = arith.constant 0 : index
    %136 = vector.load %arg12[%c80, %c0_113] : memref<200x512xf32, #tpu.memory_space<vmem>>, vector<8x512xf32>
    tpu.vector_store %arg12[%c80, %c0_113], %135 {strides = array<i32>} : memref<200x512xf32, #tpu.memory_space<vmem>>, vector<8x512xf32>,
    %c0_114 = arith.constant 0 : index
    %c127_115 = arith.constant 127 : index
    %137 = vector.load %arg10[%c0_114, %c127_115] : memref<8x768xf32, #tpu.memory_space<vmem>>, vector<8x512xf32>
    %c11 = arith.constant 11 : index
    %c0_116 = arith.constant 0 : index
    %138 = vector.load %arg5[%c11, %c0_116] : memref<25x512xf32, #tpu.memory_space<vmem>>, vector<1x512xf32>
    %139 = vector.broadcast %138 : vector<1x512xf32> to vector<8x512xf32>
    %140 = arith.mulf %137, %139 : vector<8x512xf32>
    %c88 = arith.constant 88 : index
    %c0_117 = arith.constant 0 : index
    %141 = vector.load %arg12[%c88, %c0_117] : memref<200x512xf32, #tpu.memory_space<vmem>>, vector<8x512xf32>
    tpu.vector_store %arg12[%c88, %c0_117], %140 {strides = array<i32>} : memref<200x512xf32, #tpu.memory_space<vmem>>, vector<8x512xf32>,
    %c0_118 = arith.constant 0 : index
    %c128_119 = arith.constant 128 : index
    %142 = vector.load %arg10[%c0_118, %c128_119] : memref<8x768xf32, #tpu.memory_space<vmem>>, vector<8x512xf32>
    %c12 = arith.constant 12 : index
    %c0_120 = arith.constant 0 : index
    %143 = vector.load %arg5[%c12, %c0_120] : memref<25x512xf32, #tpu.memory_space<vmem>>, vector<1x512xf32>
    %144 = vector.broadcast %143 : vector<1x512xf32> to vector<8x512xf32>
    %145 = arith.mulf %142, %144 : vector<8x512xf32>
    %c96_121 = arith.constant 96 : index
    %c0_122 = arith.constant 0 : index
    %146 = vector.load %arg12[%c96_121, %c0_122] : memref<200x512xf32, #tpu.memory_space<vmem>>, vector<8x512xf32>
    tpu.vector_store %arg12[%c96_121, %c0_122], %145 {strides = array<i32>} : memref<200x512xf32, #tpu.memory_space<vmem>>, vector<8x512xf32>,
    %c0_123 = arith.constant 0 : index
    %c129_124 = arith.constant 129 : index
    %147 = vector.load %arg10[%c0_123, %c129_124] : memref<8x768xf32, #tpu.memory_space<vmem>>, vector<8x512xf32>
    %c13 = arith.constant 13 : index
    %c0_125 = arith.constant 0 : index
    %148 = vector.load %arg5[%c13, %c0_125] : memref<25x512xf32, #tpu.memory_space<vmem>>, vector<1x512xf32>
    %149 = vector.broadcast %148 : vector<1x512xf32> to vector<8x512xf32>
    %150 = arith.mulf %147, %149 : vector<8x512xf32>
    %c104 = arith.constant 104 : index
    %c0_126 = arith.constant 0 : index
    %151 = vector.load %arg12[%c104, %c0_126] : memref<200x512xf32, #tpu.memory_space<vmem>>, vector<8x512xf32>
    tpu.vector_store %arg12[%c104, %c0_126], %150 {strides = array<i32>} : memref<200x512xf32, #tpu.memory_space<vmem>>, vector<8x512xf32>,
    %c0_127 = arith.constant 0 : index
    %c130 = arith.constant 130 : index
    %152 = vector.load %arg10[%c0_127, %c130] : memref<8x768xf32, #tpu.memory_space<vmem>>, vector<8x512xf32>
    %c14 = arith.constant 14 : index
    %c0_128 = arith.constant 0 : index
    %153 = vector.load %arg5[%c14, %c0_128] : memref<25x512xf32, #tpu.memory_space<vmem>>, vector<1x512xf32>
    %154 = vector.broadcast %153 : vector<1x512xf32> to vector<8x512xf32>
    %155 = arith.mulf %152, %154 : vector<8x512xf32>
    %c112_129 = arith.constant 112 : index
    %c0_130 = arith.constant 0 : index
    %156 = vector.load %arg12[%c112_129, %c0_130] : memref<200x512xf32, #tpu.memory_space<vmem>>, vector<8x512xf32>
    tpu.vector_store %arg12[%c112_129, %c0_130], %155 {strides = array<i32>} : memref<200x512xf32, #tpu.memory_space<vmem>>, vector<8x512xf32>,
    %c0_131 = arith.constant 0 : index
    %c142 = arith.constant 142 : index
    %157 = vector.load %arg10[%c0_131, %c142] : memref<8x768xf32, #tpu.memory_space<vmem>>, vector<8x512xf32>
    %c15 = arith.constant 15 : index
    %c0_132 = arith.constant 0 : index
    %158 = vector.load %arg5[%c15, %c0_132] : memref<25x512xf32, #tpu.memory_space<vmem>>, vector<1x512xf32>
    %159 = vector.broadcast %158 : vector<1x512xf32> to vector<8x512xf32>
    %160 = arith.mulf %157, %159 : vector<8x512xf32>
    %c120 = arith.constant 120 : index
    %c0_133 = arith.constant 0 : index
    %161 = vector.load %arg12[%c120, %c0_133] : memref<200x512xf32, #tpu.memory_space<vmem>>, vector<8x512xf32>
    tpu.vector_store %arg12[%c120, %c0_133], %160 {strides = array<i32>} : memref<200x512xf32, #tpu.memory_space<vmem>>, vector<8x512xf32>,
    %c0_134 = arith.constant 0 : index
    %c143_135 = arith.constant 143 : index
    %162 = vector.load %arg10[%c0_134, %c143_135] : memref<8x768xf32, #tpu.memory_space<vmem>>, vector<8x512xf32>
    %c16_136 = arith.constant 16 : index
    %c0_137 = arith.constant 0 : index
    %163 = vector.load %arg5[%c16_136, %c0_137] : memref<25x512xf32, #tpu.memory_space<vmem>>, vector<1x512xf32>
    %164 = vector.broadcast %163 : vector<1x512xf32> to vector<8x512xf32>
    %165 = arith.mulf %162, %164 : vector<8x512xf32>
    %c128_138 = arith.constant 128 : index
    %c0_139 = arith.constant 0 : index
    %166 = vector.load %arg12[%c128_138, %c0_139] : memref<200x512xf32, #tpu.memory_space<vmem>>, vector<8x512xf32>
    tpu.vector_store %arg12[%c128_138, %c0_139], %165 {strides = array<i32>} : memref<200x512xf32, #tpu.memory_space<vmem>>, vector<8x512xf32>,
    %c0_140 = arith.constant 0 : index
    %c144_141 = arith.constant 144 : index
    %167 = vector.load %arg10[%c0_140, %c144_141] : memref<8x768xf32, #tpu.memory_space<vmem>>, vector<8x512xf32>
    %c17 = arith.constant 17 : index
    %c0_142 = arith.constant 0 : index
    %168 = vector.load %arg5[%c17, %c0_142] : memref<25x512xf32, #tpu.memory_space<vmem>>, vector<1x512xf32>
    %169 = vector.broadcast %168 : vector<1x512xf32> to vector<8x512xf32>
    %170 = arith.mulf %167, %169 : vector<8x512xf32>
    %c136 = arith.constant 136 : index
    %c0_143 = arith.constant 0 : index
    %171 = vector.load %arg12[%c136, %c0_143] : memref<200x512xf32, #tpu.memory_space<vmem>>, vector<8x512xf32>
    tpu.vector_store %arg12[%c136, %c0_143], %170 {strides = array<i32>} : memref<200x512xf32, #tpu.memory_space<vmem>>, vector<8x512xf32>,
    %c0_144 = arith.constant 0 : index
    %c145_145 = arith.constant 145 : index
    %172 = vector.load %arg10[%c0_144, %c145_145] : memref<8x768xf32, #tpu.memory_space<vmem>>, vector<8x512xf32>
    %c18 = arith.constant 18 : index
    %c0_146 = arith.constant 0 : index
    %173 = vector.load %arg5[%c18, %c0_146] : memref<25x512xf32, #tpu.memory_space<vmem>>, vector<1x512xf32>
    %174 = vector.broadcast %173 : vector<1x512xf32> to vector<8x512xf32>
    %175 = arith.mulf %172, %174 : vector<8x512xf32>
    %c144_147 = arith.constant 144 : index
    %c0_148 = arith.constant 0 : index
    %176 = vector.load %arg12[%c144_147, %c0_148] : memref<200x512xf32, #tpu.memory_space<vmem>>, vector<8x512xf32>
    tpu.vector_store %arg12[%c144_147, %c0_148], %175 {strides = array<i32>} : memref<200x512xf32, #tpu.memory_space<vmem>>, vector<8x512xf32>,
    %c0_149 = arith.constant 0 : index
    %c146 = arith.constant 146 : index
    %177 = vector.load %arg10[%c0_149, %c146] : memref<8x768xf32, #tpu.memory_space<vmem>>, vector<8x512xf32>
    %c19 = arith.constant 19 : index
    %c0_150 = arith.constant 0 : index
    %178 = vector.load %arg5[%c19, %c0_150] : memref<25x512xf32, #tpu.memory_space<vmem>>, vector<1x512xf32>
    %179 = vector.broadcast %178 : vector<1x512xf32> to vector<8x512xf32>
    %180 = arith.mulf %177, %179 : vector<8x512xf32>
    %c152 = arith.constant 152 : index
    %c0_151 = arith.constant 0 : index
    %181 = vector.load %arg12[%c152, %c0_151] : memref<200x512xf32, #tpu.memory_space<vmem>>, vector<8x512xf32>
    tpu.vector_store %arg12[%c152, %c0_151], %180 {strides = array<i32>} : memref<200x512xf32, #tpu.memory_space<vmem>>, vector<8x512xf32>,
    %c0_152 = arith.constant 0 : index
    %c158 = arith.constant 158 : index
    %182 = vector.load %arg10[%c0_152, %c158] : memref<8x768xf32, #tpu.memory_space<vmem>>, vector<8x512xf32>
    %c20 = arith.constant 20 : index
    %c0_153 = arith.constant 0 : index
    %183 = vector.load %arg5[%c20, %c0_153] : memref<25x512xf32, #tpu.memory_space<vmem>>, vector<1x512xf32>
    %184 = vector.broadcast %183 : vector<1x512xf32> to vector<8x512xf32>
    %185 = arith.mulf %182, %184 : vector<8x512xf32>
    %c160 = arith.constant 160 : index
    %c0_154 = arith.constant 0 : index
    %186 = vector.load %arg12[%c160, %c0_154] : memref<200x512xf32, #tpu.memory_space<vmem>>, vector<8x512xf32>
    tpu.vector_store %arg12[%c160, %c0_154], %185 {strides = array<i32>} : memref<200x512xf32, #tpu.memory_space<vmem>>, vector<8x512xf32>,
    %c0_155 = arith.constant 0 : index
    %c159 = arith.constant 159 : index
    %187 = vector.load %arg10[%c0_155, %c159] : memref<8x768xf32, #tpu.memory_space<vmem>>, vector<8x512xf32>
    %c21 = arith.constant 21 : index
    %c0_156 = arith.constant 0 : index
    %188 = vector.load %arg5[%c21, %c0_156] : memref<25x512xf32, #tpu.memory_space<vmem>>, vector<1x512xf32>
    %189 = vector.broadcast %188 : vector<1x512xf32> to vector<8x512xf32>
    %190 = arith.mulf %187, %189 : vector<8x512xf32>
    %c168 = arith.constant 168 : index
    %c0_157 = arith.constant 0 : index
    %191 = vector.load %arg12[%c168, %c0_157] : memref<200x512xf32, #tpu.memory_space<vmem>>, vector<8x512xf32>
    tpu.vector_store %arg12[%c168, %c0_157], %190 {strides = array<i32>} : memref<200x512xf32, #tpu.memory_space<vmem>>, vector<8x512xf32>,
    %c0_158 = arith.constant 0 : index
    %c160_159 = arith.constant 160 : index
    %192 = vector.load %arg10[%c0_158, %c160_159] : memref<8x768xf32, #tpu.memory_space<vmem>>, vector<8x512xf32>
    %c22 = arith.constant 22 : index
    %c0_160 = arith.constant 0 : index
    %193 = vector.load %arg5[%c22, %c0_160] : memref<25x512xf32, #tpu.memory_space<vmem>>, vector<1x512xf32>
    %194 = vector.broadcast %193 : vector<1x512xf32> to vector<8x512xf32>
    %195 = arith.mulf %192, %194 : vector<8x512xf32>
    %c176 = arith.constant 176 : index
    %c0_161 = arith.constant 0 : index
    %196 = vector.load %arg12[%c176, %c0_161] : memref<200x512xf32, #tpu.memory_space<vmem>>, vector<8x512xf32>
    tpu.vector_store %arg12[%c176, %c0_161], %195 {strides = array<i32>} : memref<200x512xf32, #tpu.memory_space<vmem>>, vector<8x512xf32>,
    %c0_162 = arith.constant 0 : index
    %c161 = arith.constant 161 : index
    %197 = vector.load %arg10[%c0_162, %c161] : memref<8x768xf32, #tpu.memory_space<vmem>>, vector<8x512xf32>
    %c23 = arith.constant 23 : index
    %c0_163 = arith.constant 0 : index
    %198 = vector.load %arg5[%c23, %c0_163] : memref<25x512xf32, #tpu.memory_space<vmem>>, vector<1x512xf32>
    %199 = vector.broadcast %198 : vector<1x512xf32> to vector<8x512xf32>
    %200 = arith.mulf %197, %199 : vector<8x512xf32>
    %c184 = arith.constant 184 : index
    %c0_164 = arith.constant 0 : index
    %201 = vector.load %arg12[%c184, %c0_164] : memref<200x512xf32, #tpu.memory_space<vmem>>, vector<8x512xf32>
    tpu.vector_store %arg12[%c184, %c0_164], %200 {strides = array<i32>} : memref<200x512xf32, #tpu.memory_space<vmem>>, vector<8x512xf32>,
    %c0_165 = arith.constant 0 : index
    %c162 = arith.constant 162 : index
    %202 = vector.load %arg10[%c0_165, %c162] : memref<8x768xf32, #tpu.memory_space<vmem>>, vector<8x512xf32>
    %c24_166 = arith.constant 24 : index
    %c0_167 = arith.constant 0 : index
    %203 = vector.load %arg5[%c24_166, %c0_167] : memref<25x512xf32, #tpu.memory_space<vmem>>, vector<1x512xf32>
    %204 = vector.broadcast %203 : vector<1x512xf32> to vector<8x512xf32>
    %205 = arith.mulf %202, %204 : vector<8x512xf32>
    %c192 = arith.constant 192 : index
    %c0_168 = arith.constant 0 : index
    %206 = vector.load %arg12[%c192, %c0_168] : memref<200x512xf32, #tpu.memory_space<vmem>>, vector<8x512xf32>
    tpu.vector_store %arg12[%c192, %c0_168], %205 {strides = array<i32>} : memref<200x512xf32, #tpu.memory_space<vmem>>, vector<8x512xf32>,
    %c0_169 = arith.constant 0 : index
    %c0_170 = arith.constant 0 : index
    %207 = vector.load %arg3[%c0_169, %c0_170] : memref<8x200xf32, #tpu.memory_space<vmem>>, vector<8x200xf32>
    %c0_171 = arith.constant 0 : index
    %c0_172 = arith.constant 0 : index
    %208 = vector.load %arg12[%c0_171, %c0_172] : memref<200x512xf32, #tpu.memory_space<vmem>>, vector<200x512xf32>
    %cst_173 = arith.constant dense<0.000000e+00> : vector<8x512xf32>
    %209 = tpu.matmul %207, %208, %cst_173 {dimension_numbers = #tpu.dot_dimension_numbers<[1], [0], [0], [1], [0, 0, 1, 1], [], []>} : vector<8x200xf32>, vector<200x512xf32>, vector<8x512xf32> -> vector<8x512xf32>
    %cst_174 = arith.constant dense<0.000000e+00> : vector<8xf32>
    %210 = vector.multi_reduction <add>, %209, %cst_174 [1] : vector<8x512xf32> to vector<8xf32>
    %211 = vector.shape_cast %210 : vector<8xf32> to vector<8x1xf32>
    %cst_175 = arith.constant 0.001953125 : f32
    %212 = vector.broadcast %cst_175 : f32 to vector<8x1xf32>
    %213 = arith.mulf %211, %212 : vector<8x1xf32>
    %214 = vector.broadcast %213 : vector<8x1xf32> to vector<8x512xf32>
    %215 = arith.subf %209, %214 : vector<8x512xf32>
    %216 = arith.mulf %215, %215 : vector<8x512xf32>
    %cst_176 = arith.constant dense<0.000000e+00> : vector<8xf32>
    %217 = vector.multi_reduction <add>, %216, %cst_176 [1] : vector<8x512xf32> to vector<8xf32>
    %218 = vector.shape_cast %217 : vector<8xf32> to vector<8x1xf32>
    %cst_177 = arith.constant 0.001953125 : f32
    %219 = vector.broadcast %cst_177 : f32 to vector<8x1xf32>
    %220 = arith.mulf %218, %219 : vector<8x1xf32>
    %c0_178 = arith.constant 0 : index
    %c0_179 = arith.constant 0 : index
    %221 = vector.load %arg7[%c0_178, %c0_179] : memref<8x2xf32, #tpu.memory_space<vmem>>, vector<8x1xf32>
    %cst_180 = arith.constant 9.99999974E-6 : f32
    %222 = vector.broadcast %cst_180 : f32 to vector<8x1xf32>
    %223 = arith.addf %220, %222 : vector<8x1xf32>
    %224 = math.rsqrt %223 : vector<8x1xf32>
    %225 = arith.mulf %221, %224 : vector<8x1xf32>
    %226 = vector.broadcast %225 : vector<8x1xf32> to vector<8x512xf32>
    %227 = arith.mulf %215, %226 : vector<8x512xf32>
    %c0_181 = arith.constant 0 : index
    %c1_182 = arith.constant 1 : index
    %228 = vector.load %arg7[%c0_181, %c1_182] : memref<8x2xf32, #tpu.memory_space<vmem>>, vector<8x1xf32>
    %229 = vector.broadcast %228 : vector<8x1xf32> to vector<8x512xf32>
    %230 = arith.addf %227, %229 : vector<8x512xf32>
    %cst_183 = arith.constant 0.000000e+00 : f32
    %231 = vector.broadcast %cst_183 : f32 to vector<8x512xf32>
    %232 = arith.maximumf %230, %231 : vector<8x512xf32>
    %233 = vector.extract_strided_slice %232 {offsets = [0, 0], sizes = [8, 256], strides = [1, 1]} : vector<8x512xf32> to vector<8x256xf32>
    %c0_184 = arith.constant 0 : index
    %c0_185 = arith.constant 0 : index
    %c0_186 = arith.constant 0 : index
    %234 = vector.load %arg8[%c0_184, %c0_185, %c0_186] : memref<2x8x256xf32, #tpu.memory_space<vmem>>, vector<1x8x256xf32>
    %235 = vector.shape_cast %234 : vector<1x8x256xf32> to vector<8x256xf32>
    %236 = vector.shape_cast %233 : vector<8x256xf32> to vector<1x8x256xf32>
    tpu.vector_store %arg8[%c0_184, %c0_185, %c0_186], %236 {strides = array<i32>} : memref<2x8x256xf32, #tpu.memory_space<vmem>>, vector<1x8x256xf32>,
    %237 = vector.extract_strided_slice %232 {offsets = [0, 256], sizes = [8, 256], strides = [1, 1]} : vector<8x512xf32> to vector<8x256xf32>
    %c1_187 = arith.constant 1 : index
    %c0_188 = arith.constant 0 : index
    %c0_189 = arith.constant 0 : index
    %238 = vector.load %arg8[%c1_187, %c0_188, %c0_189] : memref<2x8x256xf32, #tpu.memory_space<vmem>>, vector<1x8x256xf32>
    %239 = vector.shape_cast %238 : vector<1x8x256xf32> to vector<8x256xf32>
    %240 = vector.shape_cast %237 : vector<8x256xf32> to vector<1x8x256xf32>
    tpu.vector_store %arg8[%c1_187, %c0_188, %c0_189], %240 {strides = array<i32>} : memref<2x8x256xf32, #tpu.memory_space<vmem>>, vector<1x8x256xf32>,
    return
  }
  func.func @transform_0(%arg0: i32) -> (i32, i32, i32) {
    %c0_i32 = arith.constant 0 : i32
    %c0_i32_0 = arith.constant 0 : i32
    %c0_i32_1 = arith.constant 0 : i32
    %c0_i32_2 = arith.constant 0 : i32
    return %c0_i32, %c0_i32_0, %c0_i32_1 : i32, i32, i32
  }
  func.func @transform_1(%arg0: i32) -> (i32, i32) {
    %c0_i32 = arith.constant 0 : i32
    %c0_i32_0 = arith.constant 0 : i32
    %c0_i32_1 = arith.constant 0 : i32
    return %c0_i32, %c0_i32_0 : i32, i32
  }
  func.func @transform_2(%arg0: i32) -> (i32, i32) {
    %c0_i32 = arith.constant 0 : i32
    %c0_i32_0 = arith.constant 0 : i32
    %c0_i32_1 = arith.constant 0 : i32
    return %c0_i32, %c0_i32_0 : i32, i32
  }
  func.func @transform_3(%arg0: i32) -> (i32, i32) {
    %c0_i32 = arith.constant 0 : i32
    %c0_i32_0 = arith.constant 0 : i32
    %c0_i32_1 = arith.constant 0 : i32
    return %c0_i32, %c0_i32_0 : i32, i32
  }
  func.func @transform_4(%arg0: i32) -> (i32, i32) {
    %c0_i32 = arith.constant 0 : i32
    %c0_i32_0 = arith.constant 0 : i32
    %c0_i32_1 = arith.constant 0 : i32
    return %c0_i32, %c0_i32_0 : i32, i32
  }
  func.func @transform_5(%arg0: i32) -> (i32, i32) {
    %c0_i32 = arith.constant 0 : i32
    %c0_i32_0 = arith.constant 0 : i32
    %c0_i32_1 = arith.constant 0 : i32
    return %c0_i32, %c0_i32_0 : i32, i32
  }
  func.func @transform_6(%arg0: i32) -> (i32, i32) {
    %c0_i32 = arith.constant 0 : i32
    %c0_i32_0 = arith.constant 0 : i32
    %c0_i32_1 = arith.constant 0 : i32
    return %c0_i32, %c0_i32_0 : i32, i32
  }
  func.func @transform_7(%arg0: i32) -> (i32, i32, i32) {
    %c0_i32 = arith.constant 0 : i32
    %c0_i32_0 = arith.constant 0 : i32
    %c0_i32_1 = arith.constant 0 : i32
    %c0_i32_2 = arith.constant 0 : i32
    return %c0_i32, %c0_i32_0, %c0_i32_1 : i32, i32, i32
  }
}

</mosaic_0001>

<bundles_post_ra>
// kernel: conv_block_forward.1
= control target key start
LH: loop header
LB: loop body
LE: loop exit
PB: predicated region body
PF: predicated region fallthrough
CT: control target
= control target key end

     0   :  { %v52_v0 = vlaneseq  ;;  %v3485_v1 = vmov 0.0   ;;  %s3486_s9 = smov 111   ;;  %s3487_s10 = smov 112   ;;  %vm5497_vm0 = vcmask 908288   ;;  %vm5500_vm1 = vcmask 916480   ;;  %s5426_s3 = inlined_call_operand.vmem [shape: f32[9,512], index: 3, kind: input, shape index: {}]   ;;  %s5427_s0 = inlined_call_operand.vmem [shape: f32[2,4,256], index: 0, kind: input, shape index: {}]   ;;  %s5428_s4 = inlined_call_operand.vmem [shape: f32[25,512], index: 4, kind: input, shape index: {}]   ;;  %s5429_s5 = inlined_call_operand.vmem [shape: f32[8,2], index: 5, kind: input, shape index: {}]   ;;  %s5430_s1 = inlined_call_operand.vmem [shape: f32[8,72], index: 1, kind: input, shape index: {}]   ;;  %s5431_s2 = inlined_call_operand.vmem [shape: f32[8,200], index: 2, kind: input, shape index: {}]   ;;  %s5432_s6 = inlined_call_operand.vmem [shape: f32[8,2], index: 6, kind: input, shape index: {}]   ;;  %s5433_s7 = inlined_call_operand.vmem [shape: f32[2,8,256], index: 7, kind: output, shape index: {}]  }
   0x1   :  { %27 = vst [vmem:[#allocation2 + $0x8] sm:$0xff] %v3485_v1  ;;  %28 = vst [vmem:[#allocation2 + $0x10] sm:$0xff] %v3485_v1  ;;  %768 = vmatprep.mubr.f32.mxu0 %v3485_v1  ;;  %839 = vmatprep.mubr.f32.mxu1 %v3485_v1  ;;  %v50_v3 = vld [vmem:[%s5426_s3] ss:$8 sm:$0xf]  ;;  %s3488_s14 = smov 113  }
   0x2   :  { %29 = vst [vmem:[#allocation2 + $0x18] sm:$0xff] %v3485_v1  ;;  %30 = vst [vmem:[#allocation2 + $0x20] sm:$0xff] %v3485_v1  ;;  %v53_v2 = vshrl.u32 %v52_v0, 7  ;;  %v32_v4 = vld [vmem:[%s5427_s0] sm:$0xff]  ;;  %v2982_v12 = vld [vmem:[%s5427_s0 + $0x8] sm:$0xff]  ;;  %s3489_s15 = smov 127  }
   0x3   :  { %36 = vst [vmem:[#allocation2 + $0x8] sm:$0xf] %v32_v4  ;;  %v2983_v8 = vld [vmem:[%s5426_s3 + $0x1] ss:$8 sm:$0xf]  ;;  %v34_v9 = vcombine.high %v32_v4, %v32_v4  ;;  %v41_v18 = vcombine.high %v2982_v12, %v2982_v12  ;;  %s3490_s18 = smov 1  }
   0x4   :  { %v3558_v5 = vsub.s32 2, %v53_v2  ;;  %v3560_v6 = vsub.s32 0, %v53_v2  ;;  %v3562_v7 = vsub.s32 1, %v53_v2  ;;  %43 = vst [vmem:[#allocation2 + $0x18] sm:$0xf] %v2982_v12  ;;  %v3580_v17 = vsub.s32 3, %v53_v2 }
   0x5   :  { %37 = vst [vmem:[#allocation2 + $0x10] sm:$0xf] %v34_v9  ;;  %44 = vst [vmem:[#allocation2 + $0x20] sm:$0xf] %v41_v18  ;;  %s3491_s23 = smov 15   ;;  %s3492_s24 = smov 16  }
   0x6   :  { %5503 = vst [vmem:[#allocation6_spill] sm:$0xff] %v3558_v5  ;;  %5504 = vst [vmem:[#allocation7_spill] sm:$0xff] %v3560_v6  ;;  %v63_v10 = vrot.slane %v50_v3, %v3558_v5  ;;  %v55_v11 = vrot.slane %v50_v3, %v3560_v6  ;;  %v129_v13 = vrot.slane %v2983_v8, %v3560_v6  ;;  %v2984_v21 = vld [vmem:[%s5426_s3 + $0x2] ss:$8 sm:$0xf]  ;;  %s3493_s27 = smov 17  }
   0x7   :  { %5505 = vst [vmem:[#allocation8_spill] sm:$0xff] %v3562_v7  ;;  %v59_v14 = vrot.slane %v50_v3, %v3562_v7  ;;  %v137_v15 = vrot.slane %v2983_v8, %v3558_v5  ;;  %v133_v16 = vrot.slane %v2983_v8, %v3562_v7  ;;  %5506 = vst [vmem:[#allocation9_spill] sm:$0xff] %v3580_v17  ;;  %v2985_v24 = vld [vmem:[%s5426_s3 + $0x3] ss:$8 sm:$0xf]  ;;  %vm5501_vm2 = vcmask 924672  }
   0x8   :  { %72 = vrot.lane.b32.xlu1 %v63_v10, %s3486_s9  ;;  %68 = vrot.lane.b32.xlu0 %v55_v11, %s3486_s9  ;;  %v141_v19 = vrot.slane %v2983_v8, %v3580_v17  ;;  %v67_v20 = vrot.slane %v50_v3, %v3580_v17  ;;  %v207_v22 = vrot.slane %v2984_v21, %v3562_v7  ;;  %v2987_v31 = vld [vmem:[%s5426_s3 + $0x5] ss:$8 sm:$0xf]  ;;  %v2988_v36 = vld [vmem:[%s5426_s3 + $0x6] ss:$8 sm:$0xf] }
   0x9   :  { %v203_v23 = vrot.slane %v2984_v21, %v3560_v6  ;;  %v277_v25 = vrot.slane %v2985_v24, %v3560_v6  ;;  %v211_v26 = vrot.slane %v2984_v21, %v3558_v5  ;;  %v285_v27 = vrot.slane %v2985_v24, %v3558_v5  ;;  %v2989_v39 = vld [vmem:[%s5426_s3 + $0x7] ss:$8 sm:$0xf]  ;;  %v2990_v46 = vld [vmem:[%s5426_s3 + $0x20] ss:$8 sm:$0xf] }
   0xa   :  { %v281_v28 = vrot.slane %v2985_v24, %v3562_v7  ;;  %v289_v29 = vrot.slane %v2985_v24, %v3580_v17  ;;  %v215_v30 = vrot.slane %v2984_v21, %v3580_v17  ;;  %v390_v32 = vrot.slane %v2987_v31, %v3562_v7  ;;  %s3495_s0 = smov 94   ;;  %s3496_s13 = smov 96  }
   0xb   :  { %v386_v33 = vrot.slane %v2987_v31, %v3560_v6  ;;  %v398_v34 = vrot.slane %v2987_v31, %v3580_v17  ;;  %v394_v35 = vrot.slane %v2987_v31, %v3558_v5  ;;  %v462_v37 = vrot.slane %v2988_v36, %v3562_v7  ;;  %s3498_s25 = smov 95   ;;  %s3499_s26 = smov 98  }
   0xc   :  { %142 = vrot.lane.b32.xlu1 %v129_v13, %s3487_s10  ;;  %70 = vrot.lane.b32.xlu0 %v59_v14, %s3486_s9  ;;  %v458_v38 = vrot.slane %v2988_v36, %v3560_v6  ;;  %v530_v40 = vrot.slane %v2989_v39, %v3560_v6  ;;  %v466_v41 = vrot.slane %v2988_v36, %v3558_v5  ;;  %v3658_v57 = vld [vmem:[#allocation2 + $0x20] sm:$0xff]  ;;  %v3701_v24 = vld [vmem:[#allocation2 + $0x10] sm:$0xff]  ;;  %vm298_vm3 = vcmask 1039360   ;;  %s3500_s30 = smov 110   ;;  %s3502_s17 = smov 126  }
   0xd   :  { %v538_v42 = vrot.slane %v2989_v39, %v3558_v5  ;;  %v534_v43 = vrot.slane %v2989_v39, %v3562_v7  ;;  %v542_v44 = vrot.slane %v2989_v39, %v3580_v17  ;;  %v470_v45 = vrot.slane %v2988_v36, %v3580_v17  ;;  %s3503_s29 = smov 2   ;;  %s3504_s8 = smov 14  }
   0xe   :  { %v606_v47 = vrot.slane %v2990_v46, %v3562_v7  ;;  %v602_v48 = vrot.slane %v2990_v46, %v3560_v6  ;;  %v610_v49 = vrot.slane %v2990_v46, %v3558_v5  ;;  %v614_v50 = vrot.slane %v2990_v46, %v3580_v17  ;;  %s3505_s28 = smov 18   ;;  %s3506_s16 = smov 30  }
   0xf   :  { %vm327_vm4 = vcmask 7168   ;;  %vm179_vm5 = vcmask 130048   ;;  %vm253_vm6 = vcmask 121856   ;;  %vm105_vm7 = vcmask 138240   ;;  %s3507_s21 = smov 31   ;;  %s3508_s11 = smov 32  }
  0x10   :  { %146 = vrot.lane.b32.xlu1 %v137_v15, %s3487_s10  ;;  %144 = vrot.lane.b32.xlu0 %v133_v16, %s3487_s10  ;;  %vm5477_vm8 = vcmask 588800   ;;  %s3509_s20 = smov 33   ;;  %s3510_s12 = smov 34   ;;  %vm1258_vm9 = vcmask 244736   ;;  %vm1110_vm10 = vcmask 261120   ;;  %vm1184_vm11 = vcmask 252928  }
  0x11   :  { %vm1036_vm12 = vcmask 269312   ;;  %vm5478_vm13 = vcmask 769024   ;;  %vm5481_vm14 = vcmask 777216   ;;  %vm5484_vm15 = vcmask 785408  }
  0x14   :  { %148 = vrot.lane.b32.xlu1 %v141_v19, %s3487_s10  ;;  %74 = vrot.lane.b32.xlu0 %v67_v20, %s3486_s9 }
  0x18   :  { %218 = vrot.lane.b32.xlu1 %v207_v22, %s3488_s14  ;;  %216 = vrot.lane.b32.xlu0 %v203_v23, %s3488_s14  ;;  %v3699_v23 = vld [vmem:[#allocation2 + $0x8] sm:$0xff] }
  0x1c   :  { %290 = vrot.lane.b32.xlu1 %v277_v25, %s3489_s15  ;;  %220 = vrot.lane.b32.xlu0 %v211_v26, %s3488_s14 }
  0x20   :  { %294 = vrot.lane.b32.xlu1 %v285_v27, %s3489_s15  ;;  %292 = vrot.lane.b32.xlu0 %v281_v28, %s3489_s15 }
  0x24   :  { %296 = vrot.lane.b32.xlu1 %v289_v29, %s3489_s15  ;;  %222 = vrot.lane.b32.xlu0 %v215_v30, %s3488_s14 }
  0x28   :  { %401 = vrot.lane.b32.xlu1 %v390_v32, %s3490_s18  ;;  %399 = vrot.lane.b32.xlu0 %v386_v33, %s3490_s18 }
  0x2c   :  { %405 = vrot.lane.b32.xlu1 %v398_v34, %s3490_s18  ;;  %403 = vrot.lane.b32.xlu0 %v394_v35, %s3490_s18  ;;  %v3717_v35 = vld [vmem:[#allocation2 + $0x18] sm:$0xff] }
  0x30   :  { %473 = vrot.lane.b32.xlu1 %v462_v37, %s3491_s23  ;;  %471 = vrot.lane.b32.xlu0 %v458_v38, %s3491_s23 }
  0x34   :  { %543 = vrot.lane.b32.xlu1 %v530_v40, %s3492_s24  ;;  %475 = vrot.lane.b32.xlu0 %v466_v41, %s3491_s23 }
  0x38   :  { %547 = vrot.lane.b32.xlu1 %v538_v42, %s3492_s24  ;;  %545 = vrot.lane.b32.xlu0 %v534_v43, %s3492_s24 }
  0x3c   :  { %549 = vrot.lane.b32.xlu1 %v542_v44, %s3492_s24  ;;  %477 = vrot.lane.b32.xlu0 %v470_v45, %s3491_s23 }
  0x40   :  { %617 = vrot.lane.b32.xlu1 %v606_v47, %s3493_s27  ;;  %615 = vrot.lane.b32.xlu0 %v602_v48, %s3493_s27 }
  0x44   :  { %619 = vrot.lane.b32.xlu0 %v610_v49, %s3493_s27  ;;  %621 = vrot.lane.b32.xlu1 %v614_v50, %s3493_s27 }
  0x7a   :  { %v73_v51 = vpop.permute.xlu1 %72  ;;  %v3654_v52 = vpop.permute.xlu0 %68 }
  0x7b   :  { %v85_v45 = vmul.f32 0.0, %v3654_v52 }
  0x7e   :  { %v3656_v53 = vpop.permute.xlu1 %142  ;;  %v71_v54 = vpop.permute.xlu0 %70 }
  0x7f   :  { %v77_v25 = vsel %vm5497_vm0, %v3654_v52, %v71_v54  ;;  %v78_v26 = vsel %vm5497_vm0, %v71_v54, %v73_v51  ;;  %v159_v49 = vmul.f32 0.0, %v3656_v53 }
  0x80   :  { %v86_v27 = vmul.f32 %v77_v25, %v3699_v23  ;;  %v87_v28 = vmul.f32 %v78_v26, %v3701_v24 }
  0x82   :  { %v147_v55 = vpop.permute.xlu1 %146  ;;  %v145_v56 = vpop.permute.xlu0 %144  ;;  %v3176_v40 = vpack.i.bf16 %v87_v28, %v86_v27 }
  0x83   :  { %v151_v31 = vsel %vm5500_vm1, %v3656_v53, %v145_v56  ;;  %v152_v32 = vsel %vm5500_vm1, %v145_v56, %v147_v55 }
  0x84   :  { %v160_v37 = vmul.f32 %v151_v31, %v3699_v23  ;;  %v161_v38 = vmul.f32 %v152_v32, %v3701_v24 }
  0x86   :  { %v149_v58 = vpop.permute.xlu1 %148  ;;  %v75_v59 = vpop.permute.xlu0 %74  ;;  %v3181_v50 = vpack.i.bf16 %v161_v38, %v160_v37 }
  0x87   :  { %v163_v60 = vmul.f32 %v149_v58, %v3658_v57  ;;  %v89_v61 = vmul.f32 %v3658_v57, %v75_v59  ;;  %v79_v36 = vsel %vm5497_vm0, %v73_v51, %v75_v59  ;;  %v153_v41 = vsel %vm5500_vm1, %v147_v55, %v149_v58 }
  0x88   :  { %v88_v42 = vmul.f32 %v3717_v35, %v79_v36  ;;  %v162_v47 = vmul.f32 %v153_v41, %v3717_v35 }
  0x89   :  { %103 = vrot.lane.b32.xlu0 %v89_v61, %s3493_s27  ;;  %177 = vrot.lane.b32.xlu1 %v163_v60, %s3492_s24 }
  0x8a   :  { %v219_v62 = vpop.permute.xlu1 %218  ;;  %v3664_v63 = vpop.permute.xlu0 %216  ;;  %v3186_v51 = vpack.i.bf16 %v88_v42, %v85_v45  ;;  %v3191_v58 = vpack.i.bf16 %v162_v47, %v159_v49 }
  0x8b   :  { %v225_v46 = vsel %vm5501_vm2, %v3664_v63, %v219_v62 }
  0x8c   :  { %v234_v54 = vmul.f32 %v225_v46, %v3699_v23 }
  0x8e   :  { %v3666_v0 = vpop.permute.xlu1 %290  ;;  %v221_v1 = vpop.permute.xlu0 %220 }
  0x8f   :  { %v226_v43 = vsel %vm5501_vm2, %v219_v62, %v221_v1 }
  0x90   :  { %v235_v48 = vmul.f32 %v226_v43, %v3701_v24 }
  0x92   :  { %v3668_v2 = vpop.permute.xlu1 %294  ;;  %v293_v3 = vpop.permute.xlu0 %292  ;;  %v3196_v59 = vpack.i.bf16 %v235_v48, %v234_v54  ;;  %v5434_v48 = vmov 1   ;;  %v2994_v54 = vld [vmem:[%s5428_s4 + $0x2] ss:$8 sm:$0xf] }
  0x93   :  { %v299_v52 = vsel %vm298_vm3, %v3666_v0, %v293_v3  ;;  %v300_v55 = vsel %vm298_vm3, %v293_v3, %v3668_v2  ;;  %v233_v3 = vmul.f32 0.0, %v3664_v63  ;;  %3246 = vset.pattern.permute.xlu1 %v5434_v48 }
  0x94   :  { %v308_v53 = vmul.f32 %v299_v52, %v3699_v23  ;;  %v309_v60 = vmul.f32 %v300_v55, %v3701_v24  ;;  %v1060_v52 = vrot.slane %v2994_v54, %v3560_v6  ;;  %v3833_v55 = vld [vmem:[%s5429_s5] sm:$0xff]  ;;  %s3497_s5 = smov 97  }
  0x96   :  { %v3670_v4 = vpop.permute.xlu1 %296  ;;  %v223_v8 = vpop.permute.xlu0 %222 }
  0x97   :  { %v311_v9 = vmul.f32 %v3670_v4, %v3658_v57  ;;  %v237_v10 = vmul.f32 %v223_v8, %v3658_v57  ;;  %v227_v56 = vsel %vm5501_vm2, %v221_v1, %v223_v8  ;;  %v301_v61 = vsel %vm298_vm3, %v3668_v2, %v3670_v4 }
  0x98   :  { %v236_v62 = vmul.f32 %v227_v56, %v3717_v35  ;;  %v310_v8 = vmul.f32 %v301_v61, %v3717_v35  ;;  %v3201_v4 = vpack.i.bf16 %v309_v60, %v308_v53 }
  0x99   :  { %251 = vrot.lane.b32.xlu0 %v237_v10, %s3491_s23  ;;  %325 = vrot.lane.b32.xlu1 %v311_v9, %s3490_s18 }
  0x9a   :  { %v3677_v11 = vpop.permute.xlu1 %401  ;;  %v3679_v12 = vpop.permute.xlu0 %399  ;;  %v3206_v10 = vpack.i.bf16 %v236_v62, %v233_v3  ;;  %v1072_v62 = vrot.slane %v2994_v54, %v3580_v17  ;;  %v2996_v3 = vld [vmem:[%s5428_s4 + $0x4] ss:$8 sm:$0xf] }
  0x9b   :  { %v407_v9 = vsel %vm327_vm4, %v3679_v12, %v3677_v11  ;;  %v415_v32 = vmul.f32 %v3679_v12, %v3699_v23 }
  0x9e   :  { %v3681_v13 = vpop.permute.xlu1 %405  ;;  %v3683_v14 = vpop.permute.xlu0 %403 }
  0x9f   :  { %v419_v15 = vmul.f32 0.0, %v3681_v13  ;;  %v408_v1 = vsel %vm327_vm4, %v3677_v11, %v3683_v14  ;;  %v409_v63 = vsel %vm327_vm4, %v3683_v14, %v3681_v13  ;;  %v416_v11 = vmul.f32 %v407_v9, %v3701_v24 }
  0xa0   :  { %v417_v2 = vmul.f32 %v408_v1, %v3717_v35  ;;  %v418_v27 = vmul.f32 %v409_v63, %v3658_v57  ;;  %v2993_v1 = vld [vmem:[%s5428_s4 + $0x1] ss:$8 sm:$0xf]  ;;  %v1208_v9 = vrot.slane %v2996_v3, %v3560_v6 }
  0xa1   :  { %433 = vrot.lane.b32.xlu0 %v419_v15, %s3489_s15  ;;  %v307_v15 = vmul.f32 0.0, %v3666_v0 }
  0xa2   :  { %v3687_v16 = vpop.permute.xlu1 %473  ;;  %v3689_v18 = vpop.permute.xlu0 %471  ;;  %v3216_v28 = vpack.i.bf16 %v417_v2, %v416_v11  ;;  %v3221_v38 = vpack.i.bf16 %v418_v27, %v415_v32  ;;  %v990_v2 = vrot.slane %v2993_v1, %v3562_v7  ;;  %v2998_v11 = vld [vmem:[%s5428_s4 + $0x6] ss:$8 sm:$0xf] }
  0xa3   :  { %v3211_v0 = vpack.i.bf16 %v310_v8, %v307_v15  ;;  %v986_v8 = vrot.slane %v2993_v1, %v3560_v6  ;;  %v994_v15 = vrot.slane %v2993_v1, %v3558_v5  ;;  %v1356_v27 = vrot.slane %v2998_v11, %v3560_v6 }
  0xa6   :  { %v3691_v19 = vpop.permute.xlu1 %543  ;;  %v3693_v20 = vpop.permute.xlu0 %475 }
  0xa7   :  { %v480_v31 = vsel %vm253_vm6, %v3687_v16, %v3693_v20 }
  0xaa   :  { %v3695_v21 = vpop.permute.xlu1 %547  ;;  %v3697_v22 = vpop.permute.xlu0 %545 }
  0xab   :  { %v551_v25 = vsel %vm179_vm5, %v3691_v19, %v3697_v22  ;;  %v552_v26 = vsel %vm179_vm5, %v3697_v22, %v3695_v21 }
  0xac   :  { %v560_v13 = vmul.f32 %v551_v25, %v3701_v24  ;;  %v561_v14 = vmul.f32 %v552_v26, %v3717_v35  ;;  %v998_v25 = vrot.slane %v2993_v1, %v3580_v17  ;;  %v1220_v26 = vrot.slane %v2996_v3, %v3580_v17 }
  0xae   :  { %v3708_v29 = vpop.permute.xlu1 %549  ;;  %v3710_v30 = vpop.permute.xlu0 %477 }
  0xaf   :  { %v563_v33 = vmul.f32 0.0, %v3708_v29  ;;  %v491_v34 = vmul.f32 0.0, %v3710_v30  ;;  %v553_v22 = vsel %vm179_vm5, %v3695_v21, %v3708_v29  ;;  %v481_v12 = vsel %vm253_vm6, %v3693_v20, %v3710_v30 }
  0xb0   :  { %v562_v36 = vmul.f32 %v553_v22, %v3658_v57  ;;  %v559_v29 = vmul.f32 %v3691_v19, %v3699_v23  ;;  %v490_v42 = vmul.f32 %v481_v12, %v3658_v57  ;;  %v487_v20 = vmul.f32 %v3689_v18, %v3699_v23 }
  0xb1   :  { %505 = vrot.lane.b32.xlu1 %v491_v34, %s3488_s14  ;;  %577 = vrot.lane.b32.xlu0 %v563_v33, %s3487_s10  ;;  %v479_v33 = vsel %vm253_vm6, %v3689_v18, %v3687_v16  ;;  %v489_v34 = vmul.f32 %v480_v31, %v3717_v35 }
  0xb2   :  { %v3724_v39 = vpop.permute.xlu0 %615  ;;  %v618_v37 = vpop.permute.xlu1 %617  ;;  %v488_v21 = vmul.f32 %v479_v33, %v3701_v24  ;;  %v3236_v46 = vpack.i.bf16 %v490_v42, %v487_v20  ;;  %v1368_v33 = vrot.slane %v2998_v11, %v3580_v17 }
  0xb3   :  { %v631_v44 = vmul.f32 %v3724_v39, %v3699_v23  ;;  %v623_v47 = vsel %vm105_vm7, %v3724_v39, %v618_v37 }
  0xb4   :  { %v3226_v43 = vpack.i.bf16 %v489_v34, %v488_v21  ;;  %v632_v49 = vmul.f32 %v623_v47, %v3701_v24  ;;  %v3900_v34 = vld [vmem:[%s5428_s4 + $0x20] ss:$8 sm:$0xf] }
  0xb5   :  { %641 = vrot.lane.b32.xlu1 %v631_v44, %s3486_s9  ;;  %3177 = vrot.lane.b32.xlu0 %v3176_v40, %s3493_s27  ;;  %v3231_v40 = vpack.i.bf16 %v561_v14, %v560_v13  ;;  %v3241_v44 = vpack.i.bf16 %v562_v36, %v559_v29  ;;  %v1364_v14 = vrot.slane %v2998_v11, %v3558_v5 }
  0xb6   :  { %v620_v41 = vpop.permute.xlu0 %619  ;;  %v622_v45 = vpop.permute.xlu1 %621  ;;  %v1212_v36 = vrot.slane %v2996_v3, %v3562_v7  ;;  %v1360_v29 = vrot.slane %v2998_v11, %v3562_v7 }
  0xb7   :  { %v624_v16 = vsel %vm105_vm7, %v618_v37, %v620_v41  ;;  %v625_v30 = vsel %vm105_vm7, %v620_v41, %v622_v45  ;;  %v1500_v37 = vrot.slane %v3900_v34, %v3560_v6 }
  0xb8   :  { %v633_v19 = vmul.f32 %v624_v16, %v3717_v35  ;;  %v634_v18 = vmul.f32 %v625_v30, %v3658_v57 }
  0xb9   :  { %3182 = vrot.lane.b32.xlu1 %v3181_v50, %s3492_s24  ;;  %3187 = vrot.lane.b32.xlu0 %v3186_v51, %s3493_s27  ;;  %v907_v50 = vld [vmem:[%s5428_s4] ss:$8 sm:$0xf]  ;;  %v635_v51 = vmul.f32 0.0, %v622_v45 }
  0xba   :  { %v924_v39 = vrot.slane %v907_v50, %v3580_v17  ;;  %v912_v56 = vrot.slane %v907_v50, %v3560_v6  ;;  %v916_v53 = vrot.slane %v907_v50, %v3562_v7  ;;  %v920_v61 = vrot.slane %v907_v50, %v3558_v5 }
  0xbd   :  { %3192 = vrot.lane.b32.xlu1 %v3191_v58, %s3492_s24  ;;  %3197 = vrot.lane.b32.xlu0 %v3196_v59, %s3491_s23  ;;  %v1068_v58 = vrot.slane %v2994_v54, %v3558_v5  ;;  %v2995_v59 = vld [vmem:[%s5428_s4 + $0x3] ss:$8 sm:$0xf] }
  0xbe   :  { %v1138_v60 = vrot.slane %v2995_v59, %v3562_v7  ;;  %v1134_v13 = vrot.slane %v2995_v59, %v3560_v6  ;;  %v1142_v31 = vrot.slane %v2995_v59, %v3558_v5  ;;  %v1146_v32 = vrot.slane %v2995_v59, %v3580_v17 }
  0xc1   :  { %3202 = vrot.lane.b32.xlu1 %v3201_v4, %s3490_s18  ;;  %3207 = vrot.lane.b32.xlu0 %v3206_v10, %s3491_s23  ;;  %v1216_v4 = vrot.slane %v2996_v3, %v3558_v5  ;;  %v2997_v10 = vld [vmem:[%s5428_s4 + $0x5] ss:$8 sm:$0xf] }
  0xc2   :  { %v1286_v63 = vrot.slane %v2997_v10, %v3562_v7  ;;  %v1290_v41 = vrot.slane %v2997_v10, %v3558_v5  ;;  %v1294_v12 = vrot.slane %v2997_v10, %v3580_v17 }
  0xc5   :  { %3212 = vrot.lane.b32.xlu1 %v3211_v0, %s3490_s18  ;;  %3217 = vrot.lane.b32.xlu0 %v3216_v28, %s3489_s15  ;;  %v1064_v0 = vrot.slane %v2994_v54, %v3562_v7  ;;  %v2999_v28 = vld [vmem:[%s5428_s4 + $0x7] ss:$8 sm:$0xf] }
  0xc6   :  { %v1432_v22 = vrot.slane %v2999_v28, %v3562_v7  ;;  %v1436_v20 = vrot.slane %v2999_v28, %v3558_v5 }
  0xc9   :  { %3222 = vrot.lane.b32.xlu1 %v3221_v38, %s3489_s15  ;;  %3232 = vrot.lane.b32.xlu0 %v3231_v40, %s3487_s10  ;;  %v1282_v38 = vrot.slane %v2997_v10, %v3560_v6  ;;  %v1508_v40 = vrot.slane %v3900_v34, %v3558_v5 }
  0xcd   :  { %3227 = vrot.lane.b32.xlu1 %v3226_v43, %s3488_s14  ;;  %3242 = vrot.lane.b32.xlu0 %v3241_v44, %s3487_s10  ;;  %v1428_v43 = vrot.slane %v2999_v28, %v3560_v6 }
  0xd1   :  { %3237 = vrot.lane.b32.xlu1 %v3236_v46, %s3488_s14  ;;  %645 = vrot.lane.b32.xlu0 %v633_v19, %s3486_s9  ;;  %v1440_v46 = vrot.slane %v2999_v28, %v3580_v17 }
  0xd5   :  { %643 = vrot.lane.b32.xlu1 %v632_v49, %s3486_s9  ;;  %647 = vrot.lane.b32.xlu0 %v634_v18, %s3486_s9  ;;  %v1504_v49 = vrot.slane %v3900_v34, %v3562_v7 }
  0xd9   :  { %649 = vrot.lane.b32.xlu1 %v635_v51, %s3486_s9  ;;  %931 = vrot.lane.b32.xlu0 %v924_v39, %s3495_s0 }
  0xdd   :  { %881 = vperm.xlu1 %3246, %v3833_v55   ;;  %1073 = vrot.lane.b32.xlu0 %v1060_v52, %s3496_s13 }
  0xe1   :  { %925 = vrot.lane.b32.xlu1 %v912_v56, %s3495_s0  ;;  %1077 = vrot.lane.b32.xlu0 %v1068_v58, %s3496_s13 }
  0xe5   :  { %927 = vrot.lane.b32.xlu1 %v916_v53, %s3495_s0  ;;  %1149 = vrot.lane.b32.xlu0 %v1138_v60, %s3497_s5  ;;  %v2986_v53 = vld [vmem:[%s5426_s3 + $0x4] ss:$8 sm:$0xf] }
  0xe9   :  { %929 = vrot.lane.b32.xlu1 %v920_v61, %s3495_s0  ;;  %1079 = vrot.lane.b32.xlu0 %v1072_v62, %s3496_s13 }
  0xed   :  { %999 = vrot.lane.b32.xlu1 %v986_v8, %s3498_s25  ;;  %1221 = vrot.lane.b32.xlu0 %v1208_v9, %s3499_s26 }
  0xf1   :  { %1001 = vrot.lane.b32.xlu1 %v990_v2, %s3498_s25  ;;  %1225 = vrot.lane.b32.xlu0 %v1216_v4, %s3499_s26  ;;  %v354_v2 = vrot.slane %v2986_v53, %v3562_v7  ;;  %v350_v4 = vrot.slane %v2986_v53, %v3560_v6 }
  0xf5   :  { %1003 = vrot.lane.b32.xlu1 %v994_v15, %s3498_s25  ;;  %1297 = vrot.lane.b32.xlu0 %v1286_v63, %s3500_s30 }
  0xf9   :  { %1005 = vrot.lane.b32.xlu1 %v998_v25, %s3498_s25  ;;  %1227 = vrot.lane.b32.xlu0 %v1220_v26, %s3499_s26 }
  0xfb   :  { %v104_v21 = vpop.permute.xlu0 %103  ;;  %v178_v16 = vpop.permute.xlu1 %177 }
  0xfd   :  { %1075 = vrot.lane.b32.xlu1 %v1064_v0, %s3496_s13  ;;  %1369 = vrot.lane.b32.xlu0 %v1356_v27, %s3486_s9 }
 0x101   :  { %1147 = vrot.lane.b32.xlu1 %v1134_v13, %s3497_s5  ;;  %1373 = vrot.lane.b32.xlu0 %v1364_v14, %s3486_s9 }
 0x105   :  { %1151 = vrot.lane.b32.xlu1 %v1142_v31, %s3497_s5  ;;  %1443 = vrot.lane.b32.xlu0 %v1432_v22, %s3487_s10 }
 0x109   :  { %1153 = vrot.lane.b32.xlu1 %v1146_v32, %s3497_s5  ;;  %1375 = vrot.lane.b32.xlu0 %v1368_v33, %s3486_s9  ;;  %v362_v32 = vrot.slane %v2986_v53, %v3580_v17 }
 0x10b   :  { %v3919_v42 = vpop.permute.xlu0 %251  ;;  %v3923_v44 = vpop.permute.xlu1 %325 }
 0x10d   :  { %1223 = vrot.lane.b32.xlu1 %v1212_v36, %s3499_s26  ;;  %1513 = vrot.lane.b32.xlu0 %v1500_v37, %s3488_s14 }
 0x111   :  { %1295 = vrot.lane.b32.xlu1 %v1282_v38, %s3500_s30  ;;  %1517 = vrot.lane.b32.xlu0 %v1508_v40, %s3488_s14  ;;  %v358_v40 = vrot.slane %v2986_v53, %v3558_v5 }
 0x113   :  { %v3925_v45 = vpop.permute.xlu0 %433 }
 0x115   :  { %1299 = vrot.lane.b32.xlu1 %v1290_v41, %s3500_s30 }
 0x119   :  { %1301 = vrot.lane.b32.xlu1 %v1294_v12, %s3500_s30 }
 0x11d   :  { %1371 = vrot.lane.b32.xlu1 %v1360_v29, %s3486_s9 }
 0x121   :  { %1441 = vrot.lane.b32.xlu1 %v1428_v43, %s3487_s10  ;;  %v368_v43 = vmul.f32 %v354_v2, %v3701_v24 }
 0x123   :  { %v3929_v19 = vpop.permute.xlu1 %505  ;;  %v3931_v30 = vpop.permute.xlu0 %577 }
 0x125   :  { %1445 = vrot.lane.b32.xlu1 %v1436_v20, %s3487_s10  ;;  %v367_v20 = vmul.f32 %v350_v4, %v3699_v23 }
 0x127   :  { %v3935_v47 = vpop.permute.xlu1 %641  ;;  %v3178_v18 = vpop.permute.xlu0 %3177 }
 0x128   :  { %v3180_v50 = vunpack.i.h.bf16 %v3178_v18  ;;  %v3179_v51 = vunpack.i.l.bf16 %v3178_v18 }
 0x129   :  { %1447 = vrot.lane.b32.xlu1 %v1440_v46, %s3487_s10  ;;  %v370_v46 = vmul.f32 %v362_v32, %v3658_v57 }
 0x12a   :  { %v107_v60 = vsel %vm105_vm7, %v3179_v51, %v3180_v50 }
 0x12b   :  { %v3183_v39 = vpop.permute.xlu1 %3182  ;;  %v3188_v54 = vpop.permute.xlu0 %3187 }
 0x12c   :  { %v3185_v52 = vunpack.i.h.bf16 %v3183_v39  ;;  %v3184_v56 = vunpack.i.l.bf16 %v3183_v39  ;;  %v3190_v58 = vunpack.i.h.bf16 %v3188_v54  ;;  %v3189_v59 = vunpack.i.l.bf16 %v3188_v54 }
 0x12d   :  { %1515 = vrot.lane.b32.xlu1 %v1504_v49, %s3488_s14 }
 0x12e   :  { %v181_v61 = vsel %vm179_vm5, %v3184_v56, %v3185_v52  ;;  %v106_v15 = vsel %vm105_vm7, %v3189_v59, %v3179_v51  ;;  %v109_v63 = vsel %vm105_vm7, %v3190_v58, %v104_v21  ;;  %v108_v25 = vsel %vm105_vm7, %v3180_v50, %v3190_v58 }
 0x12f   :  { %v3193_v62 = vpop.permute.xlu1 %3192  ;;  %v3198_v1 = vpop.permute.xlu0 %3197  ;;  %v3021_v3 = vpack.c.bf16 %v181_v61, %v107_v60 }
 0x130   :  { %v3195_v8 = vunpack.i.h.bf16 %v3193_v62  ;;  %v3194_v9 = vunpack.i.l.bf16 %v3193_v62  ;;  %v3200_v10 = vunpack.i.h.bf16 %v3198_v1  ;;  %v3199_v26 = vunpack.i.l.bf16 %v3198_v1 }
 0x131   :  { %3022 = vmatprep.subr.bf16.mxu0 %v3021_v3 }
 0x132   :  { %v180_v11 = vsel %vm179_vm5, %v3194_v9, %v3184_v56  ;;  %v183_v0 = vsel %vm179_vm5, %v3195_v8, %v178_v16  ;;  %v182_v27 = vsel %vm179_vm5, %v3185_v52, %v3195_v8  ;;  %v255_v41 = vsel %vm253_vm6, %v3199_v26, %v3200_v10 }
 0x133   :  { %v3203_v13 = vpop.permute.xlu1 %3202  ;;  %v3208_v14 = vpop.permute.xlu0 %3207  ;;  %v3023_v28 = vpack.c.bf16 %v180_v11, %v106_v15  ;;  %v3037_v31 = vpack.c.bf16 %v183_v0, %v109_v63  ;;  %v3039_v22 = vpack.c.bf16 %v182_v27, %v108_v25  ;;  %v369_v56 = vmul.f32 %v358_v40, %v3717_v35 }
 0x134   :  { %v3205_v33 = vunpack.i.h.bf16 %v3203_v13  ;;  %v3204_v36 = vunpack.i.l.bf16 %v3203_v13  ;;  %v3210_v37 = vunpack.i.h.bf16 %v3208_v14  ;;  %v3209_v38 = vunpack.i.l.bf16 %v3208_v14 }
 0x135   :  { %3024 = vmatpush1.bf16.msra.mxu0 %v3023_v28  ;;  %3038 = vmatprep.subr.bf16.mxu1 %v3037_v31 }
 0x136   :  { %3040 = vmatpush1.bf16.msra.mxu1 %v3039_v22  ;;  %v329_v12 = vsel %vm327_vm4, %v3204_v36, %v3205_v33  ;;  %v254_v39 = vsel %vm253_vm6, %v3209_v38, %v3199_v26  ;;  %v257_v54 = vsel %vm253_vm6, %v3210_v37, %v3919_v42  ;;  %v256_v52 = vsel %vm253_vm6, %v3200_v10, %v3210_v37 }
 0x137   :  { %v3213_v21 = vpop.permute.xlu1 %3212  ;;  %v3218_v29 = vpop.permute.xlu0 %3217  ;;  %v3025_v16 = vpack.c.bf16 %v329_v12, %v255_v41 }
 0x138   :  { %v3215_v18 = vunpack.i.h.bf16 %v3213_v21  ;;  %v3214_v49 = vunpack.i.l.bf16 %v3213_v21  ;;  %v3220_v50 = vunpack.i.h.bf16 %v3218_v29  ;;  %v3219_v51 = vunpack.i.l.bf16 %v3218_v29 }
 0x139   :  { %3026 = vmatprep.subr.bf16.mxu0 %v3025_v16 }
 0x13a   :  { %v328_v24 = vsel %vm327_vm4, %v3214_v49, %v3204_v36  ;;  %v331_v23 = vsel %vm327_vm4, %v3215_v18, %v3923_v44  ;;  %v436_v57 = vsel %vm298_vm3, %v3219_v51, %v3220_v50  ;;  %v330_v58 = vsel %vm327_vm4, %v3205_v33, %v3215_v18 }
 0x13b   :  { %v3223_v59 = vpop.permute.xlu1 %3222  ;;  %v3233_v53 = vpop.permute.xlu0 %3232  ;;  %v3027_v60 = vpack.c.bf16 %v328_v24, %v254_v39  ;;  %v3041_v61 = vpack.c.bf16 %v331_v23, %v257_v54  ;;  %v3029_v62 = vpack.c.bf16 %v436_v57, %v368_v43  ;;  %v3043_v1 = vpack.c.bf16 %v330_v58, %v256_v52  ;;  %v4011_v54 = vld [vmem:[%s5428_s4 + $0x22] ss:$8 sm:$0xf] }
 0x13c   :  { %v3225_v42 = vunpack.i.h.bf16 %v3223_v59  ;;  %v3224_v3 = vunpack.i.l.bf16 %v3223_v59  ;;  %v3235_v8 = vunpack.i.h.bf16 %v3233_v53  ;;  %v3234_v35 = vunpack.i.l.bf16 %v3233_v53  ;;  %v4037_v53 = vld [vmem:[%s5428_s4 + $0x25] ss:$8 sm:$0xf] }
 0x13d   :  { %3028 = vmatpush1.bf16.msra.mxu0 %v3027_v60  ;;  %3042 = vmatprep.subr.bf16.mxu1 %v3041_v61  ;;  %v1650_v52 = vrot.slane %v4011_v54, %v3562_v7  ;;  %v1831_v60 = vrot.slane %v4037_v53, %v3562_v7 }
 0x13e   :  { %3030 = vmatprep.subr.bf16.mxu0 %v3029_v62  ;;  %3044 = vmatpush1.bf16.msra.mxu1 %v3043_v1  ;;  %v435_v44 = vsel %vm298_vm3, %v3224_v3, %v3219_v51  ;;  %v438_v9 = vsel %vm298_vm3, %v3225_v42, %v3925_v45  ;;  %v437_v2 = vsel %vm298_vm3, %v3220_v50, %v3225_v42  ;;  %v3998_v50 = vld [vmem:[%s5428_s4 + $0x21] ss:$8 sm:$0xf]  ;;  %v4050_v1 = vld [vmem:[%s5428_s4 + $0x26] ss:$8 sm:$0xf] }
 0x13f   :  { %v3228_v4 = vpop.permute.xlu1 %3227  ;;  %v3243_v10 = vpop.permute.xlu0 %3242  ;;  %v3031_v15 = vpack.c.bf16 %v435_v44, %v367_v20  ;;  %v3045_v63 = vpack.c.bf16 %v438_v9, %v370_v46  ;;  %v3047_v25 = vpack.c.bf16 %v437_v2, %v369_v56  ;;  %v580_v14 = vsel %vm5500_vm1, %v3234_v35, %v3235_v8  ;;  %v4019_v56 = vld [vmem:[%s5428_s4 + $0x23] ss:$8 sm:$0xf] }
 0x140   :  { %v3230_v26 = vunpack.i.h.bf16 %v3228_v4  ;;  %v3229_v11 = vunpack.i.l.bf16 %v3228_v4  ;;  %v3245_v0 = vunpack.i.h.bf16 %v3243_v10  ;;  %v3244_v27 = vunpack.i.l.bf16 %v3243_v10  ;;  %v4078_v10 = vld [vmem:[%s5428_s4 + $0x40] ss:$8 sm:$0xf] }
 0x141   :  { %3032 = vmatpush1.bf16.msra.mxu0 %v3031_v15  ;;  %3046 = vmatprep.subr.bf16.mxu1 %v3045_v63  ;;  %v1572_v51 = vrot.slane %v3998_v50, %v3560_v6  ;;  %v1584_v39 = vrot.slane %v3998_v50, %v3580_v17  ;;  %v1720_v24 = vrot.slane %v4019_v56, %v3560_v6 }
 0x142   :  { %3048 = vmatpush1.bf16.msra.mxu1 %v3047_v25  ;;  %v508_v13 = vsel %vm5501_vm2, %v3229_v11, %v3230_v26  ;;  %v579_v33 = vsel %vm5500_vm1, %v3244_v27, %v3234_v35  ;;  %v582_v36 = vsel %vm5500_vm1, %v3245_v0, %v3931_v30  ;;  %v581_v41 = vsel %vm5500_vm1, %v3235_v8, %v3245_v0  ;;  %v4060_v8 = vld [vmem:[%s5428_s4 + $0x27] ss:$8 sm:$0xf]  ;;  %v4088_v25 = vld [vmem:[%s5428_s4 + $0x41] ss:$8 sm:$0xf] }
 0x143   :  { %v3238_v28 = vpop.permute.xlu1 %3237  ;;  %v3033_v45 = vpack.c.bf16 %v580_v14, %v508_v13  ;;  %v646_v32 = vpop.permute.xlu0 %645  ;;  %v1728_v57 = vrot.slane %v4019_v56, %v3558_v5  ;;  %v1732_v59 = vrot.slane %v4019_v56, %v3580_v17  ;;  %v1839_v62 = vrot.slane %v4037_v53, %v3580_v17  ;;  %v4106_v14 = vld [vmem:[%s5428_s4 + $0x42] ss:$8 sm:$0xf] }
 0x144   :  { %v3240_v31 = vunpack.i.h.bf16 %v3238_v28  ;;  %v3239_v22 = vunpack.i.l.bf16 %v3238_v28  ;;  %v1903_v3 = vrot.slane %v4050_v1, %v3562_v7  ;;  %v1971_v35 = vrot.slane %v4060_v8, %v3560_v6 }
 0x145   :  { %3034 = vmatprep.subr.bf16.mxu0 %v3033_v45  ;;  %v1979_v9 = vrot.slane %v4060_v8, %v3558_v5  ;;  %v1983_v4 = vrot.slane %v4060_v8, %v3580_v17  ;;  %v2047_v15 = vrot.slane %v4078_v10, %v3562_v7  ;;  %v2123_v0 = vrot.slane %v4088_v25, %v3558_v5  ;;  %v4114_v45 = vld [vmem:[%s5428_s4 + $0x43] ss:$8 sm:$0xf] }
 0x146   :  { %v507_v37 = vsel %vm5501_vm2, %v3239_v22, %v3229_v11  ;;  %v510_v38 = vsel %vm5501_vm2, %v3240_v31, %v3929_v19  ;;  %v509_v40 = vsel %vm5501_vm2, %v3230_v26, %v3240_v31  ;;  %v663_v19 = vld [vmem:[%s5430_s1] sm:$0xff]  ;;  %s3501_s1 = smov 114   ;;  %v2115_v26 = vrot.slane %v4088_v25, %v3560_v6 }
 0x147   :  { %v644_v12 = vpop.permute.xlu1 %643  ;;  %v3035_v21 = vpack.c.bf16 %v579_v33, %v507_v37  ;;  %v3049_v29 = vpack.c.bf16 %v582_v36, %v510_v38  ;;  %v3051_v16 = vpack.c.bf16 %v581_v41, %v509_v40  ;;  %v648_v20 = vpop.permute.xlu0 %647  ;;  %1585 = vrot.lane.b32.xlu1 %v1572_v51, %s3501_s1  ;;  %v2127_v27 = vrot.slane %v4088_v25, %v3580_v17  ;;  %v4135_v38 = vld [vmem:[%s5428_s4 + $0x44] ss:$8 sm:$0xf] }
 0x148   :  { %v652_v43 = vsel %vm5497_vm0, %v644_v12, %v646_v32  ;;  %v651_v46 = vsel %vm5497_vm0, %v3935_v47, %v644_v12  ;;  %v653_v49 = vsel %vm5497_vm0, %v646_v32, %v648_v20  ;;  %v1580_v47 = vrot.slane %v3998_v50, %v3558_v5 }
 0x149   :  { %3036 = vmatpush1.bf16.msra.mxu0 %v3035_v21  ;;  %3050 = vmatprep.subr.bf16.mxu1 %v3049_v29  ;;  %v2191_v28 = vrot.slane %v4106_v14, %v3562_v7  ;;  %v2259_v22 = vrot.slane %v4114_v45, %v3560_v6  ;;  %v2267_v32 = vrot.slane %v4114_v45, %v3558_v5 }
 0x14a   :  { %720 = vmatprep.subr.mxu0 %v652_v43  ;;  %3052 = vmatpush1.bf16.msra.mxu1 %v3051_v16  ;;  %v2271_v36 = vrot.slane %v4114_v45, %v3580_v17  ;;  %v2335_v40 = vrot.slane %v4135_v38, %v3562_v7 }
 0x14b   :  { %v650_v30 = vpop.permute.xlu1 %649  ;;  %1589 = vrot.lane.b32.xlu1 %v1580_v47, %s3501_s1 }
 0x14c   :  { %v654_v18 = vsel %vm5497_vm0, %v648_v20, %v650_v30 }
 0x14d   :  { %721 = vmatpush1.msra.mxu0 %v651_v46  ;;  %791 = vmatprep.subr.mxu1 %v654_v18 }
 0x14e   :  { %2991 = vmatmul.mubr.msk.f32.vlgmr.msra.gmra.mrb[0].mxu0 %vm5477_vm8, %v663_v19  ;;  %792 = vmatpush1.msra.mxu1 %v653_v49 }
 0x14f   :  { %2992 = vmatmul.mubr.msk.f32.vlgmr.msra.gmra.mrb[0].mxu1 %vm5477_vm8, %v663_v19  ;;  %1591 = vrot.lane.b32.xlu1 %v1584_v39, %s3501_s1  ;;  %v1576_v39 = vrot.slane %v3998_v50, %v3562_v7  ;;  %v1654_v50 = vrot.slane %v4011_v54, %v3558_v5  ;;  %vm5485_vm8 = vcmask 793600  }
 0x153   :  { %1661 = vrot.lane.b32.xlu1 %v1650_v52, %s3502_s17 }
 0x157   :  { %1733 = vrot.lane.b32.xlu1 %v1720_v24, %s3489_s15  ;;  %v1512_v24 = vrot.slane %v3900_v34, %v3580_v17 }
 0x15b   :  { %1737 = vrot.lane.b32.xlu1 %v1728_v57, %s3489_s15 }
 0x15c   :  { %v4024_v23 = vpop.permute.xlu1 %881 }
 0x15f   :  { %1739 = vrot.lane.b32.xlu1 %v1732_v59, %s3489_s15  ;;  %v1646_v59 = vrot.slane %v4011_v54, %v3560_v6 }
 0x160   :  { %v4029_v58 = vpop.permute.xlu1 %925 }
 0x163   :  { %1842 = vrot.lane.b32.xlu1 %v1831_v60, %s3490_s18 }
 0x164   :  { %v4042_v61 = vpop.permute.xlu1 %927 }
 0x167   :  { %1846 = vrot.lane.b32.xlu1 %v1839_v62, %s3490_s18  ;;  %v1724_v62 = vrot.slane %v4019_v56, %v3562_v7 }
 0x168   :  { %v4052_v42 = vpop.permute.xlu1 %929 }
 0x16b   :  { %1914 = vrot.lane.b32.xlu1 %v1903_v3, %s3503_s29  ;;  %v1658_v3 = vrot.slane %v4011_v54, %v3580_v17 }
 0x16c   :  { %v4065_v44 = vpop.permute.xlu1 %999 }
 0x16f   :  { %1984 = vrot.lane.b32.xlu1 %v1971_v35, %s3504_s8 }
 0x170   :  { %v4070_v2 = vpop.permute.xlu1 %1001 }
 0x173   :  { %1988 = vrot.lane.b32.xlu1 %v1979_v9, %s3504_s8  ;;  %v1827_v9 = vrot.slane %v4037_v53, %v3560_v6 }
 0x174   :  { %v4083_v63 = vpop.permute.xlu1 %1003 }
 0x177   :  { %1990 = vrot.lane.b32.xlu1 %v1983_v4, %s3504_s8  ;;  %v1835_v4 = vrot.slane %v4037_v53, %v3558_v5  ;;  %v1975_v53 = vrot.slane %v4060_v8, %v3562_v7  ;;  %v2051_v8 = vrot.slane %v4078_v10, %v3558_v5 }
 0x178   :  { %v4093_v11 = vpop.permute.xlu1 %1005 }
 0x17b   :  { %2058 = vrot.lane.b32.xlu1 %v2047_v15, %s3491_s23  ;;  %v1899_v15 = vrot.slane %v4050_v1, %v3560_v6 }
 0x17c   :  { %v4101_v13 = vpop.permute.xlu1 %1075 }
 0x17f   :  { %2128 = vrot.lane.b32.xlu1 %v2115_v26, %s3492_s24  ;;  %v1907_v26 = vrot.slane %v4050_v1, %v3558_v5 }
 0x180   :  { %v4116_v31 = vpop.permute.xlu1 %1147 }
 0x183   :  { %2132 = vrot.lane.b32.xlu1 %v2123_v0, %s3492_s24  ;;  %v4209_v0 = vpop.permute.xlu0 %931 }
 0x184   :  { %v4124_v33 = vpop.permute.xlu1 %1151 }
 0x187   :  { %2134 = vrot.lane.b32.xlu1 %v2127_v27, %s3492_s24 }
 0x188   :  { %v4129_v37 = vpop.permute.xlu1 %1153 }
 0x189   :  { %5507 = vst [vmem:[#allocation10_spill] sm:$0xff] %v4129_v37 }
 0x18b   :  { %2202 = vrot.lane.b32.xlu1 %v2191_v28, %s3493_s27  ;;  %v4216_v28 = vpop.permute.xlu0 %1073 }
 0x18c   :  { %v4140_v41 = vpop.permute.xlu1 %1223 }
 0x18f   :  { %2272 = vrot.lane.b32.xlu1 %v2259_v22, %s3505_s28  ;;  %v1911_v22 = vrot.slane %v4050_v1, %v3580_v17  ;;  %v2119_v1 = vrot.slane %v4088_v25, %v3562_v7  ;;  %v2195_v25 = vrot.slane %v4106_v14, %v3558_v5 }
 0x190   :  { %v4142_v12 = vpop.permute.xlu1 %1295 }
 0x193   :  { %2276 = vrot.lane.b32.xlu1 %v2267_v32, %s3505_s28 }
 0x194   :  { %v4144_v21 = vpop.permute.xlu1 %1299 }
 0x197   :  { %2278 = vrot.lane.b32.xlu1 %v2271_v36, %s3505_s28  ;;  %v2043_v36 = vrot.slane %v4078_v10, %v3560_v6 }
 0x198   :  { %v4156_v19 = vpop.permute.xlu1 %1301 }
 0x19b   :  { %2346 = vrot.lane.b32.xlu1 %v2335_v40, %s3506_s16  ;;  %v4226_v40 = vpop.permute.xlu0 %1077 }
 0x19c   :  { %v4160_v49 = vpop.permute.xlu1 %1371 }
 0x1a0   :  { %v4162_v51 = vpop.permute.xlu1 %1441 }
 0x1a1   :  { %5508 = vst [vmem:[#allocation11_spill] sm:$0xff] %v4162_v51 }
 0x1a4   :  { %v4164_v47 = vpop.permute.xlu1 %1445 }
 0x1a5   :  { %5509 = vst [vmem:[#allocation12_spill] sm:$0xff] %v4164_v47 }
 0x1a8   :  { %v4168_v52 = vpop.permute.xlu1 %1447 }
 0x1a9   :  { %5510 = vst [vmem:[#allocation13_spill] sm:$0xff] %v4168_v52 }
 0x1ac   :  { %v4173_v57 = vpop.permute.xlu1 %1515 }
 0x1ad   :  { %5511 = vst [vmem:[#allocation14_spill] sm:$0xff] %v4173_v57 }
 0x1b9   :  { %v4178_v60 = vpop.permute.xlu1 %1585 }
 0x1ba   :  { %5512 = vst [vmem:[#allocation15_spill] sm:$0xff] %v4178_v60 }
 0x1bd   :  { %v4186_v34 = vpop.permute.xlu1 %1589 }
 0x1be   :  { %5513 = vst [vmem:[#allocation16_spill] sm:$0xff] %v4186_v34 }
 0x1c1   :  { %v4191_v35 = vpop.permute.xlu1 %1591 }
 0x1c2   :  { %5514 = vst [vmem:[#allocation17_spill] sm:$0xff] %v4191_v35 }
 0x1c5   :  { %v4199_v56 = vpop.permute.xlu1 %1661 }
 0x1c6   :  { %5515 = vst [vmem:[#allocation18_spill] sm:$0xff] %v4199_v56 }
 0x1c9   :  { %v4204_v54 = vpop.permute.xlu1 %1733 }
 0x1ca   :  { %5516 = vst [vmem:[#allocation19_spill] sm:$0xff] %v4204_v54  ;;  %v4331_v54 = vld [vmem:[%s5428_s4 + $0x60] ss:$8 sm:$0xf] }
 0x1cd   :  { %v4214_v27 = vpop.permute.xlu1 %1737 }
 0x1ce   :  { %5517 = vst [vmem:[#allocation20_spill] sm:$0xff] %v4214_v27 }
 0x1d1   :  { %v4221_v32 = vpop.permute.xlu1 %1739 }
 0x1d2   :  { %5518 = vst [vmem:[#allocation21_spill] sm:$0xff] %v4221_v32 }
 0x221   :  { %v4146_v29 = vpop.f32.mrb[0].mxu0 }
 0x222   :  { %v4148_v16 = vpop.f32.mrb[1].mxu0  ;;  %v4150_v43 = vpop.f32.mrb[0].mxu1 }
 0x223   :  { %v846_v20 = vadd.f32 %v4148_v16, %v4146_v29  ;;  %v4154_v30 = vpop.f32.mrb[1].mxu1 }
 0x225   :  { %v847_v46 = vadd.f32 %v846_v20, %v4150_v43  ;;  %v4231_v20 = vpop.permute.xlu1 %1842 }
 0x227   :  { %v848_v18 = vadd.f32 %v847_v46, %v4154_v30  ;;  %v4233_v46 = vpop.permute.xlu0 %1149 }
 0x229   :  { %849 = vadd.xlane.f32.xlu0 %v848_v18  ;;  %v4238_v18 = vpop.permute.xlu1 %1846 }
 0x22a   :  { %5519 = vst [vmem:[#allocation22_spill] sm:$0xff] %v4238_v18  ;;  %v1860_v57 = vmul.f32 0.0, %v4238_v18 }
 0x23f   :  { %1587 = vrot.lane.b32.xlu0 %v1576_v39, %s3501_s1  ;;  %v2055_v39 = vrot.slane %v4078_v10, %v3580_v17  ;;  %v2263_v10 = vrot.slane %v4114_v45, %v3562_v7  ;;  %v2339_v45 = vrot.slane %v4135_v38, %v3558_v5 }
 0x243   :  { %1519 = vrot.lane.b32.xlu0 %v1512_v24, %s3488_s14  ;;  %v4243_v24 = vpop.permute.xlu0 %1079 }
 0x244   :  { %5520 = vst [vmem:[#allocation23_spill] sm:$0xff] %v4243_v24 }
 0x247   :  { %1659 = vrot.lane.b32.xlu0 %v1646_v59, %s3502_s17  ;;  %v2187_v59 = vrot.slane %v4106_v14, %v3560_v6 }
 0x24b   :  { %1663 = vrot.lane.b32.xlu0 %v1654_v50, %s3502_s17  ;;  %v4248_v50 = vpop.permute.xlu1 %1914 }
 0x24f   :  { %1735 = vrot.lane.b32.xlu0 %v1724_v62, %s3489_s15  ;;  %v4250_v62 = vpop.permute.xlu0 %1221 }
 0x253   :  { %1665 = vrot.lane.b32.xlu0 %v1658_v3, %s3502_s17  ;;  %v4255_v3 = vpop.permute.xlu1 %1984 }
 0x254   :  { %5521 = vst [vmem:[#allocation24_spill] sm:$0xff] %v4255_v3 }
 0x257   :  { %1840 = vrot.lane.b32.xlu0 %v1827_v9, %s3490_s18  ;;  %v4260_v9 = vpop.permute.xlu0 %1225 }
 0x25b   :  { %1844 = vrot.lane.b32.xlu0 %v1835_v4, %s3490_s18  ;;  %v2199_v4 = vrot.slane %v4106_v14, %v3580_v17  ;;  %v4282_v14 = vld [vmem:[%s5428_s4 + $0x45] ss:$8 sm:$0xf] }
 0x25f   :  { %1912 = vrot.lane.b32.xlu0 %v1899_v15, %s3503_s29  ;;  %v4265_v15 = vpop.permute.xlu1 %1988 }
 0x263   :  { %1916 = vrot.lane.b32.xlu0 %v1907_v26, %s3503_s29  ;;  %v4267_v26 = vpop.permute.xlu0 %1297 }
 0x267   :  { %1986 = vrot.lane.b32.xlu0 %v1975_v53, %s3504_s8  ;;  %v2331_v53 = vrot.slane %v4135_v38, %v3560_v6 }
 0x26b   :  { %1918 = vrot.lane.b32.xlu0 %v1911_v22, %s3503_s29  ;;  %v4272_v22 = vpop.permute.xlu1 %1990 }
 0x26f   :  { %2056 = vrot.lane.b32.xlu0 %v2043_v36, %s3491_s23  ;;  %v4277_v36 = vpop.permute.xlu0 %1227 }
 0x270   :  { %5522 = vst [vmem:[#allocation25_spill] sm:$0xff] %v4277_v36 }
 0x273   :  { %2060 = vrot.lane.b32.xlu0 %v2051_v8, %s3491_s23  ;;  %v2407_v8 = vrot.slane %v4282_v14, %v3562_v7 }
 0x277   :  { %2130 = vrot.lane.b32.xlu0 %v2119_v1, %s3492_s24  ;;  %v4287_v1 = vpop.permute.xlu1 %2058 }
 0x278   :  { %5523 = vst [vmem:[#allocation26_spill] sm:$0xff] %v4287_v1 }
 0x27b   :  { %2062 = vrot.lane.b32.xlu0 %v2055_v39, %s3491_s23  ;;  %v4289_v39 = vpop.permute.xlu0 %1369 }
 0x27c   :  { %5524 = vst [vmem:[#allocation27_spill] sm:$0xff] %v4289_v39 }
 0x27f   :  { %2200 = vrot.lane.b32.xlu0 %v2187_v59, %s3493_s27  ;;  %v2343_v59 = vrot.slane %v4135_v38, %v3580_v17 }
 0x283   :  { %2204 = vrot.lane.b32.xlu0 %v2195_v25, %s3493_s27  ;;  %v4297_v25 = vld [vmem:[%s5428_s4 + $0x46] ss:$8 sm:$0xf] }
 0x284   :  { %v2483_v38 = vrot.slane %v4297_v25, %v3558_v5 }
 0x287   :  { %2274 = vrot.lane.b32.xlu0 %v2263_v10, %s3505_s28  ;;  %v4299_v10 = vpop.permute.xlu1 %2128 }
 0x288   :  { %5525 = vst [vmem:[#allocation28_spill] sm:$0xff] %v4299_v10 }
 0x28b   :  { %2206 = vrot.lane.b32.xlu0 %v2199_v4, %s3493_s27  ;;  %v2475_v4 = vrot.slane %v4297_v25, %v3560_v6 }
 0x28f   :  { %2344 = vrot.lane.b32.xlu0 %v2331_v53, %s3506_s16  ;;  %v4304_v53 = vpop.permute.xlu0 %1373 }
 0x290   :  { %5526 = vst [vmem:[#allocation29_spill] sm:$0xff] %v4304_v53 }
 0x293   :  { %2348 = vrot.lane.b32.xlu0 %v2339_v45, %s3506_s16  ;;  %v4312_v45 = vld [vmem:[%s5428_s4 + $0x47] ss:$8 sm:$0xf]  ;;  %v4316_v48 = vpop.permute.xlu0 %1443 }
 0x297   :  { %2418 = vrot.lane.b32.xlu0 %v2407_v8, %s3507_s21  ;;  %v4314_v8 = vpop.permute.xlu1 %2132  ;;  %v4326_v27 = vpop.permute.xlu0 %1375 }
 0x298   :  { %5527 = vst [vmem:[#allocation30_spill] sm:$0xff] %v4326_v27 }
 0x29b   :  { %2350 = vrot.lane.b32.xlu0 %v2343_v59, %s3506_s16  ;;  %v2551_v59 = vrot.slane %v4312_v45, %v3562_v7  ;;  %v4321_v32 = vpop.permute.xlu1 %2134  ;;  %v4336_v56 = vpop.permute.xlu0 %1513 }
 0x29c   :  { %5528 = vst [vmem:[#allocation31_spill] sm:$0xff] %v4336_v56  ;;  %v2004_v56 = vmul.f32 0.0, %v4272_v22 }
 0x29f   :  { %2488 = vrot.lane.b32.xlu0 %v2475_v4, %s3508_s11  ;;  %v2487_v4 = vrot.slane %v4297_v25, %v3580_v17  ;;  %v4338_v35 = vpop.permute.xlu1 %2202  ;;  %v4343_v34 = vpop.permute.xlu0 %1517 }
 0x2a0   :  { %5529 = vst [vmem:[#allocation32_spill] sm:$0xff] %v4338_v35  ;;  %5530 = vst [vmem:[#allocation33_spill] sm:$0xff] %v4343_v34 }
 0x2a3   :  { %2492 = vrot.lane.b32.xlu0 %v2483_v38, %s3508_s11  ;;  %v2619_v38 = vrot.slane %v4331_v54, %v3560_v6  ;;  %v4345_v60 = vpop.permute.xlu1 %2272 }
 0x2a4   :  { %5531 = vst [vmem:[#allocation34_spill] sm:$0xff] %v4345_v60 }
 0x2a7   :  { %2562 = vrot.lane.b32.xlu0 %v2551_v59, %s3509_s20  ;;  %v2627_v59 = vrot.slane %v4331_v54, %v3558_v5  ;;  %v4351_v27 = vpop.permute.xlu1 %2276 }
 0x2ab   :  { %2494 = vrot.lane.b32.xlu0 %v2487_v4, %s3508_s11 }
 0x2af   :  { %2632 = vrot.lane.b32.xlu0 %v2619_v38, %s3510_s12 }
 0x2b3   :  { %2636 = vrot.lane.b32.xlu0 %v2627_v59, %s3510_s12 }
 0x2b6   :  { %v850_v4 = vpop.xlane.xlu0 %849 }
 0x2b7   :  { %v851_v52 = vmul.f32 0.001953125, %v850_v4  ;;  %1874 = vrot.lane.b32.xlu0 %v1860_v57, %s3489_s15 }
 0x2b9   :  { %v4354_v38 = vsub.f32 %v4146_v29, %v851_v52  ;;  %v4357_v35 = vsub.f32 %v4148_v16, %v851_v52  ;;  %v4360_v34 = vsub.f32 %v4150_v43, %v851_v52  ;;  %v4365_v59 = vsub.f32 %v4154_v30, %v851_v52 }
 0x2ba   :  { %v4362_v18 = vpop.permute.xlu0 %1587  ;;  %v2148_v29 = vmul.f32 0.0, %v4321_v32 }
 0x2bb   :  { %5532 = vst [vmem:[#allocation35_spill] sm:$0xff] %v4362_v18  ;;  %v856_v57 = vmul.f32 %v4354_v38, %v4354_v38  ;;  %v857_v4 = vmul.f32 %v4357_v35, %v4357_v35  ;;  %2018 = vrot.lane.b32.xlu0 %v2004_v56, %s3501_s1  ;;  %v858_v16 = vmul.f32 %v4360_v34, %v4360_v34  ;;  %v4377_v18 = vpop.permute.xlu1 %2278 }
 0x2bc   :  { %v859_v30 = vmul.f32 %v4365_v59, %v4365_v59  ;;  %v2292_v10 = vmul.f32 0.0, %v4377_v18 }
 0x2bd   :  { %v860_v43 = vadd.f32 %v857_v4, %v856_v57 }
 0x2be   :  { %v4375_v60 = vpop.permute.xlu0 %1519 }
 0x2bf   :  { %5533 = vst [vmem:[#allocation36_spill] sm:$0xff] %v4375_v60  ;;  %v861_v52 = vadd.f32 %v860_v43, %v858_v16  ;;  %2162 = vrot.lane.b32.xlu0 %v2148_v29, %s3487_s10  ;;  %v2403_v60 = vrot.slane %v4282_v14, %v3560_v6  ;;  %v2411_v29 = vrot.slane %v4282_v14, %v3558_v5 }
 0x2c1   :  { %v862_v1 = vadd.f32 %v861_v52, %v859_v30  ;;  %v2479_v30 = vrot.slane %v4297_v25, %v3562_v7  ;;  %v2559_v25 = vrot.slane %v4312_v45, %v3580_v17 }
 0x2c2   :  { %v4383_v56 = vpop.permute.xlu0 %1659 }
 0x2c3   :  { %5534 = vst [vmem:[#allocation37_spill] sm:$0xff] %v4383_v56  ;;  %863 = vadd.xlane.f32.xlu1 %v862_v1  ;;  %2306 = vrot.lane.b32.xlu0 %v2292_v10, %s3500_s30  ;;  %v2415_v1 = vrot.slane %v4282_v14, %v3580_v17  ;;  %v2555_v14 = vrot.slane %v4312_v45, %v3558_v5 }
 0x2c6   :  { %v4386_v3 = vpop.permute.xlu0 %1663 }
 0x2c7   :  { %5535 = vst [vmem:[#allocation38_spill] sm:$0xff] %v4386_v3 }
 0x2ca   :  { %v4388_v57 = vpop.permute.xlu0 %1735 }
 0x2cb   :  { %5536 = vst [vmem:[#allocation39_spill] sm:$0xff] %v4388_v57 }
 0x2ce   :  { %v4390_v4 = vpop.permute.xlu0 %1665 }
 0x2cf   :  { %5537 = vst [vmem:[#allocation40_spill] sm:$0xff] %v4390_v4  ;;  %v3511_v4 = vmov 0  }
 0x2d0   :  { %3247 = vset.pattern.permute.xlu0 %v3511_v4  ;;  %v2623_v4 = vrot.slane %v4331_v54, %v3562_v7 }
 0x2d2   :  { %v4394_v16 = vpop.permute.xlu0 %1840 }
 0x2d3   :  { %5538 = vst [vmem:[#allocation41_spill] sm:$0xff] %v4394_v16 }
 0x2d4   :  { %2416 = vrot.lane.b32.xlu1 %v2403_v60, %s3507_s21  ;;  %v2547_v60 = vrot.slane %v4312_v45, %v3560_v6 }
 0x2d6   :  { %v4399_v43 = vpop.permute.xlu0 %1844 }
 0x2d7   :  { %5539 = vst [vmem:[#allocation42_spill] sm:$0xff] %v4399_v43 }
 0x2d8   :  { %2420 = vrot.lane.b32.xlu1 %v2411_v29, %s3507_s21 }
 0x2da   :  { %v4404_v10 = vpop.permute.xlu0 %1912 }
 0x2dc   :  { %2422 = vrot.lane.b32.xlu1 %v2415_v1, %s3507_s21 }
 0x2de   :  { %v4409_v52 = vpop.permute.xlu0 %1916 }
 0x2e0   :  { %2490 = vrot.lane.b32.xlu1 %v2479_v30, %s3508_s11 }
 0x2e2   :  { %v4414_v29 = vpop.permute.xlu0 %1986 }
 0x2e4   :  { %2560 = vrot.lane.b32.xlu1 %v2547_v60, %s3509_s20  ;;  %v2631_v60 = vrot.slane %v4331_v54, %v3580_v17 }
 0x2e6   :  { %v4419_v1 = vpop.permute.xlu0 %1918 }
 0x2e8   :  { %2564 = vrot.lane.b32.xlu1 %v2555_v14, %s3509_s20  ;;  %v1932_v14 = vmul.f32 0.0, %v4419_v1 }
 0x2ea   :  { %v4424_v30 = vpop.permute.xlu0 %2056 }
 0x2ec   :  { %2566 = vrot.lane.b32.xlu1 %v2559_v25, %s3509_s20 }
 0x2ee   :  { %v4429_v6 = vpop.permute.xlu0 %2060 }
 0x2f0   :  { %2634 = vrot.lane.b32.xlu1 %v2623_v4, %s3510_s12 }
 0x2f2   :  { %v4434_v5 = vpop.permute.xlu0 %2130 }
 0x2f3   :  { %5540 = vst [vmem:[#allocation43_spill] sm:$0xff] %v4434_v5 }
 0x2f4   :  { %2638 = vrot.lane.b32.xlu1 %v2631_v60, %s3510_s12 }
 0x2f6   :  { %v4438_v45 = vpop.permute.xlu0 %2062 }
 0x2f7   :  { %5541 = vst [vmem:[#allocation44_spill] sm:$0xff] %v4438_v45  ;;  %v2076_v25 = vmul.f32 0.0, %v4438_v45  ;;  %v4472_v45 = vpop.permute.xlu1 %2346 }
 0x2f8   :  { %1946 = vrot.lane.b32.xlu1 %v1932_v14, %s3502_s17  ;;  %5553 = vst [vmem:[#allocation56_spill] sm:$0xff] %v4472_v45 }
 0x2fa   :  { %v4442_v7 = vpop.permute.xlu0 %2200 }
 0x2fb   :  { %5542 = vst [vmem:[#allocation45_spill] sm:$0xff] %v4442_v7 }
 0x2fc   :  { %2090 = vrot.lane.b32.xlu1 %v2076_v25, %s3488_s14 }
 0x2fe   :  { %v4445_v4 = vpop.permute.xlu0 %2204 }
 0x2ff   :  { %5543 = vst [vmem:[#allocation46_spill] sm:$0xff] %v4445_v4 }
 0x302   :  { %v4447_v57 = vpop.permute.xlu0 %2274 }
 0x303   :  { %5544 = vst [vmem:[#allocation47_spill] sm:$0xff] %v4447_v57 }
 0x306   :  { %v4449_v54 = vpop.permute.xlu0 %2206 }
 0x307   :  { %5545 = vst [vmem:[#allocation48_spill] sm:$0xff] %v4449_v54  ;;  %v2220_v17 = vmul.f32 0.0, %v4449_v54 }
 0x309   :  { %2234 = vrot.lane.b32.xlu1 %v2220_v17, %s3486_s9 }
 0x30a   :  { %v4453_v60 = vpop.permute.xlu0 %2344 }
 0x30b   :  { %5546 = vst [vmem:[#allocation49_spill] sm:$0xff] %v4453_v60 }
 0x30e   :  { %v4455_v3 = vpop.permute.xlu0 %2348 }
 0x30f   :  { %5547 = vst [vmem:[#allocation50_spill] sm:$0xff] %v4455_v3 }
 0x312   :  { %v4457_v56 = vpop.permute.xlu0 %2418 }
 0x313   :  { %5548 = vst [vmem:[#allocation51_spill] sm:$0xff] %v4457_v56 }
 0x316   :  { %v2351_v14 = vpop.permute.xlu0 %2350 }
 0x317   :  { %v4461_v25 = vsel %vm1258_vm9, %v4455_v3, %v2351_v14  ;;  %v2364_v4 = vmul.f32 0.0, %v2351_v14 }
 0x318   :  { %5549 = vst [vmem:[#allocation52_spill] sm:$0xff] %v4461_v25 }
 0x319   :  { %2378 = vrot.lane.b32.xlu1 %v2364_v4, %s3499_s26 }
 0x31a   :  { %v4464_v57 = vpop.permute.xlu0 %2488 }
 0x31b   :  { %5550 = vst [vmem:[#allocation53_spill] sm:$0xff] %v4464_v57 }
 0x31e   :  { %v2493_v54 = vpop.permute.xlu0 %2492 }
 0x322   :  { %v4466_v7 = vpop.permute.xlu0 %2562 }
 0x323   :  { %5551 = vst [vmem:[#allocation54_spill] sm:$0xff] %v4466_v7 }
 0x326   :  { %v2495_v17 = vpop.permute.xlu0 %2494 }
 0x327   :  { %v4469_v60 = vsel %vm1110_vm10, %v2493_v54, %v2495_v17  ;;  %v2508_v56 = vmul.f32 0.0, %v2495_v17 }
 0x328   :  { %5552 = vst [vmem:[#allocation55_spill] sm:$0xff] %v4469_v60 }
 0x329   :  { %2522 = vrot.lane.b32.xlu1 %v2508_v56, %s3496_s13 }
 0x350   :  { %v864_v3 = vpop.xlane.xlu1 %863 }
 0x351   :  { %v865_v25 = vmul.f32 0.001953125, %v864_v3 }
 0x353   :  { %v867_v14 = vadd.f32 1e-05, %v865_v25 }
 0x354   :  { %v4474_v5 = vpop.permute.xlu1 %2416 }
 0x355   :  { %5554 = vst [vmem:[#allocation57_spill] sm:$0xff] %v4474_v5  ;;  %3481 = vrsqrt.f32 %v867_v14 }
 0x358   :  { %v4476_v4 = vpop.permute.xlu1 %2420 }
 0x359   :  { %5555 = vst [vmem:[#allocation58_spill] sm:$0xff] %v4476_v4 }
 0x35c   :  { %v2423_v7 = vpop.permute.xlu1 %2422 }
 0x35d   :  { %v4480_v57 = vsel %vm1184_vm11, %v4476_v4, %v2423_v7  ;;  %v2436_v60 = vmul.f32 0.0, %v2423_v7 }
 0x35e   :  { %5556 = vst [vmem:[#allocation59_spill] sm:$0xff] %v4480_v57 }
 0x35f   :  { %v3482_v17 = vpop.eup %3481  ;;  %2450 = vrot.lane.b32.xlu0 %v2436_v60, %s3497_s5 }
 0x360   :  { %v869_v56 = vmul.f32 %v3482_v17, %v3833_v55  ;;  %v4484_v45 = vpop.permute.xlu1 %2490  ;;  %v4499_v55 = vpop.permute.xlu0 %2632 }
 0x361   :  { %v4488_v3 = vsel %vm1110_vm10, %v4484_v45, %v2493_v54  ;;  %5560 = vst [vmem:[#allocation63_spill] sm:$0xff] %v4499_v55 }
 0x362   :  { %5557 = vst [vmem:[#allocation60_spill] sm:$0xff] %v4488_v3 }
 0x363   :  { %872 = vperm.xlu0 %3247, %v869_v56  }
 0x364   :  { %v4490_v25 = vpop.permute.xlu1 %2560  ;;  %v4501_v17 = vpop.permute.xlu0 %2636 }
 0x365   :  { %5558 = vst [vmem:[#allocation61_spill] sm:$0xff] %v4490_v25  ;;  %5561 = vst [vmem:[#allocation64_spill] sm:$0xff] %v4501_v17 }
 0x368   :  { %v4492_v14 = vpop.permute.xlu1 %2564  ;;  %v4503_v54 = vpop.permute.xlu0 %1874 }
 0x369   :  { %5562 = vst [vmem:[#allocation65_spill] sm:$0xff] %v4503_v54 }
 0x36c   :  { %v2567_v4 = vpop.permute.xlu1 %2566  ;;  %v4505_v56 = vpop.permute.xlu0 %2018 }
 0x36d   :  { %v4496_v7 = vsel %vm1036_vm12, %v4492_v14, %v2567_v4  ;;  %v2580_v60 = vmul.f32 0.0, %v2567_v4  ;;  %5563 = vst [vmem:[#allocation66_spill] sm:$0xff] %v4505_v56  ;;  %v4514_v4 = vmul.f32 0.0, %v4029_v58  ;;  %v935_v56 = vsel %vm5478_vm13, %v4042_v61, %v4052_v42 }
 0x36e   :  { %5559 = vst [vmem:[#allocation62_spill] sm:$0xff] %v4496_v7 }
 0x36f   :  { %2594 = vrot.lane.b32.xlu0 %v2580_v60, %s3498_s25  ;;  %v934_v60 = vsel %vm5478_vm13, %v4029_v58, %v4042_v61  ;;  %v1009_v58 = vsel %vm5481_vm14, %v4070_v2, %v4083_v63  ;;  %v1010_v61 = vsel %vm5481_vm14, %v4083_v63, %v4093_v11  ;;  %v1083_v63 = vsel %vm5484_vm15, %v4101_v13, %v4226_v40 }
 0x370   :  { %v4507_v3 = vpop.permute.xlu0 %2162 }
 0x371   :  { %5564 = vst [vmem:[#allocation67_spill] sm:$0xff] %v4507_v3  ;;  %v4526_v3 = vmul.f32 0.0, %v4216_v28 }
 0x373   :  { %5567 = vst [vmem:[#allocation70_spill] sm:$0xff] %v4526_v3  ;;  %v1156_v3 = vsel %vm5485_vm8, %v4116_v31, %v4233_v46 }
 0x374   :  { %v4509_v57 = vpop.permute.xlu0 %2306 }
 0x375   :  { %5565 = vst [vmem:[#allocation68_spill] sm:$0xff] %v4509_v57  ;;  %v936_v57 = vsel %vm5478_vm13, %v4052_v42, %v4209_v0  ;;  %v4540_v42 = vsel %vm5484_vm15, %v4226_v40, %v4243_v24  ;;  %vm5488_vm13 = vcmask 801792   ;;  %v4565_v24 = vsel %vm5485_vm8, %v4124_v33, %v4129_v37 }
 0x376   :  { %v4575_v40 = vsel %vm5488_vm13, %v4260_v9, %v4277_v36 }
 0x3d1   :  { %v4511_v25 = vpop.permute.xlu0 %2450 }
 0x3d2   :  { %5566 = vst [vmem:[#allocation69_spill] sm:$0xff] %v4511_v25  ;;  %v1008_v25 = vsel %vm5481_vm14, %v4065_v44, %v4070_v2  ;;  %v4548_v2 = vsel %vm5484_vm15, %v4216_v28, %v4101_v13  ;;  %vm5495_vm14 = vcmask 900096   ;;  %v4570_v13 = vsel %vm5488_vm13, %v4250_v62, %v4140_v41 }
 0x3d3   :  { %v4592_v37 = vsel %vm5495_vm14, %v4142_v12, %v4267_v26  ;;  %vm1696_vm15 = vcmask 15360  }
 0x3e2   :  { %v873_v54 = vpop.permute.xlu0 %872 }
 0x3e3   :  { %v875_v17 = vmul.f32 %v873_v54, %v4354_v38  ;;  %v876_v55 = vmul.f32 %v873_v54, %v4357_v35  ;;  %v877_v7 = vmul.f32 %v873_v54, %v4360_v34  ;;  %v1157_v38 = vsel %vm5485_vm8, %v4233_v46, %v4124_v33 }
 0x3e4   :  { %v878_v46 = vmul.f32 %v873_v54, %v4365_v59  ;;  %v4597_v59 = vsel %vm5495_vm14, %v4267_v26, %v4144_v21  ;;  %v4616_v26 = vsel %vm5497_vm0, %v4160_v49, %v4304_v53  ;;  %vm1622_vm8 = vcmask 113664   ;;  %v5583_v53 = vld [vmem:[#allocation50_spill] sm:$0xff] }
 0x3e5   :  { %v884_v34 = vadd.f32 %v4024_v23, %v875_v17  ;;  %v885_v35 = vadd.f32 %v4024_v23, %v876_v55  ;;  %v886_v28 = vadd.f32 %v4024_v23, %v877_v7  ;;  %v4581_v7 = vsel %vm5488_vm13, %v4140_v41, %v4260_v9 }
 0x3e6   :  { %v4602_v41 = vsel %vm5495_vm14, %v4144_v21, %v4156_v19  ;;  %v4607_v9 = vsel %vm5497_vm0, %v4289_v39, %v4160_v49  ;;  %v887_v21 = vadd.f32 %v4024_v23, %v878_v46  ;;  %v4629_v49 = vsel %vm5500_vm1, %v4316_v48, %v4164_v47 }
 0x3e7   :  { %v4583_v55 = vmax.f32 %v884_v34, 0.0  ;;  %v4585_v33 = vmax.f32 %v885_v35, 0.0  ;;  %v4587_v17 = vmax.f32 %v886_v28, 0.0  ;;  %5568 = vst [vmem:[#allocation71_spill] sm:$0xff] %v4607_v9  ;;  %v4634_v23 = vsel %vm1622_vm8, %v4265_v15, %v4272_v22 }
 0x3e8   :  { %vm1332_vm13 = vcmask 146432   ;;  %v4662_v22 = vsel %vm1696_vm15, %v4404_v10, %v4248_v50  ;;  %vm5502_vm14 = vcmask 932864  }
 0x3e9   :  { %v1017_v54 = vmul.f32 %v1008_v25, %v4583_v55  ;;  %v1018_v34 = vmul.f32 %v1009_v58, %v4585_v33  ;;  %v943_v35 = vmul.f32 %v934_v60, %v4583_v55  ;;  %v944_v28 = vmul.f32 %v935_v56, %v4585_v33 }
 0x3ea   :  { %v1019_v9 = vmul.f32 %v1010_v61, %v4587_v17  ;;  %v945_v25 = vmul.f32 %v936_v57, %v4587_v17  ;;  %v4624_v60 = vsel %vm5500_vm1, %v4162_v51, %v4316_v48  ;;  %v1016_v56 = vmul.f32 0.0, %v4065_v44  ;;  %v5582_v51 = vld [vmem:[#allocation49_spill] sm:$0xff] }
 0x3eb   :  { %v3253_v36 = vpack.i.bf16 %v1018_v34, %v1017_v54  ;;  %v3248_v39 = vpack.i.bf16 %v944_v28, %v943_v35  ;;  %v4640_v57 = vsel %vm327_vm4, %v4394_v16, %v4231_v20  ;;  %v4645_v58 = vsel %vm179_vm5, %v4314_v8, %v4321_v32  ;;  %v5571_v54 = vld [vmem:[#allocation26_spill] sm:$0xff]  ;;  %v5573_v35 = vld [vmem:[#allocation28_spill] sm:$0xff] }
 0x3ec   :  { %v4650_v48 = vsel %vm1332_vm13, %v4351_v27, %v4377_v18  ;;  %v4657_v44 = vsel %vm327_vm4, %v4231_v20, %v4399_v43  ;;  %v4667_v32 = vsel %vm1696_vm15, %v4248_v50, %v4409_v52  ;;  %v5570_v18 = vld [vmem:[#allocation24_spill] sm:$0xff]  ;;  %v4677_v20 = vsel %vm1622_vm8, %v4414_v29, %v4265_v15 }
 0x3ed   :  { %5569 = vst [vmem:[#allocation72_spill] sm:$0xff] %v4650_v48  ;;  %3254 = vrot.lane.b32.xlu1 %v3253_v36, %s3509_s20  ;;  %3249 = vrot.lane.b32.xlu0 %v3248_v39, %s3510_s12  ;;  %v4672_v36 = vsel %vm1622_vm8, %v5570_v18, %v4414_v29  ;;  %v4679_v39 = vmax.f32 %v887_v21, 0.0  ;;  %v3263_v61 = vpack.i.bf16 %v1019_v9, %v1016_v56  ;;  %v5572_v29 = vld [vmem:[#allocation43_spill] sm:$0xff]  ;;  %v5574_v21 = vld [vmem:[#allocation44_spill] sm:$0xff]  ;;  %v5576_v56 = vld [vmem:[#allocation45_spill] sm:$0xff] }
 0x3ee   :  { %v3258_v46 = vpack.i.bf16 %v945_v25, %v4514_v4  ;;  %v4685_v50 = vsel %vm1696_vm15, %v4409_v52, %v4419_v1  ;;  %v4690_v34 = vsel %vm253_vm6, %v4424_v30, %v5571_v54  ;;  %v4695_v15 = vsel %vm253_vm6, %v5571_v54, %v4429_v6  ;;  %v5581_v43 = vld [vmem:[#allocation56_spill] sm:$0xff]  ;;  %v5584_v48 = vld [vmem:[#allocation51_spill] sm:$0xff] }
 0x3ef   :  { %v4700_v9 = vsel %vm179_vm5, %v5573_v35, %v5572_v29  ;;  %v4703_v4 = vmul.f32 0.0, %v4250_v62  ;;  %v4708_v52 = vsel %vm179_vm5, %v5572_v29, %v4314_v8  ;;  %v1165_v1 = vmul.f32 %v1156_v3, %v4583_v55  ;;  %v5575_v62 = vld [vmem:[#allocation32_spill] sm:$0xff]  ;;  %v5579_v29 = vld [vmem:[#allocation34_spill] sm:$0xff] }
 0x3f0   :  { %v1166_v28 = vmul.f32 %v1157_v38, %v4585_v33  ;;  %v4717_v25 = vsel %vm253_vm6, %v4429_v6, %v5574_v21  ;;  %v4722_v54 = vsel %vm105_vm7, %v5576_v56, %v5575_v62  ;;  %v1091_v8 = vmul.f32 %v4548_v2, %v4583_v55  ;;  %v5578_v38 = vld [vmem:[#allocation47_spill] sm:$0xff] }
 0x3f1   :  { %3264 = vrot.lane.b32.xlu1 %v3263_v61, %s3509_s20  ;;  %3259 = vrot.lane.b32.xlu0 %v3258_v46, %s3510_s12  ;;  %v1092_v61 = vmul.f32 %v1083_v63, %v4585_v33  ;;  %v5577_v46 = vld [vmem:[#allocation46_spill] sm:$0xff]  ;;  %v4735_v6 = vsel %vm1332_vm13, %v5579_v29, %v5578_v38  ;;  %v1020_v21 = vmul.f32 %v4093_v11, %v4679_v39  ;;  %v5580_v63 = vld [vmem:[#allocation48_spill] sm:$0xff] }
 0x3f2   :  { %v4730_v3 = vsel %vm105_vm7, %v5575_v62, %v5577_v46  ;;  %v946_v16 = vmul.f32 %v4209_v0, %v4679_v39  ;;  %v4744_v2 = vsel %vm1332_vm13, %v5578_v38, %v4351_v27  ;;  %v4749_v62 = vsel %vm105_vm7, %v5577_v46, %v5580_v63 }
 0x3f3   :  { %v4754_v47 = vsel %vm1258_vm9, %v5582_v51, %v5581_v43  ;;  %v4759_v11 = vsel %vm1258_vm9, %v5581_v43, %v5583_v53  ;;  %v1164_v0 = vmul.f32 0.0, %v4116_v31  ;;  %v4765_v27 = vsel %vm1184_vm11, %v4474_v5, %v5584_v48 }
 0x3f4   :  { %v3273_v46 = vpack.i.bf16 %v1166_v28, %v1165_v1  ;;  %v1167_v38 = vmul.f32 %v4565_v24, %v4587_v17  ;;  %v3268_v63 = vpack.i.bf16 %v1092_v61, %v1091_v8  ;;  %v1093_v53 = vmul.f32 %v4540_v42, %v4587_v17  ;;  %v5585_v42 = vld [vmem:[#allocation58_spill] sm:$0xff] }
 0x3f5   :  { %1034 = vrot.lane.b32.xlu1 %v1020_v21, %s3509_s20  ;;  %960 = vrot.lane.b32.xlu0 %v946_v16, %s3510_s12  ;;  %v1313_v31 = vmul.f32 %v4592_v37, %v4583_v55  ;;  %v1314_v43 = vmul.f32 %v4597_v59, %v4585_v33  ;;  %v1239_v5 = vmul.f32 %v4570_v13, %v4583_v55  ;;  %v5586_v59 = vld [vmem:[#allocation53_spill] sm:$0xff]  ;;  %v5587_v28 = vld [vmem:[#allocation54_spill] sm:$0xff]  ;;  %v5591_v21 = vld [vmem:[#allocation23_spill] sm:$0xff] }
 0x3f6   :  { %v1240_v16 = vmul.f32 %v4581_v7, %v4585_v33  ;;  %v4783_v1 = vmul.f32 %v4602_v41, %v4587_v17  ;;  %v4787_v24 = vmul.f32 %v4575_v40, %v4587_v17  ;;  %v4792_v37 = vsel %vm1184_vm11, %v5584_v48, %v5585_v42  ;;  %v5588_v7 = vld [vmem:[#allocation61_spill] sm:$0xff] }
 0x3f7   :  { %v4797_v13 = vsel %vm1110_vm10, %v5586_v59, %v4484_v45  ;;  %v4802_v8 = vsel %vm1036_vm12, %v5588_v7, %v5587_v28  ;;  %v4807_v40 = vsel %vm1036_vm12, %v5587_v28, %v4492_v14  ;;  %v4810_v41 = vmul.f32 0.0, %v4142_v12  ;;  %v5590_v45 = vld [vmem:[#allocation10_spill] sm:$0xff]  ;;  %v5593_v12 = vld [vmem:[#allocation25_spill] sm:$0xff] }
 0x3f8   :  { %5589 = vst [vmem:[#allocation24_spill] sm:$0xff] %v4802_v8  ;;  %v3283_v48 = vpack.i.bf16 %v1167_v38, %v1164_v0  ;;  %v1168_v61 = vmul.f32 %v5590_v45, %v4679_v39  ;;  %v1094_v42 = vmul.f32 %v5591_v21, %v4679_v39  ;;  %v5592_v7 = vld [vmem:[#allocation70_spill] sm:$0xff]  ;;  %v3293_v8 = vpack.i.bf16 %v1314_v43, %v1313_v31 }
 0x3f9   :  { %3274 = vrot.lane.b32.xlu1 %v3273_v46, %s3507_s21  ;;  %3269 = vrot.lane.b32.xlu0 %v3268_v63, %s3508_s11  ;;  %v3278_v59 = vpack.i.bf16 %v1093_v53, %v5592_v7  ;;  %v4821_v14 = vmul.f32 %v4156_v19, %v4679_v39  ;;  %v4825_v28 = vmul.f32 %v5593_v12, %v4679_v39  ;;  %v5594_v19 = vld [vmem:[#allocation71_spill] sm:$0xff] }
 0x3fa   :  { %v3288_v46 = vpack.i.bf16 %v1240_v16, %v1239_v5  ;;  %v3303_v0 = vpack.i.bf16 %v4783_v1, %v4810_v41  ;;  %v3298_v38 = vpack.i.bf16 %v4787_v24, %v4703_v4  ;;  %v4833_v63 = vmul.f32 %v4624_v60, %v4583_v55 }
 0x3fb   :  { %v4837_v53 = vmul.f32 %v4629_v49, %v4585_v33  ;;  %v4841_v31 = vmul.f32 %v5594_v19, %v4583_v55  ;;  %v4845_v5 = vmul.f32 %v4640_v57, %v4585_v33  ;;  %v4849_v43 = vmul.f32 %v4657_v44, %v4587_v17  ;;  %v5596_v19 = vld [vmem:[#allocation52_spill] sm:$0xff] }
 0x3fc   :  { %v4855_v60 = vmul.f32 %v4616_v26, %v4585_v33  ;;  %v4859_v49 = vmul.f32 %v4662_v22, %v4585_v33  ;;  %v4863_v57 = vmul.f32 %v4667_v32, %v4587_v17  ;;  %v4869_v4 = vmul.f32 %v4672_v36, %v4585_v33 }
 0x3fd   :  { %3284 = vrot.lane.b32.xlu1 %v3283_v48, %s3507_s21  ;;  %3279 = vrot.lane.b32.xlu0 %v3278_v59, %s3508_s11  ;;  %v4873_v16 = vmul.f32 %v4677_v20, %v4587_v17  ;;  %v4877_v26 = vmul.f32 %v4404_v10, %v4583_v55  ;;  %v4883_v32 = vmul.f32 %v4685_v50, %v4679_v39  ;;  %v5612_v20 = vld [vmem:[#allocation27_spill] sm:$0xff] }
 0x3fe   :  { %v4887_v1 = vmul.f32 %v5570_v18, %v4583_v55  ;;  %v4891_v36 = vmul.f32 %v4634_v23, %v4679_v39  ;;  %v4897_v10 = vmul.f32 %v4690_v34, %v4585_v33  ;;  %v4901_v24 = vmul.f32 %v4695_v15, %v4587_v17  ;;  %v5610_v15 = vld [vmem:[#allocation13_spill] sm:$0xff]  ;;  %v5611_v18 = vld [vmem:[#allocation12_spill] sm:$0xff] }
 0x3ff   :  { %v4905_v50 = vmul.f32 %v4700_v9, %v4585_v33  ;;  %v4915_v34 = vmul.f32 %v4708_v52, %v4587_v17  ;;  %v4921_v9 = vmul.f32 %v4424_v30, %v4583_v55  ;;  %v4925_v59 = vmul.f32 %v4717_v25, %v4679_v39 }
 0x400   :  { %v4929_v7 = vmul.f32 %v5573_v35, %v4583_v55  ;;  %v4935_v52 = vmul.f32 %v4645_v58, %v4679_v39  ;;  %v4939_v48 = vmul.f32 %v4722_v54, %v4585_v33  ;;  %v4943_v30 = vmul.f32 %v4730_v3, %v4587_v17 }
 0x401   :  { %1182 = vrot.lane.b32.xlu1 %v1168_v61, %s3507_s21  ;;  %1108 = vrot.lane.b32.xlu0 %v1094_v42, %s3508_s11  ;;  %v4949_v35 = vmul.f32 %v4735_v6, %v4585_v33  ;;  %v4953_v45 = vmul.f32 %v4744_v2, %v4587_v17  ;;  %v4957_v58 = vmul.f32 %v5576_v56, %v4583_v55  ;;  %v1385_v22 = vmul.f32 0.0, %v5612_v20  ;;  %v5617_v20 = vld [vmem:[#allocation35_spill] sm:$0xff] }
 0x402   :  { %v4967_v6 = vmul.f32 %v4749_v62, %v4679_v39  ;;  %v4973_v56 = vmul.f32 %v5579_v29, %v4583_v55  ;;  %v4981_v21 = vmul.f32 %v4754_v47, %v4585_v33  ;;  %v4987_v62 = vmul.f32 %v4759_v11, %v4587_v17  ;;  %v5597_v11 = vld [vmem:[#allocation57_spill] sm:$0xff] }
 0x403   :  { %v4991_v12 = vmul.f32 %v4765_v27, %v4585_v33  ;;  %v4995_v29 = vmul.f32 %v4792_v37, %v4587_v17  ;;  %v5001_v47 = vmul.f32 %v5582_v51, %v4583_v55  ;;  %v5009_v42 = vmul.f32 %v5597_v11, %v4583_v55  ;;  %v5598_v51 = vld [vmem:[#allocation59_spill] sm:$0xff]  ;;  %v5600_v27 = vld [vmem:[#allocation24_spill] sm:$0xff]  ;;  %v5606_v37 = vld [vmem:[#allocation62_spill] sm:$0xff] }
 0x404   :  { %v5025_v11 = vmul.f32 %v4797_v13, %v4585_v33  ;;  %v5033_v2 = vmul.f32 %v5600_v27, %v4585_v33  ;;  %v5603_v13 = vld [vmem:[#allocation55_spill] sm:$0xff]  ;;  %v5604_v27 = vld [vmem:[#allocation61_spill] sm:$0xff]  ;;  %v5057_v41 = vmul.f32 %v5606_v37, %v4679_v39  ;;  %v1451_v37 = vsel %vm5500_vm1, %v5611_v18, %v5610_v15 }
 0x405   :  { %3294 = vrot.lane.b32.xlu1 %v3293_v8, %s3505_s28  ;;  %3289 = vrot.lane.b32.xlu0 %v3288_v46, %s3506_s16  ;;  %v5595_v8 = vld [vmem:[#allocation72_spill] sm:$0xff]  ;;  %v5019_v46 = vmul.f32 %v5598_v51, %v4679_v39  ;;  %v5039_v51 = vmul.f32 %v4807_v40, %v4587_v17  ;;  %v5047_v54 = vmul.f32 %v5603_v13, %v4679_v39  ;;  %v5608_v13 = vld [vmem:[#allocation30_spill] sm:$0xff]  ;;  %vm962_vm1 = vcmask 277504  }
 0x406   :  { %v4977_v61 = vmul.f32 %v5595_v8, %v4679_v39  ;;  %v5005_v8 = vmul.f32 %v5596_v19, %v4679_v39  ;;  %v5601_v19 = vld [vmem:[#allocation53_spill] sm:$0xff]  ;;  %v5053_v25 = vmul.f32 %v5604_v27, %v4583_v55  ;;  %5607 = vst [vmem:[#allocation28_spill] sm:$0xff] %v5057_v41  ;;  %v3308_v40 = vpack.i.bf16 %v4855_v60, %v4841_v31  ;;  %v5622_v41 = vld [vmem:[#allocation18_spill] sm:$0xff] }
 0x407   :  { %v5043_v3 = vmul.f32 %v5601_v19, %v4583_v55  ;;  %v1460_v23 = vmul.f32 %v1451_v37, %v4587_v17  ;;  %v5616_v31 = vld [vmem:[#allocation33_spill] sm:$0xff] }
 0x408   :  { %5605 = vst [vmem:[#allocation43_spill] sm:$0xff] %v5053_v25  ;;  %v5614_v25 = vld [vmem:[#allocation14_spill] sm:$0xff] }
 0x409   :  { %3304 = vrot.lane.b32.xlu1 %v3303_v0, %s3505_s28  ;;  %3299 = vrot.lane.b32.xlu0 %v3298_v38, %s3506_s16  ;;  %v5599_v0 = vld [vmem:[#allocation60_spill] sm:$0xff]  ;;  %5602 = vst [vmem:[#allocation26_spill] sm:$0xff] %v5043_v3  ;;  %v1522_v60 = vsel %vm5501_vm2, %v5614_v25, %v5616_v31  ;;  %v5623_v3 = vld [vmem:[#allocation37_spill] sm:$0xff] }
 0x40a   :  { %v5029_v38 = vmul.f32 %v5599_v0, %v4587_v17  ;;  %v5609_v0 = vld [vmem:[#allocation29_spill] sm:$0xff] }
 0x40b   :  { %v1379_v27 = vsel %vm5497_vm0, %v5609_v0, %v5608_v13  ;;  %v5613_v0 = vld [vmem:[#allocation11_spill] sm:$0xff]  ;;  %vm1667_vm0 = vcmask 1031168  }
 0x40c   :  { %v1388_v19 = vmul.f32 %v1379_v27, %v4587_v17  ;;  %v1457_v44 = vmul.f32 0.0, %v5613_v0  ;;  %v5618_v27 = vld [vmem:[#allocation15_spill] sm:$0xff]  ;;  %v5620_v0 = vld [vmem:[#allocation36_spill] sm:$0xff] }
 0x40d   :  { %1330 = vrot.lane.b32.xlu1 %v4821_v14, %s3505_s28  ;;  %1256 = vrot.lane.b32.xlu0 %v4825_v28, %s3506_s16  ;;  %v3313_v28 = vpack.i.bf16 %v4837_v53, %v4833_v63  ;;  %v5615_v63 = vld [vmem:[#allocation31_spill] sm:$0xff]  ;;  %v1594_v37 = vsel %vm5502_vm14, %v5618_v27, %v5617_v20 }
 0x40e   :  { %v3323_v18 = vpack.i.bf16 %v1460_v23, %v1457_v44  ;;  %v3318_v14 = vpack.i.bf16 %v1388_v19, %v1385_v22  ;;  %v1521_v53 = vsel %vm5501_vm2, %v5615_v63, %v5614_v25  ;;  %v1461_v22 = vmul.f32 %v5610_v15, %v4679_v39  ;;  %v5621_v15 = vld [vmem:[#allocation17_spill] sm:$0xff] }
 0x40f   :  { %v1389_v23 = vmul.f32 %v5608_v13, %v4679_v39  ;;  %v1603_v25 = vmul.f32 %v1594_v37, %v4583_v55 }
 0x411   :  { %3314 = vrot.lane.b32.xlu1 %v3313_v28, %s3492_s24  ;;  %3309 = vrot.lane.b32.xlu0 %v3308_v40, %s3493_s27  ;;  %v5619_v40 = vld [vmem:[#allocation16_spill] sm:$0xff]  ;;  %v1531_v28 = vmul.f32 %v1522_v60, %v4585_v33  ;;  %v1529_v60 = vmul.f32 0.0, %v5615_v63  ;;  %v5625_v63 = vld [vmem:[#allocation39_spill] sm:$0xff] }
 0x412   :  { %v1595_v44 = vsel %vm5502_vm14, %v5617_v20, %v5619_v40  ;;  %v1596_v13 = vsel %vm5502_vm14, %v5619_v40, %v5621_v15  ;;  %v1668_v40 = vsel %vm1667_vm0, %v5623_v3, %v5622_v41 }
 0x413   :  { %v1604_v19 = vmul.f32 %v1595_v44, %v4585_v33  ;;  %v1605_v44 = vmul.f32 %v1596_v13, %v4587_v17  ;;  %v1606_v13 = vmul.f32 %v5621_v15, %v4679_v39  ;;  %v5629_v15 = vld [vmem:[#allocation40_spill] sm:$0xff] }
 0x415   :  { %3324 = vrot.lane.b32.xlu1 %v3323_v18, %s3492_s24  ;;  %3319 = vrot.lane.b32.xlu0 %v3318_v14, %s3493_s27  ;;  %v1530_v14 = vmul.f32 %v1521_v53, %v4583_v55  ;;  %v1523_v18 = vsel %vm5501_vm2, %v5616_v31, %v5620_v0  ;;  %v3333_v20 = vpack.i.bf16 %v1604_v19, %v1603_v25  ;;  %v5624_v25 = vld [vmem:[#allocation38_spill] sm:$0xff]  ;;  %vm5652_vm2 = vcmask 588800  }
 0x416   :  { %v1532_v53 = vmul.f32 %v1523_v18, %v4587_v17  ;;  %v1669_v19 = vsel %vm1667_vm0, %v5622_v41, %v5624_v25  ;;  %vm5653_vm14 = vmmov %vm5652_vm2 }
 0x417   :  { %v3328_v37 = vpack.i.bf16 %v1531_v28, %v1530_v14  ;;  %v5627_v28 = vld [vmem:[#allocation20_spill] sm:$0xff] }
 0x418   :  { %v1742_v18 = vsel %vm298_vm3, %v5625_v63, %v5627_v28 }
 0x419   :  { %1475 = vrot.lane.b32.xlu1 %v1461_v22, %s3492_s24  ;;  %1403 = vrot.lane.b32.xlu0 %v1389_v23, %s3493_s27  ;;  %v1602_v22 = vmul.f32 0.0, %v5618_v27  ;;  %v3338_v23 = vpack.i.bf16 %v1532_v53, %v1529_v60  ;;  %v5626_v27 = vld [vmem:[#allocation19_spill] sm:$0xff]  ;;  %v1678_v53 = vmul.f32 %v1669_v19, %v4585_v33  ;;  %v5628_v60 = vld [vmem:[#allocation21_spill] sm:$0xff]  ;;  %v1676_v19 = vmul.f32 0.0, %v5623_v3 }
 0x41a   :  { %v1741_v14 = vsel %vm298_vm3, %v5626_v27, %v5625_v63  ;;  %v1680_v3 = vmul.f32 %v5629_v15, %v4679_v39 }
 0x41b   :  { %v3343_v31 = vpack.i.bf16 %v1605_v44, %v1602_v22  ;;  %v1750_v41 = vmul.f32 %v1741_v14, %v4583_v55  ;;  %v1677_v44 = vmul.f32 %v1668_v40, %v4583_v55  ;;  %v1743_v22 = vsel %vm298_vm3, %v5627_v28, %v5628_v60 }
 0x41c   :  { %v1752_v63 = vmul.f32 %v1743_v22, %v4587_v17  ;;  %v1749_v14 = vmul.f32 0.0, %v5626_v27  ;;  %v5632_v27 = vld [vmem:[#allocation41_spill] sm:$0xff]  ;;  %v5633_v22 = vpack.i.bf16 %v4849_v43, %v4845_v5  ;;  %v5637_v5 = vpack.i.bf16 %v4891_v36, %v4887_v1  ;;  %v2635_v43 = vpop.permute.xlu1 %2634 }
 0x41d   :  { %3334 = vrot.lane.b32.xlu1 %v3333_v20, %s3504_s8  ;;  %3329 = vrot.lane.b32.xlu0 %v3328_v37, %s3491_s23  ;;  %v1533_v20 = vmul.f32 %v5620_v0, %v4679_v39  ;;  %v1751_v37 = vmul.f32 %v1742_v18, %v4585_v33  ;;  %v1670_v0 = vsel %vm1667_vm0, %v5624_v25, %v5629_v15  ;;  %v5630_v25 = vld [vmem:[#allocation22_spill] sm:$0xff] }
 0x41e   :  { %v1679_v40 = vmul.f32 %v1670_v0, %v4587_v17  ;;  %v3363_v18 = vpack.i.bf16 %v1752_v63, %v1749_v14  ;;  %v5635_v15 = vpack.i.bf16 %v4873_v16, %v4869_v4  ;;  %v5636_v0 = vpack.i.bf16 %v4883_v32, %v4877_v26 }
 0x41f   :  { %v5640_v4 = vpack.i.bf16 %v4925_v59, %v4921_v9  ;;  %v5641_v16 = vpack.i.bf16 %v4935_v52, %v4929_v7  ;;  %v5642_v32 = vpack.i.bf16 %v4943_v30, %v4939_v48  ;;  %v5643_v1 = vpack.i.bf16 %v4953_v45, %v4949_v35  ;;  %v5256_v45 = vpop.permute.xlu0 %2594 }
 0x420   :  { %v3358_v28 = vpack.i.bf16 %v1679_v40, %v1676_v19  ;;  %v2639_v26 = vpop.permute.xlu1 %2638  ;;  %v5647_v9 = vpack.i.bf16 %v4995_v29, %v4991_v12  ;;  %v5648_v7 = vpack.i.bf16 %v5005_v8, %v5001_v47  ;;  %v5649_v52 = vpack.i.bf16 %v5019_v46, %v5009_v42  ;;  %v5660_v29 = vld [vmem:[#allocation64_spill] sm:$0xff] }
 0x421   :  { %3344 = vrot.lane.b32.xlu1 %v3343_v31, %s3504_s8  ;;  %3339 = vrot.lane.b32.xlu0 %v3338_v23, %s3491_s23  ;;  %v3353_v31 = vpack.i.bf16 %v1751_v37, %v1750_v41  ;;  %v3348_v23 = vpack.i.bf16 %v1678_v53, %v1677_v44  ;;  %v1753_v41 = vmul.f32 %v5628_v60, %v4679_v39 }
 0x422   :  { %v1856_v37 = vmul.f32 %v5632_v27, %v4583_v55  ;;  %v5634_v60 = vpack.i.bf16 %v4863_v57, %v4859_v49  ;;  %v5638_v49 = vpack.i.bf16 %v4901_v24, %v4897_v10  ;;  %v5639_v57 = vpack.i.bf16 %v4915_v34, %v4905_v50 }
 0x423   :  { %v5644_v10 = vpack.i.bf16 %v4967_v6, %v4957_v58  ;;  %v5645_v24 = vpack.i.bf16 %v4977_v61, %v4973_v56  ;;  %v5646_v34 = vpack.i.bf16 %v4987_v62, %v4981_v21  ;;  %v5650_v30 = vpack.i.bf16 %v5029_v38, %v5025_v11  ;;  %v2681_v58 = vld [vmem:[%s5431_s2 + $0x8] sm:$0xff]  ;;  %v5654_v56 = vld [vmem:[#allocation26_spill] sm:$0xff]  ;;  %v5657_v21 = vld [vmem:[#allocation43_spill] sm:$0xff] }
 0x424   :  { %v5216_v36 = vpop.permute.xlu1 %1946  ;;  %v5651_v35 = vpack.i.bf16 %v5039_v51, %v5033_v2  ;;  %3017 = vmatprep.mubr.msk.f32.mxu0 %vm5652_vm2, %v2681_v58  ;;  %3018 = vmatprep.mubr.msk.f32.mxu1 %vm5653_vm14, %v2681_v58  ;;  %v5655_v61 = vpack.i.bf16 %v5047_v54, %v5654_v56  ;;  %v5656_v2 = vld [vmem:[#allocation28_spill] sm:$0xff]  ;;  %v5659_v62 = vld [vmem:[#allocation63_spill] sm:$0xff]  ;;  %v2641_v46 = vsel %vm962_vm1, %v2635_v43, %v5660_v29 }
 0x425   :  { %1620 = vrot.lane.b32.xlu1 %v1606_v13, %s3504_s8  ;;  %1547 = vrot.lane.b32.xlu0 %v1533_v20, %s3491_s23  ;;  %v5631_v13 = vld [vmem:[#allocation42_spill] sm:$0xff]  ;;  %v5658_v42 = vpack.i.bf16 %v5656_v2, %v5657_v21  ;;  %v2640_v12 = vsel %vm962_vm1, %v5659_v62, %v2635_v43  ;;  %v2650_v38 = vmul.f32 %v2641_v46, %v4587_v17 }
 0x426   :  { %v1850_v20 = vsel %vm327_vm4, %v5631_v13, %v5630_v25  ;;  %v2649_v11 = vmul.f32 %v2640_v12, %v4585_v33  ;;  %v2642_v63 = vsel %vm962_vm1, %v5660_v29, %v2639_v26 }
 0x427   :  { %v1859_v44 = vmul.f32 %v1850_v20, %v4679_v39  ;;  %v2651_v25 = vmul.f32 %v2642_v63, %v4679_v39 }
 0x428   :  { %v5226_v50 = vpop.permute.xlu1 %2090 }
 0x429   :  { %3354 = vrot.lane.b32.xlu1 %v3353_v31, %s3490_s18  ;;  %3349 = vrot.lane.b32.xlu0 %v3348_v23, %s3503_s29  ;;  %v3373_v53 = vpack.i.bf16 %v1859_v44, %v1856_v37 }
 0x42c   :  { %v5236_v59 = vpop.permute.xlu1 %2234 }
 0x42d   :  { %3364 = vrot.lane.b32.xlu1 %v3363_v18, %s3490_s18  ;;  %3359 = vrot.lane.b32.xlu0 %v3358_v28, %s3503_s29  ;;  %v2648_v28 = vmul.f32 %v5659_v62, %v4583_v55 }
 0x430   :  { %v5246_v48 = vpop.permute.xlu1 %2378 }
 0x431   :  { %1767 = vrot.lane.b32.xlu1 %v1753_v41, %s3490_s18  ;;  %1694 = vrot.lane.b32.xlu0 %v1680_v3, %s3503_s29 }
 0x434   :  { %v5261_v6 = vpop.permute.xlu1 %2522 }
 0x435   :  { %3374 = vrot.lane.b32.xlu1 %v3373_v53, %s3489_s15  ;;  %3369 = vrot.lane.b32.xlu0 %v5633_v22, %s3489_s15  ;;  %v2652_v53 = vmul.f32 0.0, %v2639_v26 }
 0x439   :  { %3379 = vrot.lane.b32.xlu1 %v5634_v60, %s3502_s17  ;;  %3384 = vrot.lane.b32.xlu0 %v5635_v15, %s3501_s1 }
 0x43d   :  { %3389 = vrot.lane.b32.xlu1 %v5636_v0, %s3502_s17  ;;  %3394 = vrot.lane.b32.xlu0 %v5637_v5, %s3501_s1 }
 0x441   :  { %3399 = vrot.lane.b32.xlu1 %v5638_v49, %s3488_s14  ;;  %3404 = vrot.lane.b32.xlu0 %v5639_v57, %s3487_s10 }
 0x445   :  { %3409 = vrot.lane.b32.xlu1 %v5640_v4, %s3488_s14  ;;  %3414 = vrot.lane.b32.xlu0 %v5641_v16, %s3487_s10 }
 0x449   :  { %3419 = vrot.lane.b32.xlu1 %v5642_v32, %s3486_s9  ;;  %3424 = vrot.lane.b32.xlu0 %v5643_v1, %s3500_s30 }
 0x44d   :  { %3429 = vrot.lane.b32.xlu1 %v5644_v10, %s3486_s9  ;;  %3434 = vrot.lane.b32.xlu0 %v5645_v24, %s3500_s30 }
 0x451   :  { %3439 = vrot.lane.b32.xlu1 %v5646_v34, %s3499_s26  ;;  %3444 = vrot.lane.b32.xlu0 %v5647_v9, %s3497_s5 }
 0x455   :  { %3449 = vrot.lane.b32.xlu1 %v5648_v7, %s3499_s26  ;;  %3454 = vrot.lane.b32.xlu0 %v5649_v52, %s3497_s5 }
 0x459   :  { %3459 = vrot.lane.b32.xlu1 %v5650_v30, %s3496_s13  ;;  %3464 = vrot.lane.b32.xlu0 %v5651_v35, %s3498_s25 }
 0x45d   :  { %3469 = vrot.lane.b32.xlu1 %v5655_v61, %s3496_s13  ;;  %3474 = vrot.lane.b32.xlu0 %v5658_v42, %s3498_s25 }
 0x45f   :  { %v3255_v47 = vpop.permute.xlu1 %3254  ;;  %v3250_v8 = vpop.permute.xlu0 %3249 }
 0x460   :  { %v3257_v51 = vunpack.i.h.bf16 %v3255_v47  ;;  %v3256_v54 = vunpack.i.l.bf16 %v3255_v47  ;;  %v3252_v31 = vunpack.i.h.bf16 %v3250_v8  ;;  %v3251_v23 = vunpack.i.l.bf16 %v3250_v8 }
 0x461   :  { %2660 = vrot.lane.b32.xlu1 %v2649_v11, %s3495_s0  ;;  %2662 = vrot.lane.b32.xlu0 %v2650_v38, %s3495_s0 }
 0x462   :  { %v964_v40 = vsel %vm962_vm1, %v3251_v23, %v3252_v31  ;;  %v1038_v19 = vsel %vm1036_vm12, %v3256_v54, %v3257_v51 }
 0x463   :  { %v3265_v14 = vpop.permute.xlu1 %3264  ;;  %v3260_v18 = vpop.permute.xlu0 %3259  ;;  %v3053_v13 = vpack.c.bf16 %v1038_v19, %v964_v40 }
 0x464   :  { %v3267_v20 = vunpack.i.h.bf16 %v3265_v14  ;;  %v3266_v41 = vunpack.i.l.bf16 %v3265_v14  ;;  %v3262_v3 = vunpack.i.h.bf16 %v3260_v18  ;;  %v3261_v27 = vunpack.i.l.bf16 %v3260_v18 }
 0x465   :  { %2658 = vrot.lane.b32.xlu1 %v2648_v28, %s3495_s0  ;;  %2664 = vrot.lane.b32.xlu0 %v2651_v25, %s3495_s0 }
 0x466   :  { %v1037_v37 = vsel %vm1036_vm12, %v3266_v41, %v3256_v54  ;;  %v963_v44 = vsel %vm962_vm1, %v3261_v27, %v3251_v23  ;;  %3054 = vmatprep.subr.bf16.mxu0 %v3053_v13  ;;  %v1039_v22 = vsel %vm1036_vm12, %v3257_v51, %v3267_v20  ;;  %v965_v60 = vsel %vm962_vm1, %v3252_v31, %v3262_v3 }
 0x467   :  { %v3055_v15 = vpack.c.bf16 %v1037_v37, %v963_v44  ;;  %v1035_v0 = vpop.permute.xlu1 %1034  ;;  %v961_v5 = vpop.permute.xlu0 %960  ;;  %v3103_v4 = vpack.c.bf16 %v1039_v22, %v965_v60 }
 0x468   :  { %v1040_v43 = vsel %vm1036_vm12, %v3267_v20, %v1035_v0  ;;  %v966_v49 = vsel %vm962_vm1, %v3262_v3, %v961_v5  ;;  %vm5666_vm1 = vcmask 932864   ;;  %vm5680_vm12 = vcmask 908288  }
 0x469   :  { %v3101_v57 = vpack.c.bf16 %v1040_v43, %v966_v49  ;;  %2666 = vrot.lane.b32.xlu1 %v2652_v53, %s3495_s0  ;;  %3056 = vmatpush1.bf16.msra.mxu0 %v3055_v15  ;;  %vm5667_vm2 = vmmov %vm5666_vm1 }
 0x46a   :  { %vm5682_vm14 = vmmov %vm5680_vm12 }
 0x46b   :  { %v3275_v16 = vpop.permute.xlu1 %3274  ;;  %v3270_v32 = vpop.permute.xlu0 %3269  ;;  %3102 = vmatprep.subr.bf16.mxu1 %v3101_v57 }
 0x46c   :  { %v3277_v26 = vunpack.i.h.bf16 %v3275_v16  ;;  %v3276_v1 = vunpack.i.l.bf16 %v3275_v16  ;;  %v3272_v10 = vunpack.i.h.bf16 %v3270_v32  ;;  %v3271_v24 = vunpack.i.l.bf16 %v3270_v32  ;;  %3104 = vmatpush1.bf16.msra.mxu1 %v3103_v4 }
 0x46e   :  { %v1112_v34 = vsel %vm1110_vm10, %v3271_v24, %v3272_v10  ;;  %v1186_v9 = vsel %vm1184_vm11, %v3276_v1, %v3277_v26 }
 0x46f   :  { %v3285_v7 = vpop.permute.xlu1 %3284  ;;  %v3280_v52 = vpop.permute.xlu0 %3279  ;;  %v3057_v30 = vpack.c.bf16 %v1186_v9, %v1112_v34 }
 0x470   :  { %v3287_v35 = vunpack.i.h.bf16 %v3285_v7  ;;  %v3286_v58 = vunpack.i.l.bf16 %v3285_v7  ;;  %v3282_v56 = vunpack.i.h.bf16 %v3280_v52  ;;  %v3281_v61 = vunpack.i.l.bf16 %v3280_v52 }
 0x471   :  { %3058 = vmatprep.subr.bf16.mxu0 %v3057_v30 }
 0x472   :  { %v1185_v2 = vsel %vm1184_vm11, %v3286_v58, %v3276_v1  ;;  %v1111_v21 = vsel %vm1110_vm10, %v3281_v61, %v3271_v24  ;;  %v1187_v42 = vsel %vm1184_vm11, %v3277_v26, %v3287_v35  ;;  %v1113_v62 = vsel %vm1110_vm10, %v3272_v10, %v3282_v56 }
 0x473   :  { %v3059_v12 = vpack.c.bf16 %v1185_v2, %v1111_v21  ;;  %v1183_v29 = vpop.permute.xlu1 %1182  ;;  %v1109_v46 = vpop.permute.xlu0 %1108  ;;  %v3107_v38 = vpack.c.bf16 %v1187_v42, %v1113_v62 }
 0x474   :  { %v1188_v47 = vsel %vm1184_vm11, %v3287_v35, %v1183_v29  ;;  %v1114_v8 = vsel %vm1110_vm10, %v3282_v56, %v1109_v46 }
 0x475   :  { %v3105_v11 = vpack.c.bf16 %v1188_v47, %v1114_v8  ;;  %3060 = vmatpush1.bf16.msra.mxu0 %v3059_v12 }
 0x477   :  { %v3295_v51 = vpop.permute.xlu1 %3294  ;;  %v3290_v54 = vpop.permute.xlu0 %3289  ;;  %3106 = vmatprep.subr.bf16.mxu1 %v3105_v11 }
 0x478   :  { %v3297_v31 = vunpack.i.h.bf16 %v3295_v51  ;;  %v3296_v23 = vunpack.i.l.bf16 %v3295_v51  ;;  %v3292_v63 = vunpack.i.h.bf16 %v3290_v54  ;;  %v3291_v40 = vunpack.i.l.bf16 %v3290_v54  ;;  %3108 = vmatpush1.bf16.msra.mxu1 %v3107_v38 }
 0x47a   :  { %v1260_v19 = vsel %vm1258_vm9, %v3291_v40, %v3292_v63  ;;  %v1334_v14 = vsel %vm1332_vm13, %v3296_v23, %v3297_v31 }
 0x47b   :  { %v3305_v18 = vpop.permute.xlu1 %3304  ;;  %v3300_v28 = vpop.permute.xlu0 %3299  ;;  %v3061_v25 = vpack.c.bf16 %v1334_v14, %v1260_v19 }
 0x47c   :  { %v3307_v13 = vunpack.i.h.bf16 %v3305_v18  ;;  %v3306_v20 = vunpack.i.l.bf16 %v3305_v18  ;;  %v3302_v41 = vunpack.i.h.bf16 %v3300_v28  ;;  %v3301_v3 = vunpack.i.l.bf16 %v3300_v28 }
 0x47d   :  { %3062 = vmatprep.subr.bf16.mxu0 %v3061_v25 }
 0x47e   :  { %v1333_v27 = vsel %vm1332_vm13, %v3306_v20, %v3296_v23  ;;  %v1259_v37 = vsel %vm1258_vm9, %v3301_v3, %v3291_v40  ;;  %v1335_v44 = vsel %vm1332_vm13, %v3297_v31, %v3307_v13  ;;  %v1261_v53 = vsel %vm1258_vm9, %v3292_v63, %v3302_v41 }
 0x47f   :  { %v3063_v22 = vpack.c.bf16 %v1333_v27, %v1259_v37  ;;  %v1331_v60 = vpop.permute.xlu1 %1330  ;;  %v1257_v15 = vpop.permute.xlu0 %1256  ;;  %v3111_v49 = vpack.c.bf16 %v1335_v44, %v1261_v53 }
 0x480   :  { %v1336_v0 = vsel %vm1332_vm13, %v3307_v13, %v1331_v60  ;;  %v1262_v5 = vsel %vm1258_vm9, %v3302_v41, %v1257_v15  ;;  %vm5681_vm13 = vcmask 900096  }
 0x481   :  { %v3109_v43 = vpack.c.bf16 %v1336_v0, %v1262_v5  ;;  %3064 = vmatpush1.bf16.msra.mxu0 %v3063_v22 }
 0x483   :  { %v3315_v57 = vpop.permute.xlu1 %3314  ;;  %v3310_v4 = vpop.permute.xlu0 %3309  ;;  %3110 = vmatprep.subr.bf16.mxu1 %v3109_v43 }
 0x484   :  { %v3317_v16 = vunpack.i.h.bf16 %v3315_v57  ;;  %v3316_v32 = vunpack.i.l.bf16 %v3315_v57  ;;  %v3312_v26 = vunpack.i.h.bf16 %v3310_v4  ;;  %v3311_v1 = vunpack.i.l.bf16 %v3310_v4  ;;  %3112 = vmatpush1.bf16.msra.mxu1 %v3111_v49 }
 0x486   :  { %v1406_v10 = vsel %vm105_vm7, %v3311_v1, %v3312_v26  ;;  %v1478_v24 = vsel %vm179_vm5, %v3316_v32, %v3317_v16 }
 0x487   :  { %v3325_v34 = vpop.permute.xlu1 %3324  ;;  %v3320_v9 = vpop.permute.xlu0 %3319  ;;  %v3065_v7 = vpack.c.bf16 %v1478_v24, %v1406_v10 }
 0x488   :  { %v3327_v52 = vunpack.i.h.bf16 %v3325_v34  ;;  %v3326_v30 = vunpack.i.l.bf16 %v3325_v34  ;;  %v3322_v35 = vunpack.i.h.bf16 %v3320_v9  ;;  %v3321_v58 = vunpack.i.l.bf16 %v3320_v9 }
 0x489   :  { %3066 = vmatprep.subr.bf16.mxu0 %v3065_v7 }
 0x48a   :  { %v1477_v56 = vsel %vm179_vm5, %v3326_v30, %v3316_v32  ;;  %v1405_v61 = vsel %vm105_vm7, %v3321_v58, %v3311_v1  ;;  %v1479_v2 = vsel %vm179_vm5, %v3317_v16, %v3327_v52  ;;  %v1407_v21 = vsel %vm105_vm7, %v3312_v26, %v3322_v35 }
 0x48b   :  { %v3067_v42 = vpack.c.bf16 %v1477_v56, %v1405_v61  ;;  %v1476_v62 = vpop.permute.xlu1 %1475  ;;  %v1404_v12 = vpop.permute.xlu0 %1403  ;;  %v3115_v8 = vpack.c.bf16 %v1479_v2, %v1407_v21 }
 0x48c   :  { %v1480_v29 = vsel %vm179_vm5, %v3327_v52, %v1476_v62  ;;  %v1408_v46 = vsel %vm105_vm7, %v3322_v35, %v1404_v12  ;;  %v3004_v35 = vld [vmem:[%s5428_s4 + $0x24] ss:$8 sm:$0xf]  ;;  %vm5671_vm5 = vcmask 924672  }
 0x48d   :  { %v3113_v47 = vpack.c.bf16 %v1480_v29, %v1408_v46  ;;  %3068 = vmatpush1.bf16.msra.mxu0 %v3067_v42  ;;  %v5661_v46 = vld [vmem:[#allocation7_spill] sm:$0xff] }
 0x48f   :  { %v3335_v11 = vpop.permute.xlu1 %3334  ;;  %v3330_v38 = vpop.permute.xlu0 %3329  ;;  %3114 = vmatprep.subr.bf16.mxu1 %v3113_v47  ;;  %v1791_v47 = vrot.slane %v3004_v35, %v5661_v46 }
 0x490   :  { %v3337_v51 = vunpack.i.h.bf16 %v3335_v11  ;;  %v3336_v54 = vunpack.i.l.bf16 %v3335_v11  ;;  %v3332_v31 = vunpack.i.h.bf16 %v3330_v38  ;;  %v3331_v23 = vunpack.i.l.bf16 %v3330_v38  ;;  %3116 = vmatpush1.bf16.msra.mxu1 %v3115_v8  ;;  %v5662_v11 = vld [vmem:[#allocation6_spill] sm:$0xff] }
 0x491   :  { %v1799_v38 = vrot.slane %v3004_v35, %v5662_v11 }
 0x492   :  { %v1550_v63 = vsel %vm253_vm6, %v3331_v23, %v3332_v31  ;;  %v1624_v40 = vsel %vm1622_vm8, %v3336_v54, %v3337_v51 }
 0x493   :  { %v3345_v19 = vpop.permute.xlu1 %3344  ;;  %v3340_v14 = vpop.permute.xlu0 %3339  ;;  %v3069_v18 = vpack.c.bf16 %v1624_v40, %v1550_v63 }
 0x494   :  { %v3347_v28 = vunpack.i.h.bf16 %v3345_v19  ;;  %v3346_v25 = vunpack.i.l.bf16 %v3345_v19  ;;  %v3342_v13 = vunpack.i.h.bf16 %v3340_v14  ;;  %v3341_v20 = vunpack.i.l.bf16 %v3340_v14 }
 0x495   :  { %3070 = vmatprep.subr.bf16.mxu0 %v3069_v18 }
 0x496   :  { %v1623_v41 = vsel %vm1622_vm8, %v3346_v25, %v3336_v54  ;;  %v1549_v3 = vsel %vm253_vm6, %v3341_v20, %v3331_v23  ;;  %v1625_v27 = vsel %vm1622_vm8, %v3337_v51, %v3347_v28  ;;  %v1551_v37 = vsel %vm253_vm6, %v3332_v31, %v3342_v13  ;;  %v5663_v51 = vld [vmem:[#allocation8_spill] sm:$0xff]  ;;  %v5664_v31 = vld [vmem:[#allocation9_spill] sm:$0xff] }
 0x497   :  { %v3071_v44 = vpack.c.bf16 %v1623_v41, %v1549_v3  ;;  %v1621_v53 = vpop.permute.xlu1 %1620  ;;  %v1548_v22 = vpop.permute.xlu0 %1547  ;;  %v3119_v5 = vpack.c.bf16 %v1625_v27, %v1551_v37  ;;  %v1795_v54 = vrot.slane %v3004_v35, %v5663_v51  ;;  %v1803_v23 = vrot.slane %v3004_v35, %v5664_v31 }
 0x498   :  { %v1626_v60 = vsel %vm1622_vm8, %v3347_v28, %v1621_v53  ;;  %v1552_v15 = vsel %vm253_vm6, %v3342_v13, %v1548_v22  ;;  %v1808_v13 = vmul.f32 %v1791_v47, %v4583_v55  ;;  %v1810_v20 = vmul.f32 %v1799_v38, %v4587_v17  ;;  %v5665_v53 = vld [vmem:[#allocation65_spill] sm:$0xff] }
 0x499   :  { %v3117_v0 = vpack.c.bf16 %v1626_v60, %v1552_v15  ;;  %3072 = vmatpush1.bf16.msra.mxu0 %v3071_v44  ;;  %v1809_v41 = vmul.f32 %v1795_v54, %v4585_v33  ;;  %v1811_v3 = vmul.f32 %v1803_v23, %v4679_v39  ;;  %vm5672_vm6 = vcmask 916480  }
 0x49a   :  { %vm5675_vm8 = vmmov %vm5672_vm6 }
 0x49b   :  { %v3355_v43 = vpop.permute.xlu1 %3354  ;;  %v3350_v49 = vpop.permute.xlu0 %3349  ;;  %3118 = vmatprep.subr.bf16.mxu1 %v3117_v0  ;;  %vm5676_vm9 = vmmov %vm5672_vm6 }
 0x49c   :  { %v3357_v57 = vunpack.i.h.bf16 %v3355_v43  ;;  %v3356_v4 = vunpack.i.l.bf16 %v3355_v43  ;;  %v3352_v16 = vunpack.i.h.bf16 %v3350_v49  ;;  %v3351_v32 = vunpack.i.l.bf16 %v3350_v49  ;;  %3120 = vmatpush1.bf16.msra.mxu1 %v3119_v5  ;;  %vm5679_vm11 = vmmov %vm5672_vm6 }
 0x49e   :  { %v1698_v26 = vsel %vm1696_vm15, %v3351_v32, %v3352_v16  ;;  %v1770_v1 = vsel %vm327_vm4, %v3356_v4, %v3357_v57 }
 0x49f   :  { %v3365_v10 = vpop.permute.xlu1 %3364  ;;  %v3360_v24 = vpop.permute.xlu0 %3359  ;;  %v3073_v34 = vpack.c.bf16 %v1770_v1, %v1698_v26 }
 0x4a0   :  { %v3367_v9 = vunpack.i.h.bf16 %v3365_v10  ;;  %v3366_v7 = vunpack.i.l.bf16 %v3365_v10  ;;  %v3362_v52 = vunpack.i.h.bf16 %v3360_v24  ;;  %v3361_v30 = vunpack.i.l.bf16 %v3360_v24 }
 0x4a1   :  { %3074 = vmatprep.subr.bf16.mxu0 %v3073_v34 }
 0x4a2   :  { %v1769_v58 = vsel %vm327_vm4, %v3366_v7, %v3356_v4  ;;  %v1697_v56 = vsel %vm1696_vm15, %v3361_v30, %v3351_v32  ;;  %v1771_v61 = vsel %vm327_vm4, %v3357_v57, %v3367_v9  ;;  %v1699_v2 = vsel %vm1696_vm15, %v3352_v16, %v3362_v52 }
 0x4a3   :  { %v3075_v21 = vpack.c.bf16 %v1769_v58, %v1697_v56  ;;  %v1768_v42 = vpop.permute.xlu1 %1767  ;;  %v1695_v62 = vpop.permute.xlu0 %1694  ;;  %v3123_v63 = vpack.c.bf16 %v1771_v61, %v1699_v2 }
 0x4a4   :  { %v1772_v12 = vsel %vm327_vm4, %v3367_v9, %v1768_v42  ;;  %v1700_v29 = vsel %vm1696_vm15, %v3362_v52, %v1695_v62  ;;  %vm5670_vm4 = vmmov %vm5666_vm1 }
 0x4a5   :  { %v3121_v8 = vpack.c.bf16 %v1772_v12, %v1700_v29  ;;  %3076 = vmatpush1.bf16.msra.mxu0 %v3075_v21  ;;  %v5669_v21 = vld [vmem:[#allocation66_spill] sm:$0xff]  ;;  %vm5683_vm15 = vmmov %vm5680_vm12 }
 0x4a7   :  { %v3375_v40 = vpop.permute.xlu1 %3374  ;;  %v3370_v19 = vpop.permute.xlu0 %3369  ;;  %3122 = vmatprep.subr.bf16.mxu1 %v3121_v8 }
 0x4a8   :  { %v3377_v14 = vunpack.i.h.bf16 %v3375_v40  ;;  %v3376_v18 = vunpack.i.l.bf16 %v3375_v40  ;;  %v3372_v28 = vunpack.i.h.bf16 %v3370_v19  ;;  %v3371_v25 = vunpack.i.l.bf16 %v3370_v19  ;;  %3124 = vmatpush1.bf16.msra.mxu1 %v3123_v63 }
 0x4aa   :  { %v1878_v27 = vsel %vm298_vm3, %v3372_v28, %v3377_v14  ;;  %v1876_v37 = vsel %vm298_vm3, %v3376_v18, %v3371_v25  ;;  %v1877_v44 = vsel %vm298_vm3, %v3371_v25, %v3372_v28  ;;  %v1879_v22 = vsel %vm298_vm3, %v3377_v14, %v5665_v53  ;;  %vm5668_vm3 = vmmov %vm5666_vm1 }
 0x4ab   :  { %v3127_v60 = vpack.c.bf16 %v1878_v27, %v1810_v20  ;;  %v3079_v15 = vpack.c.bf16 %v1876_v37, %v1808_v13  ;;  %v3380_v0 = vpop.permute.xlu1 %3379  ;;  %v3385_v5 = vpop.permute.xlu0 %3384  ;;  %v3077_v55 = vpack.c.bf16 %v1877_v44, %v1809_v41  ;;  %v3125_v43 = vpack.c.bf16 %v1879_v22, %v1811_v3  ;;  %v5678_v3 = vld [vmem:[#allocation67_spill] sm:$0xff] }
 0x4ac   :  { %v3382_v17 = vunpack.i.h.bf16 %v3380_v0  ;;  %v3381_v49 = vunpack.i.l.bf16 %v3380_v0  ;;  %v3387_v33 = vunpack.i.h.bf16 %v3385_v5  ;;  %v3386_v57 = vunpack.i.l.bf16 %v3385_v5 }
 0x4ad   :  { %3078 = vmatprep.subr.bf16.mxu0 %v3077_v55  ;;  %3126 = vmatprep.subr.bf16.mxu1 %v3125_v43 }
 0x4ae   :  { %3080 = vmatpush1.bf16.msra.mxu0 %v3079_v15  ;;  %3128 = vmatpush1.bf16.msra.mxu1 %v3127_v60  ;;  %v1949_v39 = vsel %vm1667_vm0, %v3381_v49, %v3382_v17  ;;  %v2021_v4 = vsel %vm5666_vm1, %v3386_v57, %v3387_v33  ;;  %vm5684_vm1 = vmmov %vm5681_vm13 }
 0x4af   :  { %v3390_v16 = vpop.permute.xlu1 %3389  ;;  %v3395_v32 = vpop.permute.xlu0 %3394  ;;  %v3081_v26 = vpack.c.bf16 %v2021_v4, %v1949_v39 }
 0x4b0   :  { %v3392_v1 = vunpack.i.h.bf16 %v3390_v16  ;;  %v3391_v10 = vunpack.i.l.bf16 %v3390_v16  ;;  %v3397_v24 = vunpack.i.h.bf16 %v3395_v32  ;;  %v3396_v34 = vunpack.i.l.bf16 %v3395_v32 }
 0x4b1   :  { %3082 = vmatprep.subr.bf16.mxu0 %v3081_v26 }
 0x4b2   :  { %v1948_v9 = vsel %vm1667_vm0, %v3391_v10, %v3381_v49  ;;  %v1950_v7 = vsel %vm1667_vm0, %v3382_v17, %v3392_v1  ;;  %v2020_v52 = vsel %vm5667_vm2, %v3396_v34, %v3386_v57  ;;  %v2022_v30 = vsel %vm5668_vm3, %v3387_v33, %v3397_v24  ;;  %vm5685_vm2 = vmmov %vm5684_vm1  ;;  %v5687_v34 = vld [vmem:[#allocation68_spill] sm:$0xff] }
 0x4b3   :  { %v3083_v35 = vpack.c.bf16 %v2020_v52, %v1948_v9  ;;  %v3131_v58 = vpack.c.bf16 %v2022_v30, %v1950_v7  ;;  %v3400_v56 = vpop.permute.xlu1 %3399  ;;  %v3405_v61 = vpop.permute.xlu0 %3404  ;;  %v1951_v2 = vsel %vm1667_vm0, %v3392_v1, %v5216_v36  ;;  %v2023_v42 = vsel %vm5670_vm4, %v3397_v24, %v5669_v21  ;;  %vm5673_vm0 = vmmov %vm5671_vm5 }
 0x4b4   :  { %v3402_v62 = vunpack.i.h.bf16 %v3400_v56  ;;  %v3401_v12 = vunpack.i.l.bf16 %v3400_v56  ;;  %v3407_v29 = vunpack.i.h.bf16 %v3405_v61  ;;  %v3406_v46 = vunpack.i.l.bf16 %v3405_v61  ;;  %vm5674_vm7 = vmmov %vm5673_vm0 }
 0x4b5   :  { %3084 = vmatpush1.bf16.msra.mxu0 %v3083_v35  ;;  %v3129_v47 = vpack.c.bf16 %v2023_v42, %v1951_v2  ;;  %vm5677_vm10 = vmmov %vm5673_vm0 }
 0x4b6   :  { %v2093_v8 = vsel %vm5671_vm5, %v3401_v12, %v3402_v62  ;;  %v2165_v11 = vsel %vm5672_vm6, %v3406_v46, %v3407_v29  ;;  %vm5686_vm3 = vmmov %vm5680_vm12  ;;  %vm5689_vm5 = vcmask 801792   ;;  %vm5690_vm6 = vcmask 793600  }
 0x4b7   :  { %3130 = vmatprep.subr.bf16.mxu1 %v3129_v47  ;;  %v3410_v38 = vpop.permute.xlu1 %3409  ;;  %v3415_v51 = vpop.permute.xlu0 %3414  ;;  %v3085_v54 = vpack.c.bf16 %v2165_v11, %v2093_v8  ;;  %vm5688_vm4 = vmmov %vm5684_vm1 }
 0x4b8   :  { %3132 = vmatpush1.bf16.msra.mxu1 %v3131_v58  ;;  %v3412_v31 = vunpack.i.h.bf16 %v3410_v38  ;;  %v3411_v36 = vunpack.i.l.bf16 %v3410_v38  ;;  %v3417_v23 = vunpack.i.h.bf16 %v3415_v51  ;;  %v3416_v63 = vunpack.i.l.bf16 %v3415_v51 }
 0x4b9   :  { %3086 = vmatprep.subr.bf16.mxu0 %v3085_v54 }
 0x4ba   :  { %v2092_v40 = vsel %vm5673_vm0, %v3411_v36, %v3401_v12  ;;  %v2094_v19 = vsel %vm5674_vm7, %v3402_v62, %v3412_v31  ;;  %v2164_v14 = vsel %vm5675_vm8, %v3416_v63, %v3406_v46  ;;  %v2166_v18 = vsel %vm5676_vm9, %v3407_v29, %v3417_v23  ;;  %vm5691_vm0 = vmmov %vm5689_vm5 }
 0x4bb   :  { %v3087_v28 = vpack.c.bf16 %v2164_v14, %v2092_v40  ;;  %v3135_v25 = vpack.c.bf16 %v2166_v18, %v2094_v19  ;;  %v3420_v13 = vpop.permute.xlu1 %3419  ;;  %v3425_v20 = vpop.permute.xlu0 %3424  ;;  %v2095_v41 = vsel %vm5677_vm10, %v3412_v31, %v5226_v50  ;;  %v2167_v27 = vsel %vm5679_vm11, %v3417_v23, %v5678_v3  ;;  %vm5692_vm7 = vmmov %vm5691_vm0  ;;  %v5696_v23 = vld [vmem:[#allocation69_spill] sm:$0xff] }
 0x4bc   :  { %v3422_v37 = vunpack.i.h.bf16 %v3420_v13  ;;  %v3421_v44 = vunpack.i.l.bf16 %v3420_v13  ;;  %v3427_v53 = vunpack.i.h.bf16 %v3425_v20  ;;  %v3426_v22 = vunpack.i.l.bf16 %v3425_v20  ;;  %vm5693_vm8 = vmmov %vm5690_vm6 }
 0x4bd   :  { %3088 = vmatpush1.bf16.msra.mxu0 %v3087_v28  ;;  %v3133_v60 = vpack.c.bf16 %v2167_v27, %v2095_v41  ;;  %vm5694_vm9 = vmmov %vm5690_vm6 }
 0x4be   :  { %v2237_v15 = vsel %vm5680_vm12, %v3421_v44, %v3422_v37  ;;  %v2309_v0 = vsel %vm5681_vm13, %v3426_v22, %v3427_v53  ;;  %vm5695_vm10 = vmmov %vm5691_vm0  ;;  %vm5698_vm12 = vcmask 785408   ;;  %vm5699_vm13 = vcmask 777216  }
 0x4bf   :  { %3134 = vmatprep.subr.bf16.mxu1 %v3133_v60  ;;  %v3430_v5 = vpop.permute.xlu1 %3429  ;;  %v3435_v55 = vpop.permute.xlu0 %3434  ;;  %v3089_v43 = vpack.c.bf16 %v2309_v0, %v2237_v15  ;;  %vm5697_vm11 = vmmov %vm5690_vm6 }
 0x4c0   :  { %3136 = vmatpush1.bf16.msra.mxu1 %v3135_v25  ;;  %v3432_v17 = vunpack.i.h.bf16 %v3430_v5  ;;  %v3431_v50 = vunpack.i.l.bf16 %v3430_v5  ;;  %v3437_v49 = vunpack.i.h.bf16 %v3435_v55  ;;  %v3436_v33 = vunpack.i.l.bf16 %v3435_v55 }
 0x4c1   :  { %3090 = vmatprep.subr.bf16.mxu0 %v3089_v43 }
 0x4c2   :  { %v2236_v57 = vsel %vm5682_vm14, %v3431_v50, %v3421_v44  ;;  %v2238_v39 = vsel %vm5683_vm15, %v3422_v37, %v3432_v17  ;;  %v2308_v4 = vsel %vm5684_vm1, %v3436_v33, %v3426_v22  ;;  %v2310_v16 = vsel %vm5685_vm2, %v3427_v53, %v3437_v49  ;;  %vm5700_vm14 = vmmov %vm5698_vm12 }
 0x4c3   :  { %v3091_v32 = vpack.c.bf16 %v2308_v4, %v2236_v57  ;;  %v3139_v26 = vpack.c.bf16 %v2310_v16, %v2238_v39  ;;  %v3440_v1 = vpop.permute.xlu1 %3439  ;;  %v3445_v10 = vpop.permute.xlu0 %3444  ;;  %v2239_v24 = vsel %vm5686_vm3, %v3432_v17, %v5236_v59  ;;  %v2311_v9 = vsel %vm5688_vm4, %v3437_v49, %v5687_v34  ;;  %vm5701_vm15 = vmmov %vm5698_vm12  ;;  %v2680_v39 = vld [vmem:[%s5431_s2] sm:$0xff] }
 0x4c4   :  { %v3442_v7 = vunpack.i.h.bf16 %v3440_v1  ;;  %v3441_v52 = vunpack.i.l.bf16 %v3440_v1  ;;  %v3447_v30 = vunpack.i.h.bf16 %v3445_v10  ;;  %v3446_v35 = vunpack.i.l.bf16 %v3445_v10  ;;  %vm5702_vm1 = vmmov %vm5699_vm13 }
 0x4c5   :  { %3092 = vmatpush1.bf16.msra.mxu0 %v3091_v32  ;;  %v3137_v58 = vpack.c.bf16 %v2311_v9, %v2239_v24  ;;  %vm5703_vm2 = vmmov %vm5702_vm1 }
 0x4c6   :  { %v2381_v56 = vsel %vm5689_vm5, %v3441_v52, %v3442_v7  ;;  %v2453_v61 = vsel %vm5690_vm6, %v3446_v35, %v3447_v30  ;;  %vm5704_vm3 = vmmov %vm5698_vm12  ;;  %vm5706_vm5 = vcmask 769024  }
 0x4c7   :  { %3138 = vmatprep.subr.bf16.mxu1 %v3137_v58  ;;  %v3450_v2 = vpop.permute.xlu1 %3449  ;;  %v3455_v21 = vpop.permute.xlu0 %3454  ;;  %v3093_v42 = vpack.c.bf16 %v2453_v61, %v2381_v56  ;;  %vm5705_vm4 = vmmov %vm5702_vm1 }
 0x4c8   :  { %3140 = vmatpush1.bf16.msra.mxu1 %v3139_v26  ;;  %v3452_v62 = vunpack.i.h.bf16 %v3450_v2  ;;  %v3451_v59 = vunpack.i.l.bf16 %v3450_v2  ;;  %v3457_v12 = vunpack.i.h.bf16 %v3455_v21  ;;  %v3456_v29 = vunpack.i.l.bf16 %v3455_v21  ;;  %vm5707_vm6 = vmmov %vm5706_vm5 }
 0x4c9   :  { %3094 = vmatprep.subr.bf16.mxu0 %v3093_v42 }
 0x4ca   :  { %v2380_v46 = vsel %vm5691_vm0, %v3451_v59, %v3441_v52  ;;  %v2382_v47 = vsel %vm5692_vm7, %v3442_v7, %v3452_v62  ;;  %v2452_v8 = vsel %vm5693_vm8, %v3456_v29, %v3446_v35  ;;  %v2454_v11 = vsel %vm5694_vm9, %v3447_v30, %v3457_v12  ;;  %vm5708_vm0 = vmmov %vm5706_vm5 }
 0x4cb   :  { %v3095_v38 = vpack.c.bf16 %v2452_v8, %v2380_v46  ;;  %v3143_v51 = vpack.c.bf16 %v2454_v11, %v2382_v47  ;;  %v3460_v54 = vpop.permute.xlu1 %3459  ;;  %v3465_v31 = vpop.permute.xlu0 %3464  ;;  %v2383_v36 = vsel %vm5695_vm10, %v3452_v62, %v5246_v48  ;;  %v2455_v63 = vsel %vm5697_vm11, %v3457_v12, %v5696_v23  ;;  %vm5709_vm7 = vmmov %vm5708_vm0  ;;  %v2947_v46 = vld [vmem:[%s5432_s6] sm:$0xff] }
 0x4cc   :  { %v3462_v40 = vunpack.i.h.bf16 %v3460_v54  ;;  %v3461_v19 = vunpack.i.l.bf16 %v3460_v54  ;;  %v3467_v14 = vunpack.i.h.bf16 %v3465_v31  ;;  %v3466_v18 = vunpack.i.l.bf16 %v3465_v31 }
 0x4cd   :  { %3096 = vmatpush1.bf16.msra.mxu0 %v3095_v38  ;;  %v3141_v28 = vpack.c.bf16 %v2455_v63, %v2383_v36  ;;  %v5710_v54 = vmov 1  }
 0x4ce   :  { %v2525_v25 = vsel %vm5698_vm12, %v3461_v19, %v3462_v40  ;;  %v2597_v13 = vsel %vm5699_vm13, %v3466_v18, %v3467_v14 }
 0x4cf   :  { %3142 = vmatprep.subr.bf16.mxu1 %v3141_v28  ;;  %v3470_v20 = vpop.permute.xlu1 %3469  ;;  %v3475_v41 = vpop.permute.xlu0 %3474  ;;  %v3097_v3 = vpack.c.bf16 %v2597_v13, %v2525_v25 }
 0x4d0   :  { %3144 = vmatpush1.bf16.msra.mxu1 %v3143_v51  ;;  %v3472_v27 = vunpack.i.h.bf16 %v3470_v20  ;;  %v3471_v48 = vunpack.i.l.bf16 %v3470_v20  ;;  %v3477_v37 = vunpack.i.h.bf16 %v3475_v41  ;;  %v3476_v44 = vunpack.i.l.bf16 %v3475_v41 }
 0x4d1   :  { %3098 = vmatprep.subr.bf16.mxu0 %v3097_v3 }
 0x4d2   :  { %v2524_v53 = vsel %vm5700_vm14, %v3471_v48, %v3461_v19  ;;  %v2526_v22 = vsel %vm5701_vm15, %v3462_v40, %v3472_v27  ;;  %v2596_v60 = vsel %vm5702_vm1, %v3476_v44, %v3466_v18  ;;  %v2598_v15 = vsel %vm5703_vm2, %v3467_v14, %v3477_v37 }
 0x4d3   :  { %v3099_v0 = vpack.c.bf16 %v2596_v60, %v2524_v53  ;;  %v3147_v5 = vpack.c.bf16 %v2598_v15, %v2526_v22  ;;  %v2661_v55 = vpop.permute.xlu1 %2660  ;;  %v2663_v43 = vpop.permute.xlu0 %2662  ;;  %v2527_v17 = vsel %vm5704_vm3, %v3472_v27, %v5261_v6  ;;  %v2599_v50 = vsel %vm5705_vm4, %v3477_v37, %v5256_v45 }
 0x4d4   :  { %v3145_v49 = vpack.c.bf16 %v2599_v50, %v2527_v17  ;;  %v2669_v33 = vsel %vm5706_vm5, %v2661_v55, %v2663_v43 }
 0x4d5   :  { %3100 = vmatpush1.bf16.msra.mxu0 %v3099_v0 }
 0x4d6   :  { %3146 = vmatprep.subr.bf16.mxu1 %v3145_v49  ;;  %2833 = vmatprep.subr.mxu0 %v2669_v33 }
 0x4d7   :  { %3148 = vmatpush1.bf16.msra.mxu1 %v3147_v5  ;;  %v2659_v57 = vpop.permute.xlu1 %2658  ;;  %v2665_v16 = vpop.permute.xlu0 %2664 }
 0x4d8   :  { %v2668_v4 = vsel %vm5707_vm6, %v2659_v57, %v2661_v55  ;;  %v2670_v32 = vsel %vm5709_vm7, %v2663_v43, %v2665_v16 }
 0x4d9   :  { %2834 = vmatpush1.msra.mxu0 %v2668_v4 }
 0x4da   :  { %2850 = vmatmul.mubr.f32.vlgmr.msra.gmra.mrb[2].mxu0 %v2680_v39 }
 0x4db   :  { %v2667_v6 = vpop.permute.xlu1 %2666 }
 0x4dc   :  { %v2671_v45 = vsel %vm5708_vm0, %v2665_v16, %v2667_v6 }
 0x4dd   :  { %2904 = vmatprep.subr.mxu1 %v2671_v45 }
 0x4de   :  { %2905 = vmatpush1.msra.mxu1 %v2670_v32 }
 0x4df   :  { %2921 = vmatmul.mubr.f32.vlgmr.msra.gmra.mrb[2].mxu1 %v2680_v39 }
 0x5ad   :  { %v2851_v26 = vpop.f32.mrb[2].mxu0 }
 0x5ae   :  { %v2853_v1 = vpop.f32.mrb[3].mxu0 }
 0x5af   :  { %v2927_v10 = vadd.f32 %v2853_v1, %v2851_v26 }
 0x5b2   :  { %v2922_v24 = vpop.f32.mrb[2].mxu1 }
 0x5b3   :  { %v2928_v34 = vadd.f32 %v2927_v10, %v2922_v24  ;;  %v2924_v9 = vpop.f32.mrb[3].mxu1 }
 0x5b5   :  { %v2929_v7 = vadd.f32 %v2928_v34, %v2924_v9 }
 0x5b7   :  { %2930 = vadd.xlane.f32.xlu0 %v2929_v7 }
 0x644   :  { %v2931_v52 = vpop.xlane.xlu0 %2930 }
 0x645   :  { %v2932_v30 = vmul.f32 0.001953125, %v2931_v52 }
 0x647   :  { %v2933_v35 = vsub.f32 %v2851_v26, %v2932_v30  ;;  %v2934_v58 = vsub.f32 %v2853_v1, %v2932_v30  ;;  %v2935_v56 = vsub.f32 %v2922_v24, %v2932_v30  ;;  %v2936_v61 = vsub.f32 %v2924_v9, %v2932_v30 }
 0x649   :  { %v2937_v2 = vmul.f32 %v2933_v35, %v2933_v35  ;;  %v2938_v21 = vmul.f32 %v2934_v58, %v2934_v58  ;;  %v2939_v42 = vmul.f32 %v2935_v56, %v2935_v56  ;;  %v2940_v59 = vmul.f32 %v2936_v61, %v2936_v61 }
 0x64b   :  { %v2941_v62 = vadd.f32 %v2938_v21, %v2937_v2 }
 0x64d   :  { %v2942_v12 = vadd.f32 %v2941_v62, %v2939_v42 }
 0x64f   :  { %v2943_v29 = vadd.f32 %v2942_v12, %v2940_v59 }
 0x651   :  { %2944 = vadd.xlane.f32.xlu1 %v2943_v29 }
 0x662   :  { %2962 = vperm.xlu1 %3246, %v2947_v46  }
 0x6de   :  { %v2945_v47 = vpop.xlane.xlu1 %2944 }
 0x6df   :  { %v2946_v8 = vmul.f32 0.001953125, %v2945_v47 }
 0x6e1   :  { %v2948_v11 = vadd.f32 1e-05, %v2946_v8 }
 0x6e2   :  { %v2963_v19 = vpop.permute.xlu1 %2962 }
 0x6e3   :  { %3483 = vrsqrt.f32 %v2948_v11 }
 0x6ed   :  { %v3484_v38 = vpop.eup %3483 }
 0x6ee   :  { %v2950_v51 = vmul.f32 %v3484_v38, %v2947_v46 }
 0x6f0   :  { %2953 = vperm.xlu0 %3247, %v2950_v51  }
 0x6f4   :  { %3478 = vset.pattern.permute.xlu0 %v5710_v54 }
 0x76f   :  { %v2954_v31 = vpop.permute.xlu0 %2953 }
 0x770   :  { %v2956_v36 = vmul.f32 %v2954_v31, %v2933_v35  ;;  %v2957_v23 = vmul.f32 %v2954_v31, %v2934_v58  ;;  %v2958_v63 = vmul.f32 %v2954_v31, %v2935_v56  ;;  %v2959_v40 = vmul.f32 %v2954_v31, %v2936_v61 }
 0x772   :  { %v2965_v14 = vadd.f32 %v2963_v19, %v2956_v36  ;;  %v2966_v18 = vadd.f32 %v2963_v19, %v2957_v23  ;;  %v2967_v28 = vadd.f32 %v2963_v19, %v2958_v63  ;;  %v2968_v25 = vadd.f32 %v2963_v19, %v2959_v40 }
 0x774   :  { %v2969_v13 = vmax.f32 %v2965_v14, 0.0  ;;  %v2970_v20 = vmax.f32 %v2966_v18, 0.0  ;;  %v2971_v41 = vmax.f32 %v2967_v28, 0.0  ;;  %v2972_v3 = vmax.f32 %v2968_v25, 0.0 }
 0x776   :  { %2973 = vst [vmem:[%s5433_s7] sm:$0xff] %v2969_v13  ;;  %2974 = vst [vmem:[%s5433_s7 + $0x8] sm:$0xff] %v2970_v20 }
 0x777   :  { %3019 = vst [vmem:[%s5433_s7 + $0x10] sm:$0xff] %v2971_v41  ;;  %3020 = vst [vmem:[%s5433_s7 + $0x18] sm:$0xff] %v2972_v3 }

</bundles_post_ra>
